<compile_context>
chip_gen: v7x
topology: tpu7x:2x2x1
jax: 0.10.0
libtpu: 0.0.40
codegen_flags: <defaults>
</compile_context>

<pallas_src>
import math

import jax
import jax.numpy as jnp
from jax.experimental import pallas as pl
from jax.experimental.pallas import tpu as pltpu

HID = 64  # fixed hidden width of the module


# ---------------------------------------------------------------------------
# elementwise helpers (used inside the kernel)
# ---------------------------------------------------------------------------
def _erf(x):
    # Abramowitz & Stegun 7.1.26 polynomial approximation of erf, |err| < 1.5e-7.
    a1, a2, a3, a4, a5 = 0.254829592, -0.284496736, 1.421413741, -1.453152027, 1.061405429
    p = 0.3275911
    sign = jnp.where(x >= 0.0, 1.0, -1.0)
    ax = jnp.abs(x)
    t = 1.0 / (1.0 + p * ax)
    poly = ((((a5 * t + a4) * t + a3) * t + a2) * t + a1) * t
    return sign * (1.0 - poly * jnp.exp(-ax * ax))


def _gelu(x):
    # exact GELU (erf formulation), matching torch.nn.GELU() default.
    return 0.5 * x * (1.0 + _erf(x * 0.7071067811865476))


def _layer_norm(x, g, b, eps=1e-5):
    mu = jnp.mean(x, axis=-1, keepdims=True)
    var = jnp.mean(jnp.square(x - mu), axis=-1, keepdims=True)
    return (x - mu) * jax.lax.rsqrt(var + eps) * g + b


# ---------------------------------------------------------------------------
# Pallas forward
# ---------------------------------------------------------------------------
def v_network_forward(states, actions, params, num_heads, *,
                      batch_tile=128, use_bf16_matmul=False):
    """Returns (V_value (B,N), weights (B,H,N,N), score (B,H,N,1,N-1))."""
    B, N, obs_dim = states.shape
    act_dim = actions.shape[-1]
    H = num_heads
    DH = HID // H
    f32 = jnp.float32
    inv_sqrt_dk = 1.0 / math.sqrt(float(HID))        # reference divides by sqrt(d_k=64)

    # ---- batch tiling: grid over batch tiles, not single samples ----
    TB = int(min(B, batch_tile))
    Bp = ((B + TB - 1) // TB) * TB
    if Bp != B:
        pad = Bp - B
        states = jnp.concatenate(
            [states, jnp.zeros((pad, N, obs_dim), states.dtype)], axis=0)
        actions = jnp.concatenate(
            [actions, jnp.zeros((pad, N, act_dim), actions.dtype)], axis=0)
    # agent-major layout so the kernel only needs leading-dim indexing (no reshapes)
    states_am = jnp.transpose(states, (1, 0, 2))     # (N, Bp, obs)
    actions_am = jnp.transpose(actions, (1, 0, 2))   # (N, Bp, act)

    # ---- packed lane-dense output layout ----
    F_v = N                      # V value per agent
    F_w = H * N * N              # attention weights (self weight re-inserted as 1)
    F_s = H * N * N              # raw scores (self column written as 0, dropped later)
    F_used = F_v + F_w + F_s
    F_pad = ((F_used + 127) // 128) * 128

    R = N * TB                   # rows of the fused 2-D work arrays

    def mm(x, w):
        if use_bf16_matmul:      # optional v6e/v7x MXU-friendly operand cast (f32 accumulate)
            x = x.astype(jnp.bfloat16)
            w = w.astype(jnp.bfloat16)
        return jnp.dot(x, w, preferred_element_type=f32)

    def kernel(states_ref, actions_ref,
               wse_ref, bse_ref, wsa_ref, bsa_ref,
               wkq_ref, bkq_ref, wv_ref, bv_ref,
               g1_ref, be1_ref, wavl_ref, bavl_ref,
               g2_ref, be2_ref, wc_ref, bc_ref,
               wv1_ref, bv1_ref, wv2_ref, bv2_ref,
               out_ref):
        # agent-major 2-D stacks: row n*TB + t == (agent n, sample t)
        s_all = jnp.concatenate([states_ref[n] for n in range(N)], axis=0)    # (R, obs)
        a_all = jnp.concatenate([actions_ref[n] for n in range(N)], axis=0)   # (R, act)
        sa_all = jnp.concatenate([s_all, a_all], axis=-1)                     # (R, obs+act)

        # shared embeddings, computed once per agent (no self-loop duplication)
        sqe = _gelu(mm(s_all, wse_ref[...]) + bse_ref[...])        # (R, 64) query == key embed
        oae = _gelu(mm(sa_all, wsa_ref[...]) + bsa_ref[...])       # (R, 64)

        # fused per-head projections: one (64, 2*H*64) and one (64, 64) matmul
        kq = _gelu(mm(sqe, wkq_ref[...]) + bkq_ref[...])           # (R, 2*H*64)
        vv = _gelu(mm(oae, wv_ref[...]) + bv_ref[...])             # (R, H*DH = 64)

        ones_col = jnp.ones((TB, 1), f32)
        zeros_col = jnp.zeros((TB, 1), f32)

        agg_cols = [[] for _ in range(N)]   # per agent: list of per-head (TB, DH)
        w_flat = []                         # per head: (TB, N*N)
        s_flat = []                         # per head: (TB, N*N)

        for h in range(H):
            kh = kq[:, h * HID:(h + 1) * HID]
            qh = kq[:, (H + h) * HID:(H + h + 1) * HID]
            vh = vv[:, h * DH:(h + 1) * DH]
            k_list = [kh[n * TB:(n + 1) * TB] for n in range(N)]   # (TB, 64) each
            q_list = [qh[n * TB:(n + 1) * TB] for n in range(N)]
            v_list = [vh[n * TB:(n + 1) * TB] for n in range(N)]

            w_rows, s_rows = [], []
            for i in range(N):
                # scaled dot-product scores against the N-1 neighbours
                s_cols = {}
                for j in range(N):
                    if j == i:
                        continue
                    s_cols[j] = jnp.sum(q_list[i] * k_list[j], axis=-1,
                                        keepdims=True) * inv_sqrt_dk          # (TB, 1)
                s_row = jnp.concatenate(
                    [s_cols[j] for j in range(N) if j != i], axis=-1)         # (TB, N-1)
                # softmax over neighbours (hard_attention_weights == 1)
                m = jnp.max(s_row, axis=-1, keepdims=True)
                e = jnp.exp(s_row - m)
                denom = jnp.sum(e, axis=-1, keepdims=True)
                w_row = e * pl.reciprocal(denom, approx=True)                 # (TB, N-1)

                # aggregate values + rebuild full rows (self weight = 1, self score slot = 0)
                agg_ih = None
                w_cols_full, s_cols_full = [], []
                idx = 0
                for j in range(N):
                    if j == i:
                        w_cols_full.append(ones_col)
                        s_cols_full.append(zeros_col)
                    else:
                        w_j = w_row[:, idx:idx + 1]
                        idx += 1
                        w_cols_full.append(w_j)
                        s_cols_full.append(s_cols[j])
                        contrib = w_j * v_list[j]                             # (TB, DH)
                        agg_ih = contrib if agg_ih is None else agg_ih + contrib
                agg_cols[i].append(agg_ih)
                w_rows.append(jnp.concatenate(w_cols_full, axis=-1))          # (TB, N)
                s_rows.append(jnp.concatenate(s_cols_full, axis=-1))          # (TB, N)
            w_flat.append(jnp.concatenate(w_rows, axis=-1))                   # (TB, N*N)
            s_flat.append(jnp.concatenate(s_rows, axis=-1))                   # (TB, N*N)

        # aggregated node features, head-major per agent (matches permute+reshape)
        agg_all = jnp.concatenate(
            [jnp.concatenate(agg_cols[i], axis=-1) for i in range(N)], axis=0)  # (R, 64)

        # sum of obs-action embeddings over the N-1 neighbours: total - self
        oae_list = [oae[n * TB:(n + 1) * TB] for n in range(N)]
        oae_tot = oae_list[0]
        for n in range(1, N):
            oae_tot = oae_tot + oae_list[n]
        oae_sum = jnp.concatenate([oae_tot - oae_list[n] for n in range(N)], axis=0)

        x1 = _layer_norm(oae_sum + agg_all, g1_ref[...], be1_ref[...])        # (R, 64)
        lin = _gelu(mm(x1, wavl_ref[...]) + bavl_ref[...])
        x2 = _layer_norm(x1 + lin, g2_ref[...], be2_ref[...])

        cur = jnp.concatenate([sqe, x2], axis=-1)                             # (R, 128)
        common = _gelu(mm(cur, wc_ref[...]) + bc_ref[...])
        v1 = _gelu(mm(common, wv1_ref[...]) + bv1_ref[...])
        v = mm(v1, wv2_ref[...]) + bv2_ref[...]                               # (R, 1)

        # assemble the lane-dense output slab: [V | weights | scores | zero pad]
        v2d = jnp.concatenate([v[n * TB:(n + 1) * TB] for n in range(N)], axis=-1)  # (TB, N)
        pieces = [v2d] + w_flat + s_flat
        if F_pad > F_used:
            pieces.append(jnp.zeros((TB, F_pad - F_used), f32))
        out_ref[...] = jnp.concatenate(pieces, axis=-1)

    def param_spec(p):
        nd = p.ndim
        return pl.BlockSpec(p.shape, lambda b, _nd=nd: (0,) * _nd)

    in_specs = [
        pl.BlockSpec((N, TB, obs_dim), lambda b: (0, b, 0)),
        pl.BlockSpec((N, TB, act_dim), lambda b: (0, b, 0)),
    ] + [param_spec(p) for p in params]

    out_specs = pl.BlockSpec((TB, F_pad), lambda b: (b, 0))
    out_shape = jax.ShapeDtypeStruct((Bp, F_pad), f32)

    # advisory cost estimate for the XLA scheduler
    rows = Bp * N
    mac = (obs_dim * HID + (obs_dim + act_dim) * HID + HID * (2 * H * HID)
           + HID * HID + HID * HID + 2 * HID * HID + HID * HID + HID)
    flops = 2 * rows * mac + 2 * Bp * H * N * (N - 1) * (HID + DH)
    transcend = rows * (6 * HID + 2 * H * HID) + Bp * H * N * (N - 1)
    bytes_accessed = 4 * (int(states_am.size) + int(actions_am.size)
                          + sum(int(p.size) for p in params) + Bp * F_pad)

    slab = pl.pallas_call(
        kernel,
        out_shape=out_shape,
        grid=(Bp // TB,),
        in_specs=in_specs,
        out_specs=out_specs,
        compiler_params=pltpu.CompilerParams(dimension_semantics=("parallel",)),
        cost_estimate=pl.CostEstimate(flops=int(flops),
                                      transcendentals=int(transcend),
                                      bytes_accessed=int(bytes_accessed)),
    )(states_am, actions_am, *params)

    # ---- unpack the packed slab (pure layout plumbing, outside the kernel) ----
    slab = slab[:B]
    V = slab[:, :F_v]                                                   # (B, N)
    weights = slab[:, F_v:F_v + F_w].reshape(B, H, N, N)
    score_full = slab[:, F_v + F_w:F_used].reshape(B, H, N, N)
    # drop the (zero) self column, keeping the agent-major neighbour order
    score = (score_full.reshape(B, H, N * N)[:, :, :-1]
             .reshape(B, H, N - 1, N + 1)[:, :, :, 1:]
             .reshape(B, H, N, N - 1))
    return V, weights, score[:, :, :, None, :]
    # TODO(synk): enable_hard_attention=True branch (F.gumbel_softmax, stochastic)
    # is intentionally not implemented; this instance uses enable_hard_attention=False.


# ---------------------------------------------------------------------------
# deterministic parameter initialization (shapes from V_network.__init__,
# per-head key/query/value weights fused along the output axis)
# ---------------------------------------------------------------------------
def init_params(key, obs_dim, num_actions, num_heads):
    H = num_heads
    DH = HID // H
    keys = iter(jax.random.split(key, 64))

    def xavier(shape):
        fan_in, fan_out = shape[-2], shape[-1]
        lim = math.sqrt(6.0 / (fan_in + fan_out))
        return jax.random.uniform(next(keys), shape, jnp.float32, -lim, lim)

    def bias(shape, fan_in):
        bound = 1.0 / math.sqrt(fan_in)
        return jax.random.uniform(next(keys), shape, jnp.float32, -bound, bound)

    ones = lambda s: jnp.ones(s, jnp.float32)
    zeros = lambda s: jnp.zeros(s, jnp.float32)

    wk_heads = [xavier((HID, HID)) for _ in range(H)]
    wq_heads = [xavier((HID, HID)) for _ in range(H)]
    wv_heads = [xavier((HID, DH)) for _ in range(H)]
    bk_heads = [bias((1, HID), HID) for _ in range(H)]
    bq_heads = [bias((1, HID), HID) for _ in range(H)]
    bv_heads = [bias((1, DH), HID) for _ in range(H)]

    wkq = jnp.concatenate(wk_heads + wq_heads, axis=1)       # (64, 2*H*64): [K heads | Q heads]
    bkq = jnp.concatenate(bk_heads + bq_heads, axis=1)
    wv = jnp.concatenate(wv_heads, axis=1)                   # (64, H*DH = 64)
    bv = jnp.concatenate(bv_heads, axis=1)

    # Order must match the kernel signature.
    return [
        xavier((obs_dim, HID)), bias((1, HID), obs_dim),                           # state_embed
        xavier((obs_dim + num_actions, HID)), bias((1, HID), obs_dim + num_actions),  # state_act_embed
        wkq, bkq,                                                                  # key+query heads (fused)
        wv, bv,                                                                    # attention_value heads (fused)
        ones((1, HID)), zeros((1, HID)),                                           # attention_value_layer_norm
        xavier((HID, HID)), bias((1, HID), HID),                                   # attention_value_linear
        ones((1, HID)), zeros((1, HID)),                                           # attention_value_linear_layer_norm
        xavier((2 * HID, HID)), bias((1, HID), 2 * HID),                           # common_layer
        xavier((HID, HID)), bias((1, HID), HID),                                   # v_value_layer[0]
        xavier((HID, 1)), bias((1, 1), HID),                                       # v_value_layer[2]
    ]


# ---------------------------------------------------------------------------
# pure-JAX reference of the PyTorch module (for a correctness cross-check)
# ---------------------------------------------------------------------------
def reference_forward(states, actions, params, num_heads):
    (wse, bse, wsa, bsa, wkq, bkq, wv, bv, g1, be1,
     wavl, bavl, g2, be2, wc, bc, wv1, bv1, wv2, bv2) = params
    B, N, obs = states.shape
    H = num_heads
    DH = HID // H
    gelu = lambda x: jax.nn.gelu(x, approximate=False)

    def ln(x, g, b, eps=1e-5):
        mu = jnp.mean(x, axis=-1, keepdims=True)
        var = jnp.mean(jnp.square(x - mu), axis=-1, keepdims=True)
        return (x - mu) / jnp.sqrt(var + eps) * g + b

    def remove_self(x):                      # (B, N, N, D) -> (B, N, N-1, D)
        return jnp.stack([jnp.concatenate([x[:, i, :i], x[:, i, i + 1:]], axis=1)
                          for i in range(N)], axis=1)

    sk = remove_self(jnp.broadcast_to(states[:, None], (B, N, N, obs)))
    ak = remove_self(jnp.broadcast_to(actions[:, None], (B, N, N, actions.shape[-1])))
    obs_actions = jnp.concatenate([sk, ak], axis=-1)

    sqe = gelu(states[:, :, None, :] @ wse + bse)            # (B, N, 1, 64)
    ske = gelu(sk @ wse + bse)                               # (B, N, N-1, 64)
    oae = gelu(obs_actions @ wsa + bsa)                      # (B, N, N-1, 64)

    wk_h = [wkq[:, h * HID:(h + 1) * HID] for h in range(H)]
    wq_h = [wkq[:, (H + h) * HID:(H + h + 1) * HID] for h in range(H)]
    bk_h = [bkq[:, h * HID:(h + 1) * HID] for h in range(H)]
    bq_h = [bkq[:, (H + h) * HID:(H + h + 1) * HID] for h in range(H)]
    wv_h = [wv[:, h * DH:(h + 1) * DH] for h in range(H)]
    bv_h = [bv[:, h * DH:(h + 1) * DH] for h in range(H)]

    key_obs = jnp.stack([gelu(ske @ wk_h[h] + bk_h[h]) for h in range(H)], axis=1)    # (B,H,N,N-1,64)
    query_obs = jnp.stack([gelu(sqe @ wq_h[h] + bq_h[h]) for h in range(H)], axis=1)  # (B,H,N,1,64)
    att_val = jnp.stack([gelu(oae @ wv_h[h] + bv_h[h]) for h in range(H)], axis=1)    # (B,H,N,N-1,DH)

    score = query_obs @ jnp.swapaxes(key_obs, -1, -2) / math.sqrt(64.0)               # (B,H,N,1,N-1)
    weight = jax.nn.softmax(score, axis=-1)
    w_sq = weight[..., 0, :]                                                          # (B,H,N,N-1)
    one = jnp.ones((B, H, 1), jnp.float32)
    weights_full = jnp.stack(
        [jnp.concatenate([w_sq[:, :, i, :i], one, w_sq[:, :, i, i:]], axis=-1)
         for i in range(N)], axis=2)                                                  # (B,H,N,N)

    agg = (weight @ att_val)[..., 0, :]                                               # (B,H,N,DH)
    agg = jnp.transpose(agg, (0, 2, 1, 3)).reshape(B, N, HID)
    x1 = ln(jnp.sum(oae, axis=-2) + agg, g1, be1)
    lin = gelu(x1 @ wavl + bavl)
    x2 = ln(x1 + lin, g2, be2)
    cur = jnp.concatenate([sqe[:, :, 0, :], x2], axis=-1)
    common = gelu(cur @ wc + bc)
    v1 = gelu(common @ wv1 + bv1)
    v = v1 @ wv2 + bv2
    return v[..., 0], weights_full, score


if __name__ == "__main__":
    B, N_AGENTS, OBS_DIM, NUM_ACTIONS, NUM_HEADS = 2, 4, 32, 8, 2

    key = jax.random.PRNGKey(0)
    k_s, k_a, k_p = jax.random.split(key, 3)
    states = jax.random.normal(k_s, (B, N_AGENTS, OBS_DIM), jnp.float32)
    actions = jax.random.normal(k_a, (B, N_AGENTS, NUM_ACTIONS), jnp.float32)
    params = init_params(k_p, OBS_DIM, NUM_ACTIONS, NUM_HEADS)

    V, weights, score = v_network_forward(states, actions, params, NUM_HEADS)
    (V, weights, score) = jax.block_until_ready((V, weights, score))

    assert V.shape == (B, N_AGENTS)
    assert weights.shape == (B, NUM_HEADS, N_AGENTS, N_AGENTS)
    assert score.shape == (B, NUM_HEADS, N_AGENTS, 1, N_AGENTS - 1)
    assert bool(jnp.all(jnp.isfinite(V)))
    assert bool(jnp.all(jnp.isfinite(weights)))
    assert bool(jnp.all(jnp.isfinite(score)))
    # softmax rows (plus the re-inserted self weight of 1) sum to ~2
    # (approx-reciprocal in the kernel -> loose atol)
    assert bool(jnp.allclose(jnp.sum(weights, axis=-1), 2.0, atol=5e-3))

    # cross-check against a pure-JAX reference of the PyTorch module
    V_ref, W_ref, S_ref = reference_forward(states, actions, params, NUM_HEADS)

    def _close(a, b, name, rtol=3e-2, atol=3e-2):
        ok = bool(jnp.allclose(a, b, rtol=rtol, atol=atol))
        assert ok, f"{name} mismatch: max abs diff {float(jnp.max(jnp.abs(a - b)))}"

    _close(V, V_ref, "V")
    _close(weights, W_ref, "weights")
    _close(score, S_ref, "score")

    print("KERNEL_OK")
</pallas_src>

<mosaic_0001>
module attributes {stable_mosaic.version = 11 : i64} {
  func.func @kernel(%arg0: i32, %arg1: memref<4x2x32xf32, #tpu.memory_space<vmem>>, %arg2: memref<4x2x8xf32, #tpu.memory_space<vmem>>, %arg3: memref<32x64xf32, #tpu.memory_space<vmem>>, %arg4: memref<1x64xf32, #tpu.memory_space<vmem>>, %arg5: memref<40x64xf32, #tpu.memory_space<vmem>>, %arg6: memref<1x64xf32, #tpu.memory_space<vmem>>, %arg7: memref<64x256xf32, #tpu.memory_space<vmem>>, %arg8: memref<1x256xf32, #tpu.memory_space<vmem>>, %arg9: memref<64x64xf32, #tpu.memory_space<vmem>>, %arg10: memref<1x64xf32, #tpu.memory_space<vmem>>, %arg11: memref<1x64xf32, #tpu.memory_space<vmem>>, %arg12: memref<1x64xf32, #tpu.memory_space<vmem>>, %arg13: memref<64x64xf32, #tpu.memory_space<vmem>>, %arg14: memref<1x64xf32, #tpu.memory_space<vmem>>, %arg15: memref<1x64xf32, #tpu.memory_space<vmem>>, %arg16: memref<1x64xf32, #tpu.memory_space<vmem>>, %arg17: memref<128x64xf32, #tpu.memory_space<vmem>>, %arg18: memref<1x64xf32, #tpu.memory_space<vmem>>, %arg19: memref<64x64xf32, #tpu.memory_space<vmem>>, %arg20: memref<1x64xf32, #tpu.memory_space<vmem>>, %arg21: memref<64x1xf32, #tpu.memory_space<vmem>>, %arg22: memref<1x1xf32, #tpu.memory_space<vmem>>, %arg23: memref<2x128xf32, #tpu.memory_space<vmem>>) attributes {dimension_semantics = [#tpu.dimension_semantics<parallel>], iteration_bounds = array<i64: 1>, scalar_prefetch = 0 : i64, scratch_operands = 0 : i64, tpu.core_type = #tpu.core_type<tc>, window_params = [{transform_indices = @transform_0, window_bounds = array<i64: 4, 2, 32>}, {transform_indices = @transform_1, window_bounds = array<i64: 4, 2, 8>}, {pipeline_mode = #tpu.pipeline_mode<synchronous>, transform_indices = @transform_2, window_bounds = array<i64: 32, 64>}, {pipeline_mode = #tpu.pipeline_mode<synchronous>, transform_indices = @transform_3, window_bounds = array<i64: 1, 64>}, {pipeline_mode = #tpu.pipeline_mode<synchronous>, transform_indices = @transform_4, window_bounds = array<i64: 40, 64>}, {pipeline_mode = #tpu.pipeline_mode<synchronous>, transform_indices = @transform_5, window_bounds = array<i64: 1, 64>}, {pipeline_mode = #tpu.pipeline_mode<synchronous>, transform_indices = @transform_6, window_bounds = array<i64: 64, 256>}, {pipeline_mode = #tpu.pipeline_mode<synchronous>, transform_indices = @transform_7, window_bounds = array<i64: 1, 256>}, {pipeline_mode = #tpu.pipeline_mode<synchronous>, transform_indices = @transform_8, window_bounds = array<i64: 64, 64>}, {pipeline_mode = #tpu.pipeline_mode<synchronous>, transform_indices = @transform_9, window_bounds = array<i64: 1, 64>}, {pipeline_mode = #tpu.pipeline_mode<synchronous>, transform_indices = @transform_10, window_bounds = array<i64: 1, 64>}, {pipeline_mode = #tpu.pipeline_mode<synchronous>, transform_indices = @transform_11, window_bounds = array<i64: 1, 64>}, {pipeline_mode = #tpu.pipeline_mode<synchronous>, transform_indices = @transform_12, window_bounds = array<i64: 64, 64>}, {pipeline_mode = #tpu.pipeline_mode<synchronous>, transform_indices = @transform_13, window_bounds = array<i64: 1, 64>}, {pipeline_mode = #tpu.pipeline_mode<synchronous>, transform_indices = @transform_14, window_bounds = array<i64: 1, 64>}, {pipeline_mode = #tpu.pipeline_mode<synchronous>, transform_indices = @transform_15, window_bounds = array<i64: 1, 64>}, {pipeline_mode = #tpu.pipeline_mode<synchronous>, transform_indices = @transform_16, window_bounds = array<i64: 128, 64>}, {pipeline_mode = #tpu.pipeline_mode<synchronous>, transform_indices = @transform_17, window_bounds = array<i64: 1, 64>}, {pipeline_mode = #tpu.pipeline_mode<synchronous>, transform_indices = @transform_18, window_bounds = array<i64: 64, 64>}, {pipeline_mode = #tpu.pipeline_mode<synchronous>, transform_indices = @transform_19, window_bounds = array<i64: 1, 64>}, {pipeline_mode = #tpu.pipeline_mode<synchronous>, transform_indices = @transform_20, window_bounds = array<i64: 64, 1>}, {pipeline_mode = #tpu.pipeline_mode<synchronous>, transform_indices = @transform_21, window_bounds = array<i64: 1, 1>}, {transform_indices = @transform_22, window_bounds = array<i64: 2, 128>}]} {
    %c0 = arith.constant 0 : index
    %c0_0 = arith.constant 0 : index
    %c0_1 = arith.constant 0 : index
    %0 = vector.load %arg1[%c0, %c0_0, %c0_1] : memref<4x2x32xf32, #tpu.memory_space<vmem>>, vector<1x2x32xf32>
    %1 = vector.shape_cast %0 : vector<1x2x32xf32> to vector<2x32xf32>
    %c1 = arith.constant 1 : index
    %c0_2 = arith.constant 0 : index
    %c0_3 = arith.constant 0 : index
    %2 = vector.load %arg1[%c1, %c0_2, %c0_3] : memref<4x2x32xf32, #tpu.memory_space<vmem>>, vector<1x2x32xf32>
    %3 = vector.shape_cast %2 : vector<1x2x32xf32> to vector<2x32xf32>
    %c2 = arith.constant 2 : index
    %c0_4 = arith.constant 0 : index
    %c0_5 = arith.constant 0 : index
    %4 = vector.load %arg1[%c2, %c0_4, %c0_5] : memref<4x2x32xf32, #tpu.memory_space<vmem>>, vector<1x2x32xf32>
    %5 = vector.shape_cast %4 : vector<1x2x32xf32> to vector<2x32xf32>
    %c3 = arith.constant 3 : index
    %c0_6 = arith.constant 0 : index
    %c0_7 = arith.constant 0 : index
    %6 = vector.load %arg1[%c3, %c0_6, %c0_7] : memref<4x2x32xf32, #tpu.memory_space<vmem>>, vector<1x2x32xf32>
    %7 = vector.shape_cast %6 : vector<1x2x32xf32> to vector<2x32xf32>
    %8 = tpu.concatenate %1, %3, %5, %7 in 0 : vector<2x32xf32>, vector<2x32xf32>, vector<2x32xf32>, vector<2x32xf32> -> vector<8x32xf32>
    %c0_8 = arith.constant 0 : index
    %c0_9 = arith.constant 0 : index
    %c0_10 = arith.constant 0 : index
    %9 = vector.load %arg2[%c0_8, %c0_9, %c0_10] : memref<4x2x8xf32, #tpu.memory_space<vmem>>, vector<1x2x8xf32>
    %10 = vector.shape_cast %9 : vector<1x2x8xf32> to vector<2x8xf32>
    %c1_11 = arith.constant 1 : index
    %c0_12 = arith.constant 0 : index
    %c0_13 = arith.constant 0 : index
    %11 = vector.load %arg2[%c1_11, %c0_12, %c0_13] : memref<4x2x8xf32, #tpu.memory_space<vmem>>, vector<1x2x8xf32>
    %12 = vector.shape_cast %11 : vector<1x2x8xf32> to vector<2x8xf32>
    %c2_14 = arith.constant 2 : index
    %c0_15 = arith.constant 0 : index
    %c0_16 = arith.constant 0 : index
    %13 = vector.load %arg2[%c2_14, %c0_15, %c0_16] : memref<4x2x8xf32, #tpu.memory_space<vmem>>, vector<1x2x8xf32>
    %14 = vector.shape_cast %13 : vector<1x2x8xf32> to vector<2x8xf32>
    %c3_17 = arith.constant 3 : index
    %c0_18 = arith.constant 0 : index
    %c0_19 = arith.constant 0 : index
    %15 = vector.load %arg2[%c3_17, %c0_18, %c0_19] : memref<4x2x8xf32, #tpu.memory_space<vmem>>, vector<1x2x8xf32>
    %16 = vector.shape_cast %15 : vector<1x2x8xf32> to vector<2x8xf32>
    %17 = tpu.concatenate %10, %12, %14, %16 in 0 : vector<2x8xf32>, vector<2x8xf32>, vector<2x8xf32>, vector<2x8xf32> -> vector<8x8xf32>
    %18 = tpu.concatenate %8, %17 in 1 : vector<8x32xf32>, vector<8x8xf32> -> vector<8x40xf32>
    %c0_20 = arith.constant 0 : index
    %c0_21 = arith.constant 0 : index
    %19 = vector.load %arg3[%c0_20, %c0_21] : memref<32x64xf32, #tpu.memory_space<vmem>>, vector<32x64xf32>
    %cst = arith.constant dense<0.000000e+00> : vector<8x64xf32>
    %20 = tpu.matmul %8, %19, %cst {dimension_numbers = #tpu.dot_dimension_numbers<[1], [0], [0], [1], [0, 0, 1, 1], [], []>} : vector<8x32xf32>, vector<32x64xf32>, vector<8x64xf32> -> vector<8x64xf32>
    %c0_22 = arith.constant 0 : index
    %c0_23 = arith.constant 0 : index
    %21 = vector.load %arg4[%c0_22, %c0_23] : memref<1x64xf32, #tpu.memory_space<vmem>>, vector<1x64xf32>
    %22 = vector.broadcast %21 : vector<1x64xf32> to vector<8x64xf32>
    %23 = arith.addf %20, %22 : vector<8x64xf32>
    %cst_24 = arith.constant 5.000000e-01 : f32
    %24 = vector.broadcast %cst_24 : f32 to vector<8x64xf32>
    %25 = arith.mulf %24, %23 : vector<8x64xf32>
    %cst_25 = arith.constant 0.707106769 : f32
    %26 = vector.broadcast %cst_25 : f32 to vector<8x64xf32>
    %27 = arith.mulf %23, %26 : vector<8x64xf32>
    %cst_26 = arith.constant 0.000000e+00 : f32
    %28 = vector.broadcast %cst_26 : f32 to vector<8x64xf32>
    %29 = arith.cmpf oge, %27, %28 : vector<8x64xf32>
    %cst_27 = arith.constant 1.000000e+00 : f32
    %cst_28 = arith.constant -1.000000e+00 : f32
    %30 = vector.broadcast %cst_27 : f32 to vector<8x64xf32>
    %31 = vector.broadcast %cst_28 : f32 to vector<8x64xf32>
    %32 = arith.select %29, %30, %31 : vector<8x64xi1>, vector<8x64xf32>
    %33 = math.absf %27 : vector<8x64xf32>
    %cst_29 = arith.constant 0.327591091 : f32
    %34 = vector.broadcast %cst_29 : f32 to vector<8x64xf32>
    %35 = arith.mulf %34, %33 : vector<8x64xf32>
    %cst_30 = arith.constant 1.000000e+00 : f32
    %36 = vector.broadcast %cst_30 : f32 to vector<8x64xf32>
    %37 = arith.addf %36, %35 : vector<8x64xf32>
    %cst_31 = arith.constant 1.000000e+00 : f32
    %38 = vector.broadcast %cst_31 : f32 to vector<8x64xf32>
    %39 = arith.divf %38, %37 : vector<8x64xf32>
    %cst_32 = arith.constant 1.06140542 : f32
    %40 = vector.broadcast %cst_32 : f32 to vector<8x64xf32>
    %41 = arith.mulf %40, %39 : vector<8x64xf32>
    %cst_33 = arith.constant -1.45315206 : f32
    %42 = vector.broadcast %cst_33 : f32 to vector<8x64xf32>
    %43 = arith.addf %41, %42 : vector<8x64xf32>
    %44 = arith.mulf %43, %39 : vector<8x64xf32>
    %cst_34 = arith.constant 1.42141378 : f32
    %45 = vector.broadcast %cst_34 : f32 to vector<8x64xf32>
    %46 = arith.addf %44, %45 : vector<8x64xf32>
    %47 = arith.mulf %46, %39 : vector<8x64xf32>
    %cst_35 = arith.constant -0.284496725 : f32
    %48 = vector.broadcast %cst_35 : f32 to vector<8x64xf32>
    %49 = arith.addf %47, %48 : vector<8x64xf32>
    %50 = arith.mulf %49, %39 : vector<8x64xf32>
    %cst_36 = arith.constant 0.254829586 : f32
    %51 = vector.broadcast %cst_36 : f32 to vector<8x64xf32>
    %52 = arith.addf %50, %51 : vector<8x64xf32>
    %53 = arith.mulf %52, %39 : vector<8x64xf32>
    %cst_37 = arith.constant 0.000000e+00 : f32
    %54 = vector.broadcast %cst_37 : f32 to vector<8x64xf32>
    %55 = arith.subf %54, %33 : vector<8x64xf32>
    %56 = arith.mulf %55, %33 : vector<8x64xf32>
    %57 = math.exp %56 : vector<8x64xf32>
    %58 = arith.mulf %53, %57 : vector<8x64xf32>
    %cst_38 = arith.constant 1.000000e+00 : f32
    %59 = vector.broadcast %cst_38 : f32 to vector<8x64xf32>
    %60 = arith.subf %59, %58 : vector<8x64xf32>
    %61 = arith.mulf %32, %60 : vector<8x64xf32>
    %cst_39 = arith.constant 1.000000e+00 : f32
    %62 = vector.broadcast %cst_39 : f32 to vector<8x64xf32>
    %63 = arith.addf %62, %61 : vector<8x64xf32>
    %64 = arith.mulf %25, %63 : vector<8x64xf32>
    %c0_40 = arith.constant 0 : index
    %c0_41 = arith.constant 0 : index
    %65 = vector.load %arg5[%c0_40, %c0_41] : memref<40x64xf32, #tpu.memory_space<vmem>>, vector<40x64xf32>
    %cst_42 = arith.constant dense<0.000000e+00> : vector<8x64xf32>
    %66 = tpu.matmul %18, %65, %cst_42 {dimension_numbers = #tpu.dot_dimension_numbers<[1], [0], [0], [1], [0, 0, 1, 1], [], []>} : vector<8x40xf32>, vector<40x64xf32>, vector<8x64xf32> -> vector<8x64xf32>
    %c0_43 = arith.constant 0 : index
    %c0_44 = arith.constant 0 : index
    %67 = vector.load %arg6[%c0_43, %c0_44] : memref<1x64xf32, #tpu.memory_space<vmem>>, vector<1x64xf32>
    %68 = vector.broadcast %67 : vector<1x64xf32> to vector<8x64xf32>
    %69 = arith.addf %66, %68 : vector<8x64xf32>
    %cst_45 = arith.constant 5.000000e-01 : f32
    %70 = vector.broadcast %cst_45 : f32 to vector<8x64xf32>
    %71 = arith.mulf %70, %69 : vector<8x64xf32>
    %cst_46 = arith.constant 0.707106769 : f32
    %72 = vector.broadcast %cst_46 : f32 to vector<8x64xf32>
    %73 = arith.mulf %69, %72 : vector<8x64xf32>
    %cst_47 = arith.constant 0.000000e+00 : f32
    %74 = vector.broadcast %cst_47 : f32 to vector<8x64xf32>
    %75 = arith.cmpf oge, %73, %74 : vector<8x64xf32>
    %cst_48 = arith.constant 1.000000e+00 : f32
    %cst_49 = arith.constant -1.000000e+00 : f32
    %76 = vector.broadcast %cst_48 : f32 to vector<8x64xf32>
    %77 = vector.broadcast %cst_49 : f32 to vector<8x64xf32>
    %78 = arith.select %75, %76, %77 : vector<8x64xi1>, vector<8x64xf32>
    %79 = math.absf %73 : vector<8x64xf32>
    %cst_50 = arith.constant 0.327591091 : f32
    %80 = vector.broadcast %cst_50 : f32 to vector<8x64xf32>
    %81 = arith.mulf %80, %79 : vector<8x64xf32>
    %cst_51 = arith.constant 1.000000e+00 : f32
    %82 = vector.broadcast %cst_51 : f32 to vector<8x64xf32>
    %83 = arith.addf %82, %81 : vector<8x64xf32>
    %cst_52 = arith.constant 1.000000e+00 : f32
    %84 = vector.broadcast %cst_52 : f32 to vector<8x64xf32>
    %85 = arith.divf %84, %83 : vector<8x64xf32>
    %cst_53 = arith.constant 1.06140542 : f32
    %86 = vector.broadcast %cst_53 : f32 to vector<8x64xf32>
    %87 = arith.mulf %86, %85 : vector<8x64xf32>
    %cst_54 = arith.constant -1.45315206 : f32
    %88 = vector.broadcast %cst_54 : f32 to vector<8x64xf32>
    %89 = arith.addf %87, %88 : vector<8x64xf32>
    %90 = arith.mulf %89, %85 : vector<8x64xf32>
    %cst_55 = arith.constant 1.42141378 : f32
    %91 = vector.broadcast %cst_55 : f32 to vector<8x64xf32>
    %92 = arith.addf %90, %91 : vector<8x64xf32>
    %93 = arith.mulf %92, %85 : vector<8x64xf32>
    %cst_56 = arith.constant -0.284496725 : f32
    %94 = vector.broadcast %cst_56 : f32 to vector<8x64xf32>
    %95 = arith.addf %93, %94 : vector<8x64xf32>
    %96 = arith.mulf %95, %85 : vector<8x64xf32>
    %cst_57 = arith.constant 0.254829586 : f32
    %97 = vector.broadcast %cst_57 : f32 to vector<8x64xf32>
    %98 = arith.addf %96, %97 : vector<8x64xf32>
    %99 = arith.mulf %98, %85 : vector<8x64xf32>
    %cst_58 = arith.constant 0.000000e+00 : f32
    %100 = vector.broadcast %cst_58 : f32 to vector<8x64xf32>
    %101 = arith.subf %100, %79 : vector<8x64xf32>
    %102 = arith.mulf %101, %79 : vector<8x64xf32>
    %103 = math.exp %102 : vector<8x64xf32>
    %104 = arith.mulf %99, %103 : vector<8x64xf32>
    %cst_59 = arith.constant 1.000000e+00 : f32
    %105 = vector.broadcast %cst_59 : f32 to vector<8x64xf32>
    %106 = arith.subf %105, %104 : vector<8x64xf32>
    %107 = arith.mulf %78, %106 : vector<8x64xf32>
    %cst_60 = arith.constant 1.000000e+00 : f32
    %108 = vector.broadcast %cst_60 : f32 to vector<8x64xf32>
    %109 = arith.addf %108, %107 : vector<8x64xf32>
    %110 = arith.mulf %71, %109 : vector<8x64xf32>
    %c0_61 = arith.constant 0 : index
    %c0_62 = arith.constant 0 : index
    %111 = vector.load %arg7[%c0_61, %c0_62] : memref<64x256xf32, #tpu.memory_space<vmem>>, vector<64x256xf32>
    %cst_63 = arith.constant dense<0.000000e+00> : vector<8x256xf32>
    %112 = tpu.matmul %64, %111, %cst_63 {dimension_numbers = #tpu.dot_dimension_numbers<[1], [0], [0], [1], [0, 0, 1, 1], [], []>} : vector<8x64xf32>, vector<64x256xf32>, vector<8x256xf32> -> vector<8x256xf32>
    %c0_64 = arith.constant 0 : index
    %c0_65 = arith.constant 0 : index
    %113 = vector.load %arg8[%c0_64, %c0_65] : memref<1x256xf32, #tpu.memory_space<vmem>>, vector<1x256xf32>
    %114 = vector.broadcast %113 : vector<1x256xf32> to vector<8x256xf32>
    %115 = arith.addf %112, %114 : vector<8x256xf32>
    %cst_66 = arith.constant 5.000000e-01 : f32
    %116 = vector.broadcast %cst_66 : f32 to vector<8x256xf32>
    %117 = arith.mulf %116, %115 : vector<8x256xf32>
    %cst_67 = arith.constant 0.707106769 : f32
    %118 = vector.broadcast %cst_67 : f32 to vector<8x256xf32>
    %119 = arith.mulf %115, %118 : vector<8x256xf32>
    %cst_68 = arith.constant 0.000000e+00 : f32
    %120 = vector.broadcast %cst_68 : f32 to vector<8x256xf32>
    %121 = arith.cmpf oge, %119, %120 : vector<8x256xf32>
    %cst_69 = arith.constant 1.000000e+00 : f32
    %cst_70 = arith.constant -1.000000e+00 : f32
    %122 = vector.broadcast %cst_69 : f32 to vector<8x256xf32>
    %123 = vector.broadcast %cst_70 : f32 to vector<8x256xf32>
    %124 = arith.select %121, %122, %123 : vector<8x256xi1>, vector<8x256xf32>
    %125 = math.absf %119 : vector<8x256xf32>
    %cst_71 = arith.constant 0.327591091 : f32
    %126 = vector.broadcast %cst_71 : f32 to vector<8x256xf32>
    %127 = arith.mulf %126, %125 : vector<8x256xf32>
    %cst_72 = arith.constant 1.000000e+00 : f32
    %128 = vector.broadcast %cst_72 : f32 to vector<8x256xf32>
    %129 = arith.addf %128, %127 : vector<8x256xf32>
    %cst_73 = arith.constant 1.000000e+00 : f32
    %130 = vector.broadcast %cst_73 : f32 to vector<8x256xf32>
    %131 = arith.divf %130, %129 : vector<8x256xf32>
    %cst_74 = arith.constant 1.06140542 : f32
    %132 = vector.broadcast %cst_74 : f32 to vector<8x256xf32>
    %133 = arith.mulf %132, %131 : vector<8x256xf32>
    %cst_75 = arith.constant -1.45315206 : f32
    %134 = vector.broadcast %cst_75 : f32 to vector<8x256xf32>
    %135 = arith.addf %133, %134 : vector<8x256xf32>
    %136 = arith.mulf %135, %131 : vector<8x256xf32>
    %cst_76 = arith.constant 1.42141378 : f32
    %137 = vector.broadcast %cst_76 : f32 to vector<8x256xf32>
    %138 = arith.addf %136, %137 : vector<8x256xf32>
    %139 = arith.mulf %138, %131 : vector<8x256xf32>
    %cst_77 = arith.constant -0.284496725 : f32
    %140 = vector.broadcast %cst_77 : f32 to vector<8x256xf32>
    %141 = arith.addf %139, %140 : vector<8x256xf32>
    %142 = arith.mulf %141, %131 : vector<8x256xf32>
    %cst_78 = arith.constant 0.254829586 : f32
    %143 = vector.broadcast %cst_78 : f32 to vector<8x256xf32>
    %144 = arith.addf %142, %143 : vector<8x256xf32>
    %145 = arith.mulf %144, %131 : vector<8x256xf32>
    %cst_79 = arith.constant 0.000000e+00 : f32
    %146 = vector.broadcast %cst_79 : f32 to vector<8x256xf32>
    %147 = arith.subf %146, %125 : vector<8x256xf32>
    %148 = arith.mulf %147, %125 : vector<8x256xf32>
    %149 = math.exp %148 : vector<8x256xf32>
    %150 = arith.mulf %145, %149 : vector<8x256xf32>
    %cst_80 = arith.constant 1.000000e+00 : f32
    %151 = vector.broadcast %cst_80 : f32 to vector<8x256xf32>
    %152 = arith.subf %151, %150 : vector<8x256xf32>
    %153 = arith.mulf %124, %152 : vector<8x256xf32>
    %cst_81 = arith.constant 1.000000e+00 : f32
    %154 = vector.broadcast %cst_81 : f32 to vector<8x256xf32>
    %155 = arith.addf %154, %153 : vector<8x256xf32>
    %156 = arith.mulf %117, %155 : vector<8x256xf32>
    %c0_82 = arith.constant 0 : index
    %c0_83 = arith.constant 0 : index
    %157 = vector.load %arg9[%c0_82, %c0_83] : memref<64x64xf32, #tpu.memory_space<vmem>>, vector<64x64xf32>
    %cst_84 = arith.constant dense<0.000000e+00> : vector<8x64xf32>
    %158 = tpu.matmul %110, %157, %cst_84 {dimension_numbers = #tpu.dot_dimension_numbers<[1], [0], [0], [1], [0, 0, 1, 1], [], []>} : vector<8x64xf32>, vector<64x64xf32>, vector<8x64xf32> -> vector<8x64xf32>
    %c0_85 = arith.constant 0 : index
    %c0_86 = arith.constant 0 : index
    %159 = vector.load %arg10[%c0_85, %c0_86] : memref<1x64xf32, #tpu.memory_space<vmem>>, vector<1x64xf32>
    %160 = vector.broadcast %159 : vector<1x64xf32> to vector<8x64xf32>
    %161 = arith.addf %158, %160 : vector<8x64xf32>
    %cst_87 = arith.constant 5.000000e-01 : f32
    %162 = vector.broadcast %cst_87 : f32 to vector<8x64xf32>
    %163 = arith.mulf %162, %161 : vector<8x64xf32>
    %cst_88 = arith.constant 0.707106769 : f32
    %164 = vector.broadcast %cst_88 : f32 to vector<8x64xf32>
    %165 = arith.mulf %161, %164 : vector<8x64xf32>
    %cst_89 = arith.constant 0.000000e+00 : f32
    %166 = vector.broadcast %cst_89 : f32 to vector<8x64xf32>
    %167 = arith.cmpf oge, %165, %166 : vector<8x64xf32>
    %cst_90 = arith.constant 1.000000e+00 : f32
    %cst_91 = arith.constant -1.000000e+00 : f32
    %168 = vector.broadcast %cst_90 : f32 to vector<8x64xf32>
    %169 = vector.broadcast %cst_91 : f32 to vector<8x64xf32>
    %170 = arith.select %167, %168, %169 : vector<8x64xi1>, vector<8x64xf32>
    %171 = math.absf %165 : vector<8x64xf32>
    %cst_92 = arith.constant 0.327591091 : f32
    %172 = vector.broadcast %cst_92 : f32 to vector<8x64xf32>
    %173 = arith.mulf %172, %171 : vector<8x64xf32>
    %cst_93 = arith.constant 1.000000e+00 : f32
    %174 = vector.broadcast %cst_93 : f32 to vector<8x64xf32>
    %175 = arith.addf %174, %173 : vector<8x64xf32>
    %cst_94 = arith.constant 1.000000e+00 : f32
    %176 = vector.broadcast %cst_94 : f32 to vector<8x64xf32>
    %177 = arith.divf %176, %175 : vector<8x64xf32>
    %cst_95 = arith.constant 1.06140542 : f32
    %178 = vector.broadcast %cst_95 : f32 to vector<8x64xf32>
    %179 = arith.mulf %178, %177 : vector<8x64xf32>
    %cst_96 = arith.constant -1.45315206 : f32
    %180 = vector.broadcast %cst_96 : f32 to vector<8x64xf32>
    %181 = arith.addf %179, %180 : vector<8x64xf32>
    %182 = arith.mulf %181, %177 : vector<8x64xf32>
    %cst_97 = arith.constant 1.42141378 : f32
    %183 = vector.broadcast %cst_97 : f32 to vector<8x64xf32>
    %184 = arith.addf %182, %183 : vector<8x64xf32>
    %185 = arith.mulf %184, %177 : vector<8x64xf32>
    %cst_98 = arith.constant -0.284496725 : f32
    %186 = vector.broadcast %cst_98 : f32 to vector<8x64xf32>
    %187 = arith.addf %185, %186 : vector<8x64xf32>
    %188 = arith.mulf %187, %177 : vector<8x64xf32>
    %cst_99 = arith.constant 0.254829586 : f32
    %189 = vector.broadcast %cst_99 : f32 to vector<8x64xf32>
    %190 = arith.addf %188, %189 : vector<8x64xf32>
    %191 = arith.mulf %190, %177 : vector<8x64xf32>
    %cst_100 = arith.constant 0.000000e+00 : f32
    %192 = vector.broadcast %cst_100 : f32 to vector<8x64xf32>
    %193 = arith.subf %192, %171 : vector<8x64xf32>
    %194 = arith.mulf %193, %171 : vector<8x64xf32>
    %195 = math.exp %194 : vector<8x64xf32>
    %196 = arith.mulf %191, %195 : vector<8x64xf32>
    %cst_101 = arith.constant 1.000000e+00 : f32
    %197 = vector.broadcast %cst_101 : f32 to vector<8x64xf32>
    %198 = arith.subf %197, %196 : vector<8x64xf32>
    %199 = arith.mulf %170, %198 : vector<8x64xf32>
    %cst_102 = arith.constant 1.000000e+00 : f32
    %200 = vector.broadcast %cst_102 : f32 to vector<8x64xf32>
    %201 = arith.addf %200, %199 : vector<8x64xf32>
    %202 = arith.mulf %163, %201 : vector<8x64xf32>
    %cst_103 = arith.constant 1.000000e+00 : f32
    %203 = vector.broadcast %cst_103 : f32 to vector<2x1xf32>
    %cst_104 = arith.constant 0.000000e+00 : f32
    %204 = vector.broadcast %cst_104 : f32 to vector<2x1xf32>
    %205 = vector.extract_strided_slice %156 {offsets = [0, 0], sizes = [8, 64], strides = [1, 1]} : vector<8x256xf32> to vector<8x64xf32>
    %206 = vector.extract_strided_slice %156 {offsets = [0, 128], sizes = [8, 64], strides = [1, 1]} : vector<8x256xf32> to vector<8x64xf32>
    %207 = vector.extract_strided_slice %202 {offsets = [0, 0], sizes = [8, 32], strides = [1, 1]} : vector<8x64xf32> to vector<8x32xf32>
    %208 = vector.extract_strided_slice %205 {offsets = [0, 0], sizes = [2, 64], strides = [1, 1]} : vector<8x64xf32> to vector<2x64xf32>
    %209 = vector.extract_strided_slice %205 {offsets = [2, 0], sizes = [2, 64], strides = [1, 1]} : vector<8x64xf32> to vector<2x64xf32>
    %210 = vector.extract_strided_slice %205 {offsets = [4, 0], sizes = [2, 64], strides = [1, 1]} : vector<8x64xf32> to vector<2x64xf32>
    %211 = vector.extract_strided_slice %205 {offsets = [6, 0], sizes = [2, 64], strides = [1, 1]} : vector<8x64xf32> to vector<2x64xf32>
    %212 = vector.extract_strided_slice %206 {offsets = [0, 0], sizes = [2, 64], strides = [1, 1]} : vector<8x64xf32> to vector<2x64xf32>
    %213 = vector.extract_strided_slice %206 {offsets = [2, 0], sizes = [2, 64], strides = [1, 1]} : vector<8x64xf32> to vector<2x64xf32>
    %214 = vector.extract_strided_slice %206 {offsets = [4, 0], sizes = [2, 64], strides = [1, 1]} : vector<8x64xf32> to vector<2x64xf32>
    %215 = vector.extract_strided_slice %206 {offsets = [6, 0], sizes = [2, 64], strides = [1, 1]} : vector<8x64xf32> to vector<2x64xf32>
    %216 = vector.extract_strided_slice %207 {offsets = [0, 0], sizes = [2, 32], strides = [1, 1]} : vector<8x32xf32> to vector<2x32xf32>
    %217 = vector.extract_strided_slice %207 {offsets = [2, 0], sizes = [2, 32], strides = [1, 1]} : vector<8x32xf32> to vector<2x32xf32>
    %218 = vector.extract_strided_slice %207 {offsets = [4, 0], sizes = [2, 32], strides = [1, 1]} : vector<8x32xf32> to vector<2x32xf32>
    %219 = vector.extract_strided_slice %207 {offsets = [6, 0], sizes = [2, 32], strides = [1, 1]} : vector<8x32xf32> to vector<2x32xf32>
    %220 = arith.mulf %212, %209 : vector<2x64xf32>
    %cst_105 = arith.constant dense<0.000000e+00> : vector<2xf32>
    %221 = vector.multi_reduction <add>, %220, %cst_105 [1] : vector<2x64xf32> to vector<2xf32>
    %222 = vector.shape_cast %221 : vector<2xf32> to vector<2x1xf32>
    %cst_106 = arith.constant 1.250000e-01 : f32
    %223 = vector.broadcast %cst_106 : f32 to vector<2x1xf32>
    %224 = arith.mulf %222, %223 : vector<2x1xf32>
    %225 = arith.mulf %212, %210 : vector<2x64xf32>
    %cst_107 = arith.constant dense<0.000000e+00> : vector<2xf32>
    %226 = vector.multi_reduction <add>, %225, %cst_107 [1] : vector<2x64xf32> to vector<2xf32>
    %227 = vector.shape_cast %226 : vector<2xf32> to vector<2x1xf32>
    %cst_108 = arith.constant 1.250000e-01 : f32
    %228 = vector.broadcast %cst_108 : f32 to vector<2x1xf32>
    %229 = arith.mulf %227, %228 : vector<2x1xf32>
    %230 = arith.mulf %212, %211 : vector<2x64xf32>
    %cst_109 = arith.constant dense<0.000000e+00> : vector<2xf32>
    %231 = vector.multi_reduction <add>, %230, %cst_109 [1] : vector<2x64xf32> to vector<2xf32>
    %232 = vector.shape_cast %231 : vector<2xf32> to vector<2x1xf32>
    %cst_110 = arith.constant 1.250000e-01 : f32
    %233 = vector.broadcast %cst_110 : f32 to vector<2x1xf32>
    %234 = arith.mulf %232, %233 : vector<2x1xf32>
    %235 = tpu.concatenate %224, %229, %234 in 1 : vector<2x1xf32>, vector<2x1xf32>, vector<2x1xf32> -> vector<2x3xf32>
    %cst_111 = arith.constant dense<0xFF800000> : vector<2xf32>
    %236 = vector.multi_reduction <maximumf>, %235, %cst_111 [1] : vector<2x3xf32> to vector<2xf32>
    %237 = vector.shape_cast %236 : vector<2xf32> to vector<2x1xf32>
    %238 = vector.broadcast %237 : vector<2x1xf32> to vector<2x3xf32>
    %239 = arith.subf %235, %238 : vector<2x3xf32>
    %240 = math.exp %239 : vector<2x3xf32>
    %cst_112 = arith.constant dense<0.000000e+00> : vector<2xf32>
    %241 = vector.multi_reduction <add>, %240, %cst_112 [1] : vector<2x3xf32> to vector<2xf32>
    %242 = vector.shape_cast %241 : vector<2xf32> to vector<2x1xf32>
    %243 = tpu.reciprocal %242 {approx = true} : vector<2x1xf32> -> vector<2x1xf32>
    %244 = vector.broadcast %243 : vector<2x1xf32> to vector<2x3xf32>
    %245 = arith.mulf %240, %244 : vector<2x3xf32>
    %246 = vector.extract_strided_slice %245 {offsets = [0, 0], sizes = [2, 1], strides = [1, 1]} : vector<2x3xf32> to vector<2x1xf32>
    %247 = vector.broadcast %246 : vector<2x1xf32> to vector<2x32xf32>
    %248 = arith.mulf %247, %217 : vector<2x32xf32>
    %249 = vector.extract_strided_slice %245 {offsets = [0, 1], sizes = [2, 1], strides = [1, 1]} : vector<2x3xf32> to vector<2x1xf32>
    %250 = vector.broadcast %249 : vector<2x1xf32> to vector<2x32xf32>
    %251 = arith.mulf %250, %218 : vector<2x32xf32>
    %252 = arith.addf %248, %251 : vector<2x32xf32>
    %253 = vector.extract_strided_slice %245 {offsets = [0, 2], sizes = [2, 1], strides = [1, 1]} : vector<2x3xf32> to vector<2x1xf32>
    %254 = vector.broadcast %253 : vector<2x1xf32> to vector<2x32xf32>
    %255 = arith.mulf %254, %219 : vector<2x32xf32>
    %256 = arith.addf %252, %255 : vector<2x32xf32>
    %257 = tpu.concatenate %203, %246, %249, %253 in 1 : vector<2x1xf32>, vector<2x1xf32>, vector<2x1xf32>, vector<2x1xf32> -> vector<2x4xf32>
    %258 = tpu.concatenate %204, %224, %229, %234 in 1 : vector<2x1xf32>, vector<2x1xf32>, vector<2x1xf32>, vector<2x1xf32> -> vector<2x4xf32>
    %259 = arith.mulf %213, %208 : vector<2x64xf32>
    %cst_113 = arith.constant dense<0.000000e+00> : vector<2xf32>
    %260 = vector.multi_reduction <add>, %259, %cst_113 [1] : vector<2x64xf32> to vector<2xf32>
    %261 = vector.shape_cast %260 : vector<2xf32> to vector<2x1xf32>
    %cst_114 = arith.constant 1.250000e-01 : f32
    %262 = vector.broadcast %cst_114 : f32 to vector<2x1xf32>
    %263 = arith.mulf %261, %262 : vector<2x1xf32>
    %264 = arith.mulf %213, %210 : vector<2x64xf32>
    %cst_115 = arith.constant dense<0.000000e+00> : vector<2xf32>
    %265 = vector.multi_reduction <add>, %264, %cst_115 [1] : vector<2x64xf32> to vector<2xf32>
    %266 = vector.shape_cast %265 : vector<2xf32> to vector<2x1xf32>
    %cst_116 = arith.constant 1.250000e-01 : f32
    %267 = vector.broadcast %cst_116 : f32 to vector<2x1xf32>
    %268 = arith.mulf %266, %267 : vector<2x1xf32>
    %269 = arith.mulf %213, %211 : vector<2x64xf32>
    %cst_117 = arith.constant dense<0.000000e+00> : vector<2xf32>
    %270 = vector.multi_reduction <add>, %269, %cst_117 [1] : vector<2x64xf32> to vector<2xf32>
    %271 = vector.shape_cast %270 : vector<2xf32> to vector<2x1xf32>
    %cst_118 = arith.constant 1.250000e-01 : f32
    %272 = vector.broadcast %cst_118 : f32 to vector<2x1xf32>
    %273 = arith.mulf %271, %272 : vector<2x1xf32>
    %274 = tpu.concatenate %263, %268, %273 in 1 : vector<2x1xf32>, vector<2x1xf32>, vector<2x1xf32> -> vector<2x3xf32>
    %cst_119 = arith.constant dense<0xFF800000> : vector<2xf32>
    %275 = vector.multi_reduction <maximumf>, %274, %cst_119 [1] : vector<2x3xf32> to vector<2xf32>
    %276 = vector.shape_cast %275 : vector<2xf32> to vector<2x1xf32>
    %277 = vector.broadcast %276 : vector<2x1xf32> to vector<2x3xf32>
    %278 = arith.subf %274, %277 : vector<2x3xf32>
    %279 = math.exp %278 : vector<2x3xf32>
    %cst_120 = arith.constant dense<0.000000e+00> : vector<2xf32>
    %280 = vector.multi_reduction <add>, %279, %cst_120 [1] : vector<2x3xf32> to vector<2xf32>
    %281 = vector.shape_cast %280 : vector<2xf32> to vector<2x1xf32>
    %282 = tpu.reciprocal %281 {approx = true} : vector<2x1xf32> -> vector<2x1xf32>
    %283 = vector.broadcast %282 : vector<2x1xf32> to vector<2x3xf32>
    %284 = arith.mulf %279, %283 : vector<2x3xf32>
    %285 = vector.extract_strided_slice %284 {offsets = [0, 0], sizes = [2, 1], strides = [1, 1]} : vector<2x3xf32> to vector<2x1xf32>
    %286 = vector.broadcast %285 : vector<2x1xf32> to vector<2x32xf32>
    %287 = arith.mulf %286, %216 : vector<2x32xf32>
    %288 = vector.extract_strided_slice %284 {offsets = [0, 1], sizes = [2, 1], strides = [1, 1]} : vector<2x3xf32> to vector<2x1xf32>
    %289 = vector.broadcast %288 : vector<2x1xf32> to vector<2x32xf32>
    %290 = arith.mulf %289, %218 : vector<2x32xf32>
    %291 = arith.addf %287, %290 : vector<2x32xf32>
    %292 = vector.extract_strided_slice %284 {offsets = [0, 2], sizes = [2, 1], strides = [1, 1]} : vector<2x3xf32> to vector<2x1xf32>
    %293 = vector.broadcast %292 : vector<2x1xf32> to vector<2x32xf32>
    %294 = arith.mulf %293, %219 : vector<2x32xf32>
    %295 = arith.addf %291, %294 : vector<2x32xf32>
    %296 = tpu.concatenate %285, %203, %288, %292 in 1 : vector<2x1xf32>, vector<2x1xf32>, vector<2x1xf32>, vector<2x1xf32> -> vector<2x4xf32>
    %297 = tpu.concatenate %263, %204, %268, %273 in 1 : vector<2x1xf32>, vector<2x1xf32>, vector<2x1xf32>, vector<2x1xf32> -> vector<2x4xf32>
    %298 = arith.mulf %214, %208 : vector<2x64xf32>
    %cst_121 = arith.constant dense<0.000000e+00> : vector<2xf32>
    %299 = vector.multi_reduction <add>, %298, %cst_121 [1] : vector<2x64xf32> to vector<2xf32>
    %300 = vector.shape_cast %299 : vector<2xf32> to vector<2x1xf32>
    %cst_122 = arith.constant 1.250000e-01 : f32
    %301 = vector.broadcast %cst_122 : f32 to vector<2x1xf32>
    %302 = arith.mulf %300, %301 : vector<2x1xf32>
    %303 = arith.mulf %214, %209 : vector<2x64xf32>
    %cst_123 = arith.constant dense<0.000000e+00> : vector<2xf32>
    %304 = vector.multi_reduction <add>, %303, %cst_123 [1] : vector<2x64xf32> to vector<2xf32>
    %305 = vector.shape_cast %304 : vector<2xf32> to vector<2x1xf32>
    %cst_124 = arith.constant 1.250000e-01 : f32
    %306 = vector.broadcast %cst_124 : f32 to vector<2x1xf32>
    %307 = arith.mulf %305, %306 : vector<2x1xf32>
    %308 = arith.mulf %214, %211 : vector<2x64xf32>
    %cst_125 = arith.constant dense<0.000000e+00> : vector<2xf32>
    %309 = vector.multi_reduction <add>, %308, %cst_125 [1] : vector<2x64xf32> to vector<2xf32>
    %310 = vector.shape_cast %309 : vector<2xf32> to vector<2x1xf32>
    %cst_126 = arith.constant 1.250000e-01 : f32
    %311 = vector.broadcast %cst_126 : f32 to vector<2x1xf32>
    %312 = arith.mulf %310, %311 : vector<2x1xf32>
    %313 = tpu.concatenate %302, %307, %312 in 1 : vector<2x1xf32>, vector<2x1xf32>, vector<2x1xf32> -> vector<2x3xf32>
    %cst_127 = arith.constant dense<0xFF800000> : vector<2xf32>
    %314 = vector.multi_reduction <maximumf>, %313, %cst_127 [1] : vector<2x3xf32> to vector<2xf32>
    %315 = vector.shape_cast %314 : vector<2xf32> to vector<2x1xf32>
    %316 = vector.broadcast %315 : vector<2x1xf32> to vector<2x3xf32>
    %317 = arith.subf %313, %316 : vector<2x3xf32>
    %318 = math.exp %317 : vector<2x3xf32>
    %cst_128 = arith.constant dense<0.000000e+00> : vector<2xf32>
    %319 = vector.multi_reduction <add>, %318, %cst_128 [1] : vector<2x3xf32> to vector<2xf32>
    %320 = vector.shape_cast %319 : vector<2xf32> to vector<2x1xf32>
    %321 = tpu.reciprocal %320 {approx = true} : vector<2x1xf32> -> vector<2x1xf32>
    %322 = vector.broadcast %321 : vector<2x1xf32> to vector<2x3xf32>
    %323 = arith.mulf %318, %322 : vector<2x3xf32>
    %324 = vector.extract_strided_slice %323 {offsets = [0, 0], sizes = [2, 1], strides = [1, 1]} : vector<2x3xf32> to vector<2x1xf32>
    %325 = vector.broadcast %324 : vector<2x1xf32> to vector<2x32xf32>
    %326 = arith.mulf %325, %216 : vector<2x32xf32>
    %327 = vector.extract_strided_slice %323 {offsets = [0, 1], sizes = [2, 1], strides = [1, 1]} : vector<2x3xf32> to vector<2x1xf32>
    %328 = vector.broadcast %327 : vector<2x1xf32> to vector<2x32xf32>
    %329 = arith.mulf %328, %217 : vector<2x32xf32>
    %330 = arith.addf %326, %329 : vector<2x32xf32>
    %331 = vector.extract_strided_slice %323 {offsets = [0, 2], sizes = [2, 1], strides = [1, 1]} : vector<2x3xf32> to vector<2x1xf32>
    %332 = vector.broadcast %331 : vector<2x1xf32> to vector<2x32xf32>
    %333 = arith.mulf %332, %219 : vector<2x32xf32>
    %334 = arith.addf %330, %333 : vector<2x32xf32>
    %335 = tpu.concatenate %324, %327, %203, %331 in 1 : vector<2x1xf32>, vector<2x1xf32>, vector<2x1xf32>, vector<2x1xf32> -> vector<2x4xf32>
    %336 = tpu.concatenate %302, %307, %204, %312 in 1 : vector<2x1xf32>, vector<2x1xf32>, vector<2x1xf32>, vector<2x1xf32> -> vector<2x4xf32>
    %337 = arith.mulf %215, %208 : vector<2x64xf32>
    %cst_129 = arith.constant dense<0.000000e+00> : vector<2xf32>
    %338 = vector.multi_reduction <add>, %337, %cst_129 [1] : vector<2x64xf32> to vector<2xf32>
    %339 = vector.shape_cast %338 : vector<2xf32> to vector<2x1xf32>
    %cst_130 = arith.constant 1.250000e-01 : f32
    %340 = vector.broadcast %cst_130 : f32 to vector<2x1xf32>
    %341 = arith.mulf %339, %340 : vector<2x1xf32>
    %342 = arith.mulf %215, %209 : vector<2x64xf32>
    %cst_131 = arith.constant dense<0.000000e+00> : vector<2xf32>
    %343 = vector.multi_reduction <add>, %342, %cst_131 [1] : vector<2x64xf32> to vector<2xf32>
    %344 = vector.shape_cast %343 : vector<2xf32> to vector<2x1xf32>
    %cst_132 = arith.constant 1.250000e-01 : f32
    %345 = vector.broadcast %cst_132 : f32 to vector<2x1xf32>
    %346 = arith.mulf %344, %345 : vector<2x1xf32>
    %347 = arith.mulf %215, %210 : vector<2x64xf32>
    %cst_133 = arith.constant dense<0.000000e+00> : vector<2xf32>
    %348 = vector.multi_reduction <add>, %347, %cst_133 [1] : vector<2x64xf32> to vector<2xf32>
    %349 = vector.shape_cast %348 : vector<2xf32> to vector<2x1xf32>
    %cst_134 = arith.constant 1.250000e-01 : f32
    %350 = vector.broadcast %cst_134 : f32 to vector<2x1xf32>
    %351 = arith.mulf %349, %350 : vector<2x1xf32>
    %352 = tpu.concatenate %341, %346, %351 in 1 : vector<2x1xf32>, vector<2x1xf32>, vector<2x1xf32> -> vector<2x3xf32>
    %cst_135 = arith.constant dense<0xFF800000> : vector<2xf32>
    %353 = vector.multi_reduction <maximumf>, %352, %cst_135 [1] : vector<2x3xf32> to vector<2xf32>
    %354 = vector.shape_cast %353 : vector<2xf32> to vector<2x1xf32>
    %355 = vector.broadcast %354 : vector<2x1xf32> to vector<2x3xf32>
    %356 = arith.subf %352, %355 : vector<2x3xf32>
    %357 = math.exp %356 : vector<2x3xf32>
    %cst_136 = arith.constant dense<0.000000e+00> : vector<2xf32>
    %358 = vector.multi_reduction <add>, %357, %cst_136 [1] : vector<2x3xf32> to vector<2xf32>
    %359 = vector.shape_cast %358 : vector<2xf32> to vector<2x1xf32>
    %360 = tpu.reciprocal %359 {approx = true} : vector<2x1xf32> -> vector<2x1xf32>
    %361 = vector.broadcast %360 : vector<2x1xf32> to vector<2x3xf32>
    %362 = arith.mulf %357, %361 : vector<2x3xf32>
    %363 = vector.extract_strided_slice %362 {offsets = [0, 0], sizes = [2, 1], strides = [1, 1]} : vector<2x3xf32> to vector<2x1xf32>
    %364 = vector.broadcast %363 : vector<2x1xf32> to vector<2x32xf32>
    %365 = arith.mulf %364, %216 : vector<2x32xf32>
    %366 = vector.extract_strided_slice %362 {offsets = [0, 1], sizes = [2, 1], strides = [1, 1]} : vector<2x3xf32> to vector<2x1xf32>
    %367 = vector.broadcast %366 : vector<2x1xf32> to vector<2x32xf32>
    %368 = arith.mulf %367, %217 : vector<2x32xf32>
    %369 = arith.addf %365, %368 : vector<2x32xf32>
    %370 = vector.extract_strided_slice %362 {offsets = [0, 2], sizes = [2, 1], strides = [1, 1]} : vector<2x3xf32> to vector<2x1xf32>
    %371 = vector.broadcast %370 : vector<2x1xf32> to vector<2x32xf32>
    %372 = arith.mulf %371, %218 : vector<2x32xf32>
    %373 = arith.addf %369, %372 : vector<2x32xf32>
    %374 = tpu.concatenate %363, %366, %370, %203 in 1 : vector<2x1xf32>, vector<2x1xf32>, vector<2x1xf32>, vector<2x1xf32> -> vector<2x4xf32>
    %375 = tpu.concatenate %341, %346, %351, %204 in 1 : vector<2x1xf32>, vector<2x1xf32>, vector<2x1xf32>, vector<2x1xf32> -> vector<2x4xf32>
    %376 = tpu.concatenate %257, %296, %335, %374 in 1 : vector<2x4xf32>, vector<2x4xf32>, vector<2x4xf32>, vector<2x4xf32> -> vector<2x16xf32>
    %377 = tpu.concatenate %258, %297, %336, %375 in 1 : vector<2x4xf32>, vector<2x4xf32>, vector<2x4xf32>, vector<2x4xf32> -> vector<2x16xf32>
    %378 = vector.extract_strided_slice %156 {offsets = [0, 64], sizes = [8, 64], strides = [1, 1]} : vector<8x256xf32> to vector<8x64xf32>
    %379 = vector.extract_strided_slice %156 {offsets = [0, 192], sizes = [8, 64], strides = [1, 1]} : vector<8x256xf32> to vector<8x64xf32>
    %380 = vector.extract_strided_slice %202 {offsets = [0, 32], sizes = [8, 32], strides = [1, 1]} : vector<8x64xf32> to vector<8x32xf32>
    %381 = vector.extract_strided_slice %378 {offsets = [0, 0], sizes = [2, 64], strides = [1, 1]} : vector<8x64xf32> to vector<2x64xf32>
    %382 = vector.extract_strided_slice %378 {offsets = [2, 0], sizes = [2, 64], strides = [1, 1]} : vector<8x64xf32> to vector<2x64xf32>
    %383 = vector.extract_strided_slice %378 {offsets = [4, 0], sizes = [2, 64], strides = [1, 1]} : vector<8x64xf32> to vector<2x64xf32>
    %384 = vector.extract_strided_slice %378 {offsets = [6, 0], sizes = [2, 64], strides = [1, 1]} : vector<8x64xf32> to vector<2x64xf32>
    %385 = vector.extract_strided_slice %379 {offsets = [0, 0], sizes = [2, 64], strides = [1, 1]} : vector<8x64xf32> to vector<2x64xf32>
    %386 = vector.extract_strided_slice %379 {offsets = [2, 0], sizes = [2, 64], strides = [1, 1]} : vector<8x64xf32> to vector<2x64xf32>
    %387 = vector.extract_strided_slice %379 {offsets = [4, 0], sizes = [2, 64], strides = [1, 1]} : vector<8x64xf32> to vector<2x64xf32>
    %388 = vector.extract_strided_slice %379 {offsets = [6, 0], sizes = [2, 64], strides = [1, 1]} : vector<8x64xf32> to vector<2x64xf32>
    %389 = vector.extract_strided_slice %380 {offsets = [0, 0], sizes = [2, 32], strides = [1, 1]} : vector<8x32xf32> to vector<2x32xf32>
    %390 = vector.extract_strided_slice %380 {offsets = [2, 0], sizes = [2, 32], strides = [1, 1]} : vector<8x32xf32> to vector<2x32xf32>
    %391 = vector.extract_strided_slice %380 {offsets = [4, 0], sizes = [2, 32], strides = [1, 1]} : vector<8x32xf32> to vector<2x32xf32>
    %392 = vector.extract_strided_slice %380 {offsets = [6, 0], sizes = [2, 32], strides = [1, 1]} : vector<8x32xf32> to vector<2x32xf32>
    %393 = arith.mulf %385, %382 : vector<2x64xf32>
    %cst_137 = arith.constant dense<0.000000e+00> : vector<2xf32>
    %394 = vector.multi_reduction <add>, %393, %cst_137 [1] : vector<2x64xf32> to vector<2xf32>
    %395 = vector.shape_cast %394 : vector<2xf32> to vector<2x1xf32>
    %cst_138 = arith.constant 1.250000e-01 : f32
    %396 = vector.broadcast %cst_138 : f32 to vector<2x1xf32>
    %397 = arith.mulf %395, %396 : vector<2x1xf32>
    %398 = arith.mulf %385, %383 : vector<2x64xf32>
    %cst_139 = arith.constant dense<0.000000e+00> : vector<2xf32>
    %399 = vector.multi_reduction <add>, %398, %cst_139 [1] : vector<2x64xf32> to vector<2xf32>
    %400 = vector.shape_cast %399 : vector<2xf32> to vector<2x1xf32>
    %cst_140 = arith.constant 1.250000e-01 : f32
    %401 = vector.broadcast %cst_140 : f32 to vector<2x1xf32>
    %402 = arith.mulf %400, %401 : vector<2x1xf32>
    %403 = arith.mulf %385, %384 : vector<2x64xf32>
    %cst_141 = arith.constant dense<0.000000e+00> : vector<2xf32>
    %404 = vector.multi_reduction <add>, %403, %cst_141 [1] : vector<2x64xf32> to vector<2xf32>
    %405 = vector.shape_cast %404 : vector<2xf32> to vector<2x1xf32>
    %cst_142 = arith.constant 1.250000e-01 : f32
    %406 = vector.broadcast %cst_142 : f32 to vector<2x1xf32>
    %407 = arith.mulf %405, %406 : vector<2x1xf32>
    %408 = tpu.concatenate %397, %402, %407 in 1 : vector<2x1xf32>, vector<2x1xf32>, vector<2x1xf32> -> vector<2x3xf32>
    %cst_143 = arith.constant dense<0xFF800000> : vector<2xf32>
    %409 = vector.multi_reduction <maximumf>, %408, %cst_143 [1] : vector<2x3xf32> to vector<2xf32>
    %410 = vector.shape_cast %409 : vector<2xf32> to vector<2x1xf32>
    %411 = vector.broadcast %410 : vector<2x1xf32> to vector<2x3xf32>
    %412 = arith.subf %408, %411 : vector<2x3xf32>
    %413 = math.exp %412 : vector<2x3xf32>
    %cst_144 = arith.constant dense<0.000000e+00> : vector<2xf32>
    %414 = vector.multi_reduction <add>, %413, %cst_144 [1] : vector<2x3xf32> to vector<2xf32>
    %415 = vector.shape_cast %414 : vector<2xf32> to vector<2x1xf32>
    %416 = tpu.reciprocal %415 {approx = true} : vector<2x1xf32> -> vector<2x1xf32>
    %417 = vector.broadcast %416 : vector<2x1xf32> to vector<2x3xf32>
    %418 = arith.mulf %413, %417 : vector<2x3xf32>
    %419 = vector.extract_strided_slice %418 {offsets = [0, 0], sizes = [2, 1], strides = [1, 1]} : vector<2x3xf32> to vector<2x1xf32>
    %420 = vector.broadcast %419 : vector<2x1xf32> to vector<2x32xf32>
    %421 = arith.mulf %420, %390 : vector<2x32xf32>
    %422 = vector.extract_strided_slice %418 {offsets = [0, 1], sizes = [2, 1], strides = [1, 1]} : vector<2x3xf32> to vector<2x1xf32>
    %423 = vector.broadcast %422 : vector<2x1xf32> to vector<2x32xf32>
    %424 = arith.mulf %423, %391 : vector<2x32xf32>
    %425 = arith.addf %421, %424 : vector<2x32xf32>
    %426 = vector.extract_strided_slice %418 {offsets = [0, 2], sizes = [2, 1], strides = [1, 1]} : vector<2x3xf32> to vector<2x1xf32>
    %427 = vector.broadcast %426 : vector<2x1xf32> to vector<2x32xf32>
    %428 = arith.mulf %427, %392 : vector<2x32xf32>
    %429 = arith.addf %425, %428 : vector<2x32xf32>
    %430 = tpu.concatenate %203, %419, %422, %426 in 1 : vector<2x1xf32>, vector<2x1xf32>, vector<2x1xf32>, vector<2x1xf32> -> vector<2x4xf32>
    %431 = tpu.concatenate %204, %397, %402, %407 in 1 : vector<2x1xf32>, vector<2x1xf32>, vector<2x1xf32>, vector<2x1xf32> -> vector<2x4xf32>
    %432 = arith.mulf %386, %381 : vector<2x64xf32>
    %cst_145 = arith.constant dense<0.000000e+00> : vector<2xf32>
    %433 = vector.multi_reduction <add>, %432, %cst_145 [1] : vector<2x64xf32> to vector<2xf32>
    %434 = vector.shape_cast %433 : vector<2xf32> to vector<2x1xf32>
    %cst_146 = arith.constant 1.250000e-01 : f32
    %435 = vector.broadcast %cst_146 : f32 to vector<2x1xf32>
    %436 = arith.mulf %434, %435 : vector<2x1xf32>
    %437 = arith.mulf %386, %383 : vector<2x64xf32>
    %cst_147 = arith.constant dense<0.000000e+00> : vector<2xf32>
    %438 = vector.multi_reduction <add>, %437, %cst_147 [1] : vector<2x64xf32> to vector<2xf32>
    %439 = vector.shape_cast %438 : vector<2xf32> to vector<2x1xf32>
    %cst_148 = arith.constant 1.250000e-01 : f32
    %440 = vector.broadcast %cst_148 : f32 to vector<2x1xf32>
    %441 = arith.mulf %439, %440 : vector<2x1xf32>
    %442 = arith.mulf %386, %384 : vector<2x64xf32>
    %cst_149 = arith.constant dense<0.000000e+00> : vector<2xf32>
    %443 = vector.multi_reduction <add>, %442, %cst_149 [1] : vector<2x64xf32> to vector<2xf32>
    %444 = vector.shape_cast %443 : vector<2xf32> to vector<2x1xf32>
    %cst_150 = arith.constant 1.250000e-01 : f32
    %445 = vector.broadcast %cst_150 : f32 to vector<2x1xf32>
    %446 = arith.mulf %444, %445 : vector<2x1xf32>
    %447 = tpu.concatenate %436, %441, %446 in 1 : vector<2x1xf32>, vector<2x1xf32>, vector<2x1xf32> -> vector<2x3xf32>
    %cst_151 = arith.constant dense<0xFF800000> : vector<2xf32>
    %448 = vector.multi_reduction <maximumf>, %447, %cst_151 [1] : vector<2x3xf32> to vector<2xf32>
    %449 = vector.shape_cast %448 : vector<2xf32> to vector<2x1xf32>
    %450 = vector.broadcast %449 : vector<2x1xf32> to vector<2x3xf32>
    %451 = arith.subf %447, %450 : vector<2x3xf32>
    %452 = math.exp %451 : vector<2x3xf32>
    %cst_152 = arith.constant dense<0.000000e+00> : vector<2xf32>
    %453 = vector.multi_reduction <add>, %452, %cst_152 [1] : vector<2x3xf32> to vector<2xf32>
    %454 = vector.shape_cast %453 : vector<2xf32> to vector<2x1xf32>
    %455 = tpu.reciprocal %454 {approx = true} : vector<2x1xf32> -> vector<2x1xf32>
    %456 = vector.broadcast %455 : vector<2x1xf32> to vector<2x3xf32>
    %457 = arith.mulf %452, %456 : vector<2x3xf32>
    %458 = vector.extract_strided_slice %457 {offsets = [0, 0], sizes = [2, 1], strides = [1, 1]} : vector<2x3xf32> to vector<2x1xf32>
    %459 = vector.broadcast %458 : vector<2x1xf32> to vector<2x32xf32>
    %460 = arith.mulf %459, %389 : vector<2x32xf32>
    %461 = vector.extract_strided_slice %457 {offsets = [0, 1], sizes = [2, 1], strides = [1, 1]} : vector<2x3xf32> to vector<2x1xf32>
    %462 = vector.broadcast %461 : vector<2x1xf32> to vector<2x32xf32>
    %463 = arith.mulf %462, %391 : vector<2x32xf32>
    %464 = arith.addf %460, %463 : vector<2x32xf32>
    %465 = vector.extract_strided_slice %457 {offsets = [0, 2], sizes = [2, 1], strides = [1, 1]} : vector<2x3xf32> to vector<2x1xf32>
    %466 = vector.broadcast %465 : vector<2x1xf32> to vector<2x32xf32>
    %467 = arith.mulf %466, %392 : vector<2x32xf32>
    %468 = arith.addf %464, %467 : vector<2x32xf32>
    %469 = tpu.concatenate %458, %203, %461, %465 in 1 : vector<2x1xf32>, vector<2x1xf32>, vector<2x1xf32>, vector<2x1xf32> -> vector<2x4xf32>
    %470 = tpu.concatenate %436, %204, %441, %446 in 1 : vector<2x1xf32>, vector<2x1xf32>, vector<2x1xf32>, vector<2x1xf32> -> vector<2x4xf32>
    %471 = arith.mulf %387, %381 : vector<2x64xf32>
    %cst_153 = arith.constant dense<0.000000e+00> : vector<2xf32>
    %472 = vector.multi_reduction <add>, %471, %cst_153 [1] : vector<2x64xf32> to vector<2xf32>
    %473 = vector.shape_cast %472 : vector<2xf32> to vector<2x1xf32>
    %cst_154 = arith.constant 1.250000e-01 : f32
    %474 = vector.broadcast %cst_154 : f32 to vector<2x1xf32>
    %475 = arith.mulf %473, %474 : vector<2x1xf32>
    %476 = arith.mulf %387, %382 : vector<2x64xf32>
    %cst_155 = arith.constant dense<0.000000e+00> : vector<2xf32>
    %477 = vector.multi_reduction <add>, %476, %cst_155 [1] : vector<2x64xf32> to vector<2xf32>
    %478 = vector.shape_cast %477 : vector<2xf32> to vector<2x1xf32>
    %cst_156 = arith.constant 1.250000e-01 : f32
    %479 = vector.broadcast %cst_156 : f32 to vector<2x1xf32>
    %480 = arith.mulf %478, %479 : vector<2x1xf32>
    %481 = arith.mulf %387, %384 : vector<2x64xf32>
    %cst_157 = arith.constant dense<0.000000e+00> : vector<2xf32>
    %482 = vector.multi_reduction <add>, %481, %cst_157 [1] : vector<2x64xf32> to vector<2xf32>
    %483 = vector.shape_cast %482 : vector<2xf32> to vector<2x1xf32>
    %cst_158 = arith.constant 1.250000e-01 : f32
    %484 = vector.broadcast %cst_158 : f32 to vector<2x1xf32>
    %485 = arith.mulf %483, %484 : vector<2x1xf32>
    %486 = tpu.concatenate %475, %480, %485 in 1 : vector<2x1xf32>, vector<2x1xf32>, vector<2x1xf32> -> vector<2x3xf32>
    %cst_159 = arith.constant dense<0xFF800000> : vector<2xf32>
    %487 = vector.multi_reduction <maximumf>, %486, %cst_159 [1] : vector<2x3xf32> to vector<2xf32>
    %488 = vector.shape_cast %487 : vector<2xf32> to vector<2x1xf32>
    %489 = vector.broadcast %488 : vector<2x1xf32> to vector<2x3xf32>
    %490 = arith.subf %486, %489 : vector<2x3xf32>
    %491 = math.exp %490 : vector<2x3xf32>
    %cst_160 = arith.constant dense<0.000000e+00> : vector<2xf32>
    %492 = vector.multi_reduction <add>, %491, %cst_160 [1] : vector<2x3xf32> to vector<2xf32>
    %493 = vector.shape_cast %492 : vector<2xf32> to vector<2x1xf32>
    %494 = tpu.reciprocal %493 {approx = true} : vector<2x1xf32> -> vector<2x1xf32>
    %495 = vector.broadcast %494 : vector<2x1xf32> to vector<2x3xf32>
    %496 = arith.mulf %491, %495 : vector<2x3xf32>
    %497 = vector.extract_strided_slice %496 {offsets = [0, 0], sizes = [2, 1], strides = [1, 1]} : vector<2x3xf32> to vector<2x1xf32>
    %498 = vector.broadcast %497 : vector<2x1xf32> to vector<2x32xf32>
    %499 = arith.mulf %498, %389 : vector<2x32xf32>
    %500 = vector.extract_strided_slice %496 {offsets = [0, 1], sizes = [2, 1], strides = [1, 1]} : vector<2x3xf32> to vector<2x1xf32>
    %501 = vector.broadcast %500 : vector<2x1xf32> to vector<2x32xf32>
    %502 = arith.mulf %501, %390 : vector<2x32xf32>
    %503 = arith.addf %499, %502 : vector<2x32xf32>
    %504 = vector.extract_strided_slice %496 {offsets = [0, 2], sizes = [2, 1], strides = [1, 1]} : vector<2x3xf32> to vector<2x1xf32>
    %505 = vector.broadcast %504 : vector<2x1xf32> to vector<2x32xf32>
    %506 = arith.mulf %505, %392 : vector<2x32xf32>
    %507 = arith.addf %503, %506 : vector<2x32xf32>
    %508 = tpu.concatenate %497, %500, %203, %504 in 1 : vector<2x1xf32>, vector<2x1xf32>, vector<2x1xf32>, vector<2x1xf32> -> vector<2x4xf32>
    %509 = tpu.concatenate %475, %480, %204, %485 in 1 : vector<2x1xf32>, vector<2x1xf32>, vector<2x1xf32>, vector<2x1xf32> -> vector<2x4xf32>
    %510 = arith.mulf %388, %381 : vector<2x64xf32>
    %cst_161 = arith.constant dense<0.000000e+00> : vector<2xf32>
    %511 = vector.multi_reduction <add>, %510, %cst_161 [1] : vector<2x64xf32> to vector<2xf32>
    %512 = vector.shape_cast %511 : vector<2xf32> to vector<2x1xf32>
    %cst_162 = arith.constant 1.250000e-01 : f32
    %513 = vector.broadcast %cst_162 : f32 to vector<2x1xf32>
    %514 = arith.mulf %512, %513 : vector<2x1xf32>
    %515 = arith.mulf %388, %382 : vector<2x64xf32>
    %cst_163 = arith.constant dense<0.000000e+00> : vector<2xf32>
    %516 = vector.multi_reduction <add>, %515, %cst_163 [1] : vector<2x64xf32> to vector<2xf32>
    %517 = vector.shape_cast %516 : vector<2xf32> to vector<2x1xf32>
    %cst_164 = arith.constant 1.250000e-01 : f32
    %518 = vector.broadcast %cst_164 : f32 to vector<2x1xf32>
    %519 = arith.mulf %517, %518 : vector<2x1xf32>
    %520 = arith.mulf %388, %383 : vector<2x64xf32>
    %cst_165 = arith.constant dense<0.000000e+00> : vector<2xf32>
    %521 = vector.multi_reduction <add>, %520, %cst_165 [1] : vector<2x64xf32> to vector<2xf32>
    %522 = vector.shape_cast %521 : vector<2xf32> to vector<2x1xf32>
    %cst_166 = arith.constant 1.250000e-01 : f32
    %523 = vector.broadcast %cst_166 : f32 to vector<2x1xf32>
    %524 = arith.mulf %522, %523 : vector<2x1xf32>
    %525 = tpu.concatenate %514, %519, %524 in 1 : vector<2x1xf32>, vector<2x1xf32>, vector<2x1xf32> -> vector<2x3xf32>
    %cst_167 = arith.constant dense<0xFF800000> : vector<2xf32>
    %526 = vector.multi_reduction <maximumf>, %525, %cst_167 [1] : vector<2x3xf32> to vector<2xf32>
    %527 = vector.shape_cast %526 : vector<2xf32> to vector<2x1xf32>
    %528 = vector.broadcast %527 : vector<2x1xf32> to vector<2x3xf32>
    %529 = arith.subf %525, %528 : vector<2x3xf32>
    %530 = math.exp %529 : vector<2x3xf32>
    %cst_168 = arith.constant dense<0.000000e+00> : vector<2xf32>
    %531 = vector.multi_reduction <add>, %530, %cst_168 [1] : vector<2x3xf32> to vector<2xf32>
    %532 = vector.shape_cast %531 : vector<2xf32> to vector<2x1xf32>
    %533 = tpu.reciprocal %532 {approx = true} : vector<2x1xf32> -> vector<2x1xf32>
    %534 = vector.broadcast %533 : vector<2x1xf32> to vector<2x3xf32>
    %535 = arith.mulf %530, %534 : vector<2x3xf32>
    %536 = vector.extract_strided_slice %535 {offsets = [0, 0], sizes = [2, 1], strides = [1, 1]} : vector<2x3xf32> to vector<2x1xf32>
    %537 = vector.broadcast %536 : vector<2x1xf32> to vector<2x32xf32>
    %538 = arith.mulf %537, %389 : vector<2x32xf32>
    %539 = vector.extract_strided_slice %535 {offsets = [0, 1], sizes = [2, 1], strides = [1, 1]} : vector<2x3xf32> to vector<2x1xf32>
    %540 = vector.broadcast %539 : vector<2x1xf32> to vector<2x32xf32>
    %541 = arith.mulf %540, %390 : vector<2x32xf32>
    %542 = arith.addf %538, %541 : vector<2x32xf32>
    %543 = vector.extract_strided_slice %535 {offsets = [0, 2], sizes = [2, 1], strides = [1, 1]} : vector<2x3xf32> to vector<2x1xf32>
    %544 = vector.broadcast %543 : vector<2x1xf32> to vector<2x32xf32>
    %545 = arith.mulf %544, %391 : vector<2x32xf32>
    %546 = arith.addf %542, %545 : vector<2x32xf32>
    %547 = tpu.concatenate %536, %539, %543, %203 in 1 : vector<2x1xf32>, vector<2x1xf32>, vector<2x1xf32>, vector<2x1xf32> -> vector<2x4xf32>
    %548 = tpu.concatenate %514, %519, %524, %204 in 1 : vector<2x1xf32>, vector<2x1xf32>, vector<2x1xf32>, vector<2x1xf32> -> vector<2x4xf32>
    %549 = tpu.concatenate %430, %469, %508, %547 in 1 : vector<2x4xf32>, vector<2x4xf32>, vector<2x4xf32>, vector<2x4xf32> -> vector<2x16xf32>
    %550 = tpu.concatenate %431, %470, %509, %548 in 1 : vector<2x4xf32>, vector<2x4xf32>, vector<2x4xf32>, vector<2x4xf32> -> vector<2x16xf32>
    %551 = tpu.concatenate %256, %429 in 1 : vector<2x32xf32>, vector<2x32xf32> -> vector<2x64xf32>
    %552 = tpu.concatenate %295, %468 in 1 : vector<2x32xf32>, vector<2x32xf32> -> vector<2x64xf32>
    %553 = tpu.concatenate %334, %507 in 1 : vector<2x32xf32>, vector<2x32xf32> -> vector<2x64xf32>
    %554 = tpu.concatenate %373, %546 in 1 : vector<2x32xf32>, vector<2x32xf32> -> vector<2x64xf32>
    %555 = tpu.concatenate %551, %552, %553, %554 in 0 : vector<2x64xf32>, vector<2x64xf32>, vector<2x64xf32>, vector<2x64xf32> -> vector<8x64xf32>
    %556 = vector.extract_strided_slice %110 {offsets = [0, 0], sizes = [2, 64], strides = [1, 1]} : vector<8x64xf32> to vector<2x64xf32>
    %557 = vector.extract_strided_slice %110 {offsets = [2, 0], sizes = [2, 64], strides = [1, 1]} : vector<8x64xf32> to vector<2x64xf32>
    %558 = vector.extract_strided_slice %110 {offsets = [4, 0], sizes = [2, 64], strides = [1, 1]} : vector<8x64xf32> to vector<2x64xf32>
    %559 = vector.extract_strided_slice %110 {offsets = [6, 0], sizes = [2, 64], strides = [1, 1]} : vector<8x64xf32> to vector<2x64xf32>
    %560 = arith.addf %556, %557 : vector<2x64xf32>
    %561 = arith.addf %560, %558 : vector<2x64xf32>
    %562 = arith.addf %561, %559 : vector<2x64xf32>
    %563 = arith.subf %562, %556 : vector<2x64xf32>
    %564 = arith.subf %562, %557 : vector<2x64xf32>
    %565 = arith.subf %562, %558 : vector<2x64xf32>
    %566 = arith.subf %562, %559 : vector<2x64xf32>
    %567 = tpu.concatenate %563, %564, %565, %566 in 0 : vector<2x64xf32>, vector<2x64xf32>, vector<2x64xf32>, vector<2x64xf32> -> vector<8x64xf32>
    %568 = arith.addf %567, %555 : vector<8x64xf32>
    %c0_169 = arith.constant 0 : index
    %c0_170 = arith.constant 0 : index
    %569 = vector.load %arg11[%c0_169, %c0_170] : memref<1x64xf32, #tpu.memory_space<vmem>>, vector<1x64xf32>
    %c0_171 = arith.constant 0 : index
    %c0_172 = arith.constant 0 : index
    %570 = vector.load %arg12[%c0_171, %c0_172] : memref<1x64xf32, #tpu.memory_space<vmem>>, vector<1x64xf32>
    %cst_173 = arith.constant dense<0.000000e+00> : vector<8xf32>
    %571 = vector.multi_reduction <add>, %568, %cst_173 [1] : vector<8x64xf32> to vector<8xf32>
    %572 = vector.shape_cast %571 : vector<8xf32> to vector<8x1xf32>
    %cst_174 = arith.constant 6.400000e+01 : f32
    %573 = vector.broadcast %cst_174 : f32 to vector<8x1xf32>
    %574 = arith.divf %572, %573 : vector<8x1xf32>
    %575 = vector.broadcast %574 : vector<8x1xf32> to vector<8x64xf32>
    %576 = arith.subf %568, %575 : vector<8x64xf32>
    %577 = arith.mulf %576, %576 : vector<8x64xf32>
    %cst_175 = arith.constant dense<0.000000e+00> : vector<8xf32>
    %578 = vector.multi_reduction <add>, %577, %cst_175 [1] : vector<8x64xf32> to vector<8xf32>
    %579 = vector.shape_cast %578 : vector<8xf32> to vector<8x1xf32>
    %cst_176 = arith.constant 6.400000e+01 : f32
    %580 = vector.broadcast %cst_176 : f32 to vector<8x1xf32>
    %581 = arith.divf %579, %580 : vector<8x1xf32>
    %582 = vector.broadcast %574 : vector<8x1xf32> to vector<8x64xf32>
    %583 = arith.subf %568, %582 : vector<8x64xf32>
    %cst_177 = arith.constant 9.99999974E-6 : f32
    %584 = vector.broadcast %cst_177 : f32 to vector<8x1xf32>
    %585 = arith.addf %581, %584 : vector<8x1xf32>
    %586 = math.rsqrt %585 : vector<8x1xf32>
    %587 = vector.broadcast %586 : vector<8x1xf32> to vector<8x64xf32>
    %588 = arith.mulf %583, %587 : vector<8x64xf32>
    %589 = vector.broadcast %569 : vector<1x64xf32> to vector<8x64xf32>
    %590 = arith.mulf %588, %589 : vector<8x64xf32>
    %591 = vector.broadcast %570 : vector<1x64xf32> to vector<8x64xf32>
    %592 = arith.addf %590, %591 : vector<8x64xf32>
    %c0_178 = arith.constant 0 : index
    %c0_179 = arith.constant 0 : index
    %593 = vector.load %arg13[%c0_178, %c0_179] : memref<64x64xf32, #tpu.memory_space<vmem>>, vector<64x64xf32>
    %cst_180 = arith.constant dense<0.000000e+00> : vector<8x64xf32>
    %594 = tpu.matmul %592, %593, %cst_180 {dimension_numbers = #tpu.dot_dimension_numbers<[1], [0], [0], [1], [0, 0, 1, 1], [], []>} : vector<8x64xf32>, vector<64x64xf32>, vector<8x64xf32> -> vector<8x64xf32>
    %c0_181 = arith.constant 0 : index
    %c0_182 = arith.constant 0 : index
    %595 = vector.load %arg14[%c0_181, %c0_182] : memref<1x64xf32, #tpu.memory_space<vmem>>, vector<1x64xf32>
    %596 = vector.broadcast %595 : vector<1x64xf32> to vector<8x64xf32>
    %597 = arith.addf %594, %596 : vector<8x64xf32>
    %cst_183 = arith.constant 5.000000e-01 : f32
    %598 = vector.broadcast %cst_183 : f32 to vector<8x64xf32>
    %599 = arith.mulf %598, %597 : vector<8x64xf32>
    %cst_184 = arith.constant 0.707106769 : f32
    %600 = vector.broadcast %cst_184 : f32 to vector<8x64xf32>
    %601 = arith.mulf %597, %600 : vector<8x64xf32>
    %cst_185 = arith.constant 0.000000e+00 : f32
    %602 = vector.broadcast %cst_185 : f32 to vector<8x64xf32>
    %603 = arith.cmpf oge, %601, %602 : vector<8x64xf32>
    %cst_186 = arith.constant 1.000000e+00 : f32
    %cst_187 = arith.constant -1.000000e+00 : f32
    %604 = vector.broadcast %cst_186 : f32 to vector<8x64xf32>
    %605 = vector.broadcast %cst_187 : f32 to vector<8x64xf32>
    %606 = arith.select %603, %604, %605 : vector<8x64xi1>, vector<8x64xf32>
    %607 = math.absf %601 : vector<8x64xf32>
    %cst_188 = arith.constant 0.327591091 : f32
    %608 = vector.broadcast %cst_188 : f32 to vector<8x64xf32>
    %609 = arith.mulf %608, %607 : vector<8x64xf32>
    %cst_189 = arith.constant 1.000000e+00 : f32
    %610 = vector.broadcast %cst_189 : f32 to vector<8x64xf32>
    %611 = arith.addf %610, %609 : vector<8x64xf32>
    %cst_190 = arith.constant 1.000000e+00 : f32
    %612 = vector.broadcast %cst_190 : f32 to vector<8x64xf32>
    %613 = arith.divf %612, %611 : vector<8x64xf32>
    %cst_191 = arith.constant 1.06140542 : f32
    %614 = vector.broadcast %cst_191 : f32 to vector<8x64xf32>
    %615 = arith.mulf %614, %613 : vector<8x64xf32>
    %cst_192 = arith.constant -1.45315206 : f32
    %616 = vector.broadcast %cst_192 : f32 to vector<8x64xf32>
    %617 = arith.addf %615, %616 : vector<8x64xf32>
    %618 = arith.mulf %617, %613 : vector<8x64xf32>
    %cst_193 = arith.constant 1.42141378 : f32
    %619 = vector.broadcast %cst_193 : f32 to vector<8x64xf32>
    %620 = arith.addf %618, %619 : vector<8x64xf32>
    %621 = arith.mulf %620, %613 : vector<8x64xf32>
    %cst_194 = arith.constant -0.284496725 : f32
    %622 = vector.broadcast %cst_194 : f32 to vector<8x64xf32>
    %623 = arith.addf %621, %622 : vector<8x64xf32>
    %624 = arith.mulf %623, %613 : vector<8x64xf32>
    %cst_195 = arith.constant 0.254829586 : f32
    %625 = vector.broadcast %cst_195 : f32 to vector<8x64xf32>
    %626 = arith.addf %624, %625 : vector<8x64xf32>
    %627 = arith.mulf %626, %613 : vector<8x64xf32>
    %cst_196 = arith.constant 0.000000e+00 : f32
    %628 = vector.broadcast %cst_196 : f32 to vector<8x64xf32>
    %629 = arith.subf %628, %607 : vector<8x64xf32>
    %630 = arith.mulf %629, %607 : vector<8x64xf32>
    %631 = math.exp %630 : vector<8x64xf32>
    %632 = arith.mulf %627, %631 : vector<8x64xf32>
    %cst_197 = arith.constant 1.000000e+00 : f32
    %633 = vector.broadcast %cst_197 : f32 to vector<8x64xf32>
    %634 = arith.subf %633, %632 : vector<8x64xf32>
    %635 = arith.mulf %606, %634 : vector<8x64xf32>
    %cst_198 = arith.constant 1.000000e+00 : f32
    %636 = vector.broadcast %cst_198 : f32 to vector<8x64xf32>
    %637 = arith.addf %636, %635 : vector<8x64xf32>
    %638 = arith.mulf %599, %637 : vector<8x64xf32>
    %639 = arith.addf %592, %638 : vector<8x64xf32>
    %c0_199 = arith.constant 0 : index
    %c0_200 = arith.constant 0 : index
    %640 = vector.load %arg15[%c0_199, %c0_200] : memref<1x64xf32, #tpu.memory_space<vmem>>, vector<1x64xf32>
    %c0_201 = arith.constant 0 : index
    %c0_202 = arith.constant 0 : index
    %641 = vector.load %arg16[%c0_201, %c0_202] : memref<1x64xf32, #tpu.memory_space<vmem>>, vector<1x64xf32>
    %cst_203 = arith.constant dense<0.000000e+00> : vector<8xf32>
    %642 = vector.multi_reduction <add>, %639, %cst_203 [1] : vector<8x64xf32> to vector<8xf32>
    %643 = vector.shape_cast %642 : vector<8xf32> to vector<8x1xf32>
    %cst_204 = arith.constant 6.400000e+01 : f32
    %644 = vector.broadcast %cst_204 : f32 to vector<8x1xf32>
    %645 = arith.divf %643, %644 : vector<8x1xf32>
    %646 = vector.broadcast %645 : vector<8x1xf32> to vector<8x64xf32>
    %647 = arith.subf %639, %646 : vector<8x64xf32>
    %648 = arith.mulf %647, %647 : vector<8x64xf32>
    %cst_205 = arith.constant dense<0.000000e+00> : vector<8xf32>
    %649 = vector.multi_reduction <add>, %648, %cst_205 [1] : vector<8x64xf32> to vector<8xf32>
    %650 = vector.shape_cast %649 : vector<8xf32> to vector<8x1xf32>
    %cst_206 = arith.constant 6.400000e+01 : f32
    %651 = vector.broadcast %cst_206 : f32 to vector<8x1xf32>
    %652 = arith.divf %650, %651 : vector<8x1xf32>
    %653 = vector.broadcast %645 : vector<8x1xf32> to vector<8x64xf32>
    %654 = arith.subf %639, %653 : vector<8x64xf32>
    %cst_207 = arith.constant 9.99999974E-6 : f32
    %655 = vector.broadcast %cst_207 : f32 to vector<8x1xf32>
    %656 = arith.addf %652, %655 : vector<8x1xf32>
    %657 = math.rsqrt %656 : vector<8x1xf32>
    %658 = vector.broadcast %657 : vector<8x1xf32> to vector<8x64xf32>
    %659 = arith.mulf %654, %658 : vector<8x64xf32>
    %660 = vector.broadcast %640 : vector<1x64xf32> to vector<8x64xf32>
    %661 = arith.mulf %659, %660 : vector<8x64xf32>
    %662 = vector.broadcast %641 : vector<1x64xf32> to vector<8x64xf32>
    %663 = arith.addf %661, %662 : vector<8x64xf32>
    %664 = tpu.concatenate %64, %663 in 1 : vector<8x64xf32>, vector<8x64xf32> -> vector<8x128xf32>
    %c0_208 = arith.constant 0 : index
    %c0_209 = arith.constant 0 : index
    %665 = vector.load %arg17[%c0_208, %c0_209] : memref<128x64xf32, #tpu.memory_space<vmem>>, vector<128x64xf32>
    %cst_210 = arith.constant dense<0.000000e+00> : vector<8x64xf32>
    %666 = tpu.matmul %664, %665, %cst_210 {dimension_numbers = #tpu.dot_dimension_numbers<[1], [0], [0], [1], [0, 0, 1, 1], [], []>} : vector<8x128xf32>, vector<128x64xf32>, vector<8x64xf32> -> vector<8x64xf32>
    %c0_211 = arith.constant 0 : index
    %c0_212 = arith.constant 0 : index
    %667 = vector.load %arg18[%c0_211, %c0_212] : memref<1x64xf32, #tpu.memory_space<vmem>>, vector<1x64xf32>
    %668 = vector.broadcast %667 : vector<1x64xf32> to vector<8x64xf32>
    %669 = arith.addf %666, %668 : vector<8x64xf32>
    %cst_213 = arith.constant 5.000000e-01 : f32
    %670 = vector.broadcast %cst_213 : f32 to vector<8x64xf32>
    %671 = arith.mulf %670, %669 : vector<8x64xf32>
    %cst_214 = arith.constant 0.707106769 : f32
    %672 = vector.broadcast %cst_214 : f32 to vector<8x64xf32>
    %673 = arith.mulf %669, %672 : vector<8x64xf32>
    %cst_215 = arith.constant 0.000000e+00 : f32
    %674 = vector.broadcast %cst_215 : f32 to vector<8x64xf32>
    %675 = arith.cmpf oge, %673, %674 : vector<8x64xf32>
    %cst_216 = arith.constant 1.000000e+00 : f32
    %cst_217 = arith.constant -1.000000e+00 : f32
    %676 = vector.broadcast %cst_216 : f32 to vector<8x64xf32>
    %677 = vector.broadcast %cst_217 : f32 to vector<8x64xf32>
    %678 = arith.select %675, %676, %677 : vector<8x64xi1>, vector<8x64xf32>
    %679 = math.absf %673 : vector<8x64xf32>
    %cst_218 = arith.constant 0.327591091 : f32
    %680 = vector.broadcast %cst_218 : f32 to vector<8x64xf32>
    %681 = arith.mulf %680, %679 : vector<8x64xf32>
    %cst_219 = arith.constant 1.000000e+00 : f32
    %682 = vector.broadcast %cst_219 : f32 to vector<8x64xf32>
    %683 = arith.addf %682, %681 : vector<8x64xf32>
    %cst_220 = arith.constant 1.000000e+00 : f32
    %684 = vector.broadcast %cst_220 : f32 to vector<8x64xf32>
    %685 = arith.divf %684, %683 : vector<8x64xf32>
    %cst_221 = arith.constant 1.06140542 : f32
    %686 = vector.broadcast %cst_221 : f32 to vector<8x64xf32>
    %687 = arith.mulf %686, %685 : vector<8x64xf32>
    %cst_222 = arith.constant -1.45315206 : f32
    %688 = vector.broadcast %cst_222 : f32 to vector<8x64xf32>
    %689 = arith.addf %687, %688 : vector<8x64xf32>
    %690 = arith.mulf %689, %685 : vector<8x64xf32>
    %cst_223 = arith.constant 1.42141378 : f32
    %691 = vector.broadcast %cst_223 : f32 to vector<8x64xf32>
    %692 = arith.addf %690, %691 : vector<8x64xf32>
    %693 = arith.mulf %692, %685 : vector<8x64xf32>
    %cst_224 = arith.constant -0.284496725 : f32
    %694 = vector.broadcast %cst_224 : f32 to vector<8x64xf32>
    %695 = arith.addf %693, %694 : vector<8x64xf32>
    %696 = arith.mulf %695, %685 : vector<8x64xf32>
    %cst_225 = arith.constant 0.254829586 : f32
    %697 = vector.broadcast %cst_225 : f32 to vector<8x64xf32>
    %698 = arith.addf %696, %697 : vector<8x64xf32>
    %699 = arith.mulf %698, %685 : vector<8x64xf32>
    %cst_226 = arith.constant 0.000000e+00 : f32
    %700 = vector.broadcast %cst_226 : f32 to vector<8x64xf32>
    %701 = arith.subf %700, %679 : vector<8x64xf32>
    %702 = arith.mulf %701, %679 : vector<8x64xf32>
    %703 = math.exp %702 : vector<8x64xf32>
    %704 = arith.mulf %699, %703 : vector<8x64xf32>
    %cst_227 = arith.constant 1.000000e+00 : f32
    %705 = vector.broadcast %cst_227 : f32 to vector<8x64xf32>
    %706 = arith.subf %705, %704 : vector<8x64xf32>
    %707 = arith.mulf %678, %706 : vector<8x64xf32>
    %cst_228 = arith.constant 1.000000e+00 : f32
    %708 = vector.broadcast %cst_228 : f32 to vector<8x64xf32>
    %709 = arith.addf %708, %707 : vector<8x64xf32>
    %710 = arith.mulf %671, %709 : vector<8x64xf32>
    %c0_229 = arith.constant 0 : index
    %c0_230 = arith.constant 0 : index
    %711 = vector.load %arg19[%c0_229, %c0_230] : memref<64x64xf32, #tpu.memory_space<vmem>>, vector<64x64xf32>
    %cst_231 = arith.constant dense<0.000000e+00> : vector<8x64xf32>
    %712 = tpu.matmul %710, %711, %cst_231 {dimension_numbers = #tpu.dot_dimension_numbers<[1], [0], [0], [1], [0, 0, 1, 1], [], []>} : vector<8x64xf32>, vector<64x64xf32>, vector<8x64xf32> -> vector<8x64xf32>
    %c0_232 = arith.constant 0 : index
    %c0_233 = arith.constant 0 : index
    %713 = vector.load %arg20[%c0_232, %c0_233] : memref<1x64xf32, #tpu.memory_space<vmem>>, vector<1x64xf32>
    %714 = vector.broadcast %713 : vector<1x64xf32> to vector<8x64xf32>
    %715 = arith.addf %712, %714 : vector<8x64xf32>
    %cst_234 = arith.constant 5.000000e-01 : f32
    %716 = vector.broadcast %cst_234 : f32 to vector<8x64xf32>
    %717 = arith.mulf %716, %715 : vector<8x64xf32>
    %cst_235 = arith.constant 0.707106769 : f32
    %718 = vector.broadcast %cst_235 : f32 to vector<8x64xf32>
    %719 = arith.mulf %715, %718 : vector<8x64xf32>
    %cst_236 = arith.constant 0.000000e+00 : f32
    %720 = vector.broadcast %cst_236 : f32 to vector<8x64xf32>
    %721 = arith.cmpf oge, %719, %720 : vector<8x64xf32>
    %cst_237 = arith.constant 1.000000e+00 : f32
    %cst_238 = arith.constant -1.000000e+00 : f32
    %722 = vector.broadcast %cst_237 : f32 to vector<8x64xf32>
    %723 = vector.broadcast %cst_238 : f32 to vector<8x64xf32>
    %724 = arith.select %721, %722, %723 : vector<8x64xi1>, vector<8x64xf32>
    %725 = math.absf %719 : vector<8x64xf32>
    %cst_239 = arith.constant 0.327591091 : f32
    %726 = vector.broadcast %cst_239 : f32 to vector<8x64xf32>
    %727 = arith.mulf %726, %725 : vector<8x64xf32>
    %cst_240 = arith.constant 1.000000e+00 : f32
    %728 = vector.broadcast %cst_240 : f32 to vector<8x64xf32>
    %729 = arith.addf %728, %727 : vector<8x64xf32>
    %cst_241 = arith.constant 1.000000e+00 : f32
    %730 = vector.broadcast %cst_241 : f32 to vector<8x64xf32>
    %731 = arith.divf %730, %729 : vector<8x64xf32>
    %cst_242 = arith.constant 1.06140542 : f32
    %732 = vector.broadcast %cst_242 : f32 to vector<8x64xf32>
    %733 = arith.mulf %732, %731 : vector<8x64xf32>
    %cst_243 = arith.constant -1.45315206 : f32
    %734 = vector.broadcast %cst_243 : f32 to vector<8x64xf32>
    %735 = arith.addf %733, %734 : vector<8x64xf32>
    %736 = arith.mulf %735, %731 : vector<8x64xf32>
    %cst_244 = arith.constant 1.42141378 : f32
    %737 = vector.broadcast %cst_244 : f32 to vector<8x64xf32>
    %738 = arith.addf %736, %737 : vector<8x64xf32>
    %739 = arith.mulf %738, %731 : vector<8x64xf32>
    %cst_245 = arith.constant -0.284496725 : f32
    %740 = vector.broadcast %cst_245 : f32 to vector<8x64xf32>
    %741 = arith.addf %739, %740 : vector<8x64xf32>
    %742 = arith.mulf %741, %731 : vector<8x64xf32>
    %cst_246 = arith.constant 0.254829586 : f32
    %743 = vector.broadcast %cst_246 : f32 to vector<8x64xf32>
    %744 = arith.addf %742, %743 : vector<8x64xf32>
    %745 = arith.mulf %744, %731 : vector<8x64xf32>
    %cst_247 = arith.constant 0.000000e+00 : f32
    %746 = vector.broadcast %cst_247 : f32 to vector<8x64xf32>
    %747 = arith.subf %746, %725 : vector<8x64xf32>
    %748 = arith.mulf %747, %725 : vector<8x64xf32>
    %749 = math.exp %748 : vector<8x64xf32>
    %750 = arith.mulf %745, %749 : vector<8x64xf32>
    %cst_248 = arith.constant 1.000000e+00 : f32
    %751 = vector.broadcast %cst_248 : f32 to vector<8x64xf32>
    %752 = arith.subf %751, %750 : vector<8x64xf32>
    %753 = arith.mulf %724, %752 : vector<8x64xf32>
    %cst_249 = arith.constant 1.000000e+00 : f32
    %754 = vector.broadcast %cst_249 : f32 to vector<8x64xf32>
    %755 = arith.addf %754, %753 : vector<8x64xf32>
    %756 = arith.mulf %717, %755 : vector<8x64xf32>
    %c0_250 = arith.constant 0 : index
    %c0_251 = arith.constant 0 : index
    %757 = vector.load %arg21[%c0_250, %c0_251] : memref<64x1xf32, #tpu.memory_space<vmem>>, vector<64x1xf32>
    %cst_252 = arith.constant dense<0.000000e+00> : vector<8x1xf32>
    %758 = tpu.matmul %756, %757, %cst_252 {dimension_numbers = #tpu.dot_dimension_numbers<[1], [0], [0], [1], [0, 0, 1, 1], [], []>} : vector<8x64xf32>, vector<64x1xf32>, vector<8x1xf32> -> vector<8x1xf32>
    %c0_253 = arith.constant 0 : index
    %c0_254 = arith.constant 0 : index
    %759 = vector.load %arg22[%c0_253, %c0_254] : memref<1x1xf32, #tpu.memory_space<vmem>>, vector<1x1xf32>
    %760 = vector.broadcast %759 : vector<1x1xf32> to vector<8x1xf32>
    %761 = arith.addf %758, %760 : vector<8x1xf32>
    %762 = vector.extract_strided_slice %761 {offsets = [0, 0], sizes = [2, 1], strides = [1, 1]} : vector<8x1xf32> to vector<2x1xf32>
    %763 = vector.extract_strided_slice %761 {offsets = [2, 0], sizes = [2, 1], strides = [1, 1]} : vector<8x1xf32> to vector<2x1xf32>
    %764 = vector.extract_strided_slice %761 {offsets = [4, 0], sizes = [2, 1], strides = [1, 1]} : vector<8x1xf32> to vector<2x1xf32>
    %765 = vector.extract_strided_slice %761 {offsets = [6, 0], sizes = [2, 1], strides = [1, 1]} : vector<8x1xf32> to vector<2x1xf32>
    %766 = tpu.concatenate %762, %763, %764, %765 in 1 : vector<2x1xf32>, vector<2x1xf32>, vector<2x1xf32>, vector<2x1xf32> -> vector<2x4xf32>
    %cst_255 = arith.constant 0.000000e+00 : f32
    %767 = vector.broadcast %cst_255 : f32 to vector<2x60xf32>
    %768 = tpu.concatenate %766, %376, %549, %377, %550, %767 in 1 : vector<2x4xf32>, vector<2x16xf32>, vector<2x16xf32>, vector<2x16xf32>, vector<2x16xf32>, vector<2x60xf32> -> vector<2x128xf32>
    %c0_256 = arith.constant 0 : index
    %c0_257 = arith.constant 0 : index
    %769 = vector.load %arg23[%c0_256, %c0_257] : memref<2x128xf32, #tpu.memory_space<vmem>>, vector<2x128xf32>
    tpu.vector_store %arg23[%c0_256, %c0_257], %768 {strides = array<i32>} : memref<2x128xf32, #tpu.memory_space<vmem>>, vector<2x128xf32>,
    return
  }
  func.func @transform_0(%arg0: i32) -> (i32, i32, i32) {
    %c0_i32 = arith.constant 0 : i32
    %c0_i32_0 = arith.constant 0 : i32
    %c0_i32_1 = arith.constant 0 : i32
    return %c0_i32, %arg0, %c0_i32_0 : i32, i32, i32
  }
  func.func @transform_1(%arg0: i32) -> (i32, i32, i32) {
    %c0_i32 = arith.constant 0 : i32
    %c0_i32_0 = arith.constant 0 : i32
    %c0_i32_1 = arith.constant 0 : i32
    return %c0_i32, %arg0, %c0_i32_0 : i32, i32, i32
  }
  func.func @transform_2(%arg0: i32) -> (i32, i32) {
    %c0_i32 = arith.constant 0 : i32
    %c0_i32_0 = arith.constant 0 : i32
    %c0_i32_1 = arith.constant 0 : i32
    return %c0_i32, %c0_i32_0 : i32, i32
  }
  func.func @transform_3(%arg0: i32) -> (i32, i32) {
    %c0_i32 = arith.constant 0 : i32
    %c0_i32_0 = arith.constant 0 : i32
    %c0_i32_1 = arith.constant 0 : i32
    return %c0_i32, %c0_i32_0 : i32, i32
  }
  func.func @transform_4(%arg0: i32) -> (i32, i32) {
    %c0_i32 = arith.constant 0 : i32
    %c0_i32_0 = arith.constant 0 : i32
    %c0_i32_1 = arith.constant 0 : i32
    return %c0_i32, %c0_i32_0 : i32, i32
  }
  func.func @transform_5(%arg0: i32) -> (i32, i32) {
    %c0_i32 = arith.constant 0 : i32
    %c0_i32_0 = arith.constant 0 : i32
    %c0_i32_1 = arith.constant 0 : i32
    return %c0_i32, %c0_i32_0 : i32, i32
  }
  func.func @transform_6(%arg0: i32) -> (i32, i32) {
    %c0_i32 = arith.constant 0 : i32
    %c0_i32_0 = arith.constant 0 : i32
    %c0_i32_1 = arith.constant 0 : i32
    return %c0_i32, %c0_i32_0 : i32, i32
  }
  func.func @transform_7(%arg0: i32) -> (i32, i32) {
    %c0_i32 = arith.constant 0 : i32
    %c0_i32_0 = arith.constant 0 : i32
    %c0_i32_1 = arith.constant 0 : i32
    return %c0_i32, %c0_i32_0 : i32, i32
  }
  func.func @transform_8(%arg0: i32) -> (i32, i32) {
    %c0_i32 = arith.constant 0 : i32
    %c0_i32_0 = arith.constant 0 : i32
    %c0_i32_1 = arith.constant 0 : i32
    return %c0_i32, %c0_i32_0 : i32, i32
  }
  func.func @transform_9(%arg0: i32) -> (i32, i32) {
    %c0_i32 = arith.constant 0 : i32
    %c0_i32_0 = arith.constant 0 : i32
    %c0_i32_1 = arith.constant 0 : i32
    return %c0_i32, %c0_i32_0 : i32, i32
  }
  func.func @transform_10(%arg0: i32) -> (i32, i32) {
    %c0_i32 = arith.constant 0 : i32
    %c0_i32_0 = arith.constant 0 : i32
    %c0_i32_1 = arith.constant 0 : i32
    return %c0_i32, %c0_i32_0 : i32, i32
  }
  func.func @transform_11(%arg0: i32) -> (i32, i32) {
    %c0_i32 = arith.constant 0 : i32
    %c0_i32_0 = arith.constant 0 : i32
    %c0_i32_1 = arith.constant 0 : i32
    return %c0_i32, %c0_i32_0 : i32, i32
  }
  func.func @transform_12(%arg0: i32) -> (i32, i32) {
    %c0_i32 = arith.constant 0 : i32
    %c0_i32_0 = arith.constant 0 : i32
    %c0_i32_1 = arith.constant 0 : i32
    return %c0_i32, %c0_i32_0 : i32, i32
  }
  func.func @transform_13(%arg0: i32) -> (i32, i32) {
    %c0_i32 = arith.constant 0 : i32
    %c0_i32_0 = arith.constant 0 : i32
    %c0_i32_1 = arith.constant 0 : i32
    return %c0_i32, %c0_i32_0 : i32, i32
  }
  func.func @transform_14(%arg0: i32) -> (i32, i32) {
    %c0_i32 = arith.constant 0 : i32
    %c0_i32_0 = arith.constant 0 : i32
    %c0_i32_1 = arith.constant 0 : i32
    return %c0_i32, %c0_i32_0 : i32, i32
  }
  func.func @transform_15(%arg0: i32) -> (i32, i32) {
    %c0_i32 = arith.constant 0 : i32
    %c0_i32_0 = arith.constant 0 : i32
    %c0_i32_1 = arith.constant 0 : i32
    return %c0_i32, %c0_i32_0 : i32, i32
  }
  func.func @transform_16(%arg0: i32) -> (i32, i32) {
    %c0_i32 = arith.constant 0 : i32
    %c0_i32_0 = arith.constant 0 : i32
    %c0_i32_1 = arith.constant 0 : i32
    return %c0_i32, %c0_i32_0 : i32, i32
  }
  func.func @transform_17(%arg0: i32) -> (i32, i32) {
    %c0_i32 = arith.constant 0 : i32
    %c0_i32_0 = arith.constant 0 : i32
    %c0_i32_1 = arith.constant 0 : i32
    return %c0_i32, %c0_i32_0 : i32, i32
  }
  func.func @transform_18(%arg0: i32) -> (i32, i32) {
    %c0_i32 = arith.constant 0 : i32
    %c0_i32_0 = arith.constant 0 : i32
    %c0_i32_1 = arith.constant 0 : i32
    return %c0_i32, %c0_i32_0 : i32, i32
  }
  func.func @transform_19(%arg0: i32) -> (i32, i32) {
    %c0_i32 = arith.constant 0 : i32
    %c0_i32_0 = arith.constant 0 : i32
    %c0_i32_1 = arith.constant 0 : i32
    return %c0_i32, %c0_i32_0 : i32, i32
  }
  func.func @transform_20(%arg0: i32) -> (i32, i32) {
    %c0_i32 = arith.constant 0 : i32
    %c0_i32_0 = arith.constant 0 : i32
    %c0_i32_1 = arith.constant 0 : i32
    return %c0_i32, %c0_i32_0 : i32, i32
  }
  func.func @transform_21(%arg0: i32) -> (i32, i32) {
    %c0_i32 = arith.constant 0 : i32
    %c0_i32_0 = arith.constant 0 : i32
    %c0_i32_1 = arith.constant 0 : i32
    return %c0_i32, %c0_i32_0 : i32, i32
  }
  func.func @transform_22(%arg0: i32) -> (i32, i32) {
    %c0_i32 = arith.constant 0 : i32
    %c0_i32_0 = arith.constant 0 : i32
    return %arg0, %c0_i32 : i32, i32
  }
}

</mosaic_0001>

<bundles_post_ra>
// kernel: tpu_custom_call.1
= control target key start
LH: loop header
LB: loop body
LE: loop exit
PB: predicated region body
PF: predicated region fallthrough
CT: control target
= control target key end

     0   :  { %s3640_s0 = inlined_call_operand.hbm [shape: f32[4,2,32], index: 0, kind: input, shape index: {}]   ;;  %s3641_s1 = inlined_call_operand.hbm [shape: f32[4,2,8], index: 1, kind: input, shape index: {}]   ;;  %s3642_s2 = inlined_call_operand.hbm [shape: f32[32,64], index: 2, kind: input, shape index: {}]   ;;  %s3643_s3 = inlined_call_operand.vmem [shape: f32[1,64], index: 3, kind: input, shape index: {}]   ;;  %s3644_s4 = inlined_call_operand.hbm [shape: f32[40,64], index: 4, kind: input, shape index: {}]   ;;  %s3645_s5 = inlined_call_operand.hbm [shape: f32[1,64], index: 5, kind: input, shape index: {}]   ;;  %s3646_s6 = inlined_call_operand.vmem [shape: f32[64,256], index: 6, kind: input, shape index: {}]   ;;  %s3647_s7 = inlined_call_operand.hbm [shape: f32[1,256], index: 7, kind: input, shape index: {}]   ;;  %s3648_s8 = inlined_call_operand.vmem [shape: f32[64,64], index: 8, kind: input, shape index: {}]   ;;  %s3649_s9 = inlined_call_operand.hbm [shape: f32[1,64], index: 9, kind: input, shape index: {}]   ;;  %s3650_s10 = inlined_call_operand.hbm [shape: f32[1,64], index: 10, kind: input, shape index: {}]   ;;  %s3651_s11 = inlined_call_operand.hbm [shape: f32[1,64], index: 11, kind: input, shape index: {}]   ;;  %s3652_s12 = inlined_call_operand.vmem [shape: f32[64,64], index: 12, kind: input, shape index: {}]   ;;  %s3653_s13 = inlined_call_operand.hbm [shape: f32[1,64], index: 13, kind: input, shape index: {}]   ;;  %s3654_s14 = inlined_call_operand.hbm [shape: f32[1,64], index: 14, kind: input, shape index: {}]   ;;  %s3655_s15 = inlined_call_operand.hbm [shape: f32[1,64], index: 15, kind: input, shape index: {}]   ;;  %s3656_s16 = inlined_call_operand.vmem [shape: f32[128,64], index: 16, kind: input, shape index: {}]   ;;  %s3657_s17 = inlined_call_operand.vmem [shape: f32[1,64], index: 17, kind: input, shape index: {}]   ;;  %s3658_s18 = inlined_call_operand.hbm [shape: f32[64,64], index: 18, kind: input, shape index: {}]   ;;  %s3659_s19 = inlined_call_operand.vmem [shape: f32[1,64], index: 19, kind: input, shape index: {}]   ;;  %s3660_s20 = inlined_call_operand.vmem [shape: f32[64,1], index: 20, kind: input, shape index: {}]   ;;  %s3661_s21 = inlined_call_operand.<no memory space> [shape: f32[1,1], index: 21, kind: input, shape index: {}]   ;;  %s3662_s22 = inlined_call_operand.hbm [shape: f32[2,128], index: 22, kind: output, shape index: {}]  }
   0x1   :  { %3670 = sst [smem:[#allocation33_spill]] %s3640_s0  ;;  %v27_v0 = vstv %s3661_s21 }
   0x2   :  { %3671 = sst [smem:[#allocation34_spill]] %s3641_s1  ;;  %28 = vst [vmem:[#allocation2] sm:$0x1] %v27_v0 }
   0x3   :  { %3672 = sst [smem:[#allocation35_spill]] %s3642_s2 }
   0x4   :  { %3673 = sst [smem:[#allocation36_spill]] %s3643_s3 }
   0x5   :  { %3674 = sst [smem:[#allocation37_spill]] %s3644_s4 }
   0x6   :  { %3675 = sst [smem:[#allocation38_spill]] %s3645_s5 }
   0x7   :  { %3676 = sst [smem:[#allocation39_spill]] %s3646_s6 }
   0x8   :  { %3677 = sst [smem:[#allocation40_spill]] %s3659_s19 }
   0x9   :  { %3678 = sst [smem:[#allocation41_spill]] %s3662_s22 }
   0xa   :  { %29 = vsyncpa [#allocation4], 0 }
   0xb   :  { %30 = vsyncpa [#allocation7], 0 }
   0xc   :  { %31 = vsyncpa [#allocation10], 0 }
   0xd   :  { %32 = vsyncpa [#allocation13], 0 }
   0xe   :  { %33 = vsyncpa [#allocation16], 0 }
   0xf   :  { %34 = vsyncpa [#allocation19], 0 }
  0x10   :  { %35 = vsyncpa [#allocation22], 0 }
  0x11   :  { %36 = vsyncpa [#allocation5], 0  ;;  %s2677_s29 = smov [#allocation6]   ;;  %s3679_s23 = sld [smem:[#allocation34_spill]] }
  0x12   :  { %s54_s30 = sshll.u32 %s2677_s29, 4  ;;  %s55_s30 = int_to_ptr.vmem [resolvable:$true] %s54_s30 }
  0x17   :  { %s2353_s1 = scalar_lea.hbm %s3679_s23, 128 }
  0x18   :  { %p2354_p0 = scmp.ne.s32.totalorder %s3679_s23, %s2353_s1  ;;  %p2357_p1 = scmp.lt.u32.totalorder %s2353_s1, %s3679_s23 }
  0x1a   :  { %p2359_p2 = pnand %p2357_p1, %p2354_p0 }
  0x1c   :  { %2362 = shalt.err (!%p2359_p2)
}
  0x1d   :  { %s2363_s25 = scalar_lea.vmem %s55_s30, 128  ;;  %p2368_p4 = scmp.lt.s32.totalorder %s55_s30, %s55_s30 }
  0x1e   :  { %p2364_p3 = scmp.ne.s32.totalorder %s55_s30, %s2363_s25  ;;  %p2369_p5 = scmp.lt.s32.totalorder %s2363_s25, %s2363_s25 }
  0x20   :  { %p2370_p6 = por %p2369_p5, %p2368_p4 }
  0x22   :  { %p2371_p7 = pnand %p2370_p6, %p2364_p3 }
  0x24   :  { %2374 = shalt.err (!%p2371_p7)
}
  0x25   :  { %s2678_s26 = smov 32   ;;  %s2679_s2 = smov 2  }
  0x26   :  { %60 = dma.hbm_to_vmem [thread:$0]  %s3679_s23, 128, %s55_s30, [#allocation7], %s2678_s26, %s2678_s26, %s2679_s2  }
  0x27   :  { %s2680_s28 = smov [#allocation9]   ;;  %s2681_s4 = smov [#allocation12]  }
  0x28   :  { %s80_s29 = sshll.u32 %s2680_s28, 4  ;;  %s105_s0 = sshll.u32 %s2681_s4, 4  ;;  %s81_s29 = int_to_ptr.vmem [resolvable:$true] %s80_s29  ;;  %s106_s0 = int_to_ptr.vmem [resolvable:$true] %s105_s0 }
  0x29   :  { %s3680_s24 = sld [smem:[#allocation37_spill]] }
  0x2f   :  { %s2375_s21 = scalar_lea.hbm %s3680_s24, 640 }
  0x30   :  { %p2376_p8 = scmp.ne.s32.totalorder %s3680_s24, %s2375_s21  ;;  %p2379_p9 = scmp.lt.u32.totalorder %s2375_s21, %s3680_s24 }
  0x32   :  { %p2381_p10 = pnand %p2379_p9, %p2376_p8 }
  0x34   :  { %2384 = shalt.err (!%p2381_p10)
}
  0x35   :  { %s2385_s30 = scalar_lea.vmem %s81_s29, 640  ;;  %p2390_p12 = scmp.lt.s32.totalorder %s81_s29, %s81_s29 }
  0x36   :  { %p2386_p11 = scmp.ne.s32.totalorder %s81_s29, %s2385_s30  ;;  %p2391_p13 = scmp.lt.s32.totalorder %s2385_s30, %s2385_s30 }
  0x38   :  { %p2392_p0 = por %p2391_p13, %p2390_p12 }
  0x3a   :  { %p2393_p1 = pnand %p2392_p0, %p2386_p11 }
  0x3c   :  { %2396 = shalt.err (!%p2393_p1)
}
  0x3d   :  { %s2682_s23 = smov 128   ;;  %s2683_s27 = smov 8  }
  0x3e   :  { %86 = dma.hbm_to_vmem [thread:$0]  %s3680_s24, 640, %s81_s29, [#allocation10], %s2682_s23, %s2682_s23, %s2683_s27  }
  0x3f   :  { %s2397_s4 = scalar_lea.hbm %s3647_s7, 32 }
  0x40   :  { %p2398_p2 = scmp.ne.s32.totalorder %s3647_s7, %s2397_s4  ;;  %p2401_p3 = scmp.lt.u32.totalorder %s2397_s4, %s3647_s7 }
  0x42   :  { %p2403_p4 = pnand %p2401_p3, %p2398_p2 }
  0x44   :  { %2406 = shalt.err (!%p2403_p4)
}
  0x45   :  { %s2407_s25 = scalar_lea.vmem %s106_s0, 32  ;;  %p2412_p6 = scmp.lt.s32.totalorder %s106_s0, %s106_s0 }
  0x46   :  { %p2408_p5 = scmp.ne.s32.totalorder %s106_s0, %s2407_s25  ;;  %p2413_p7 = scmp.lt.s32.totalorder %s2407_s25, %s2407_s25 }
  0x48   :  { %p2414_p8 = por %p2413_p7, %p2412_p6 }
  0x4a   :  { %p2415_p9 = pnand %p2414_p8, %p2408_p5 }
  0x4c   :  { %2418 = shalt.err (!%p2415_p9)
}
  0x4d   :  { %108 = dma.hbm_to_vmem [thread:$0]  %s3647_s7, 32, %s106_s0, [#allocation13]  }
  0x4e   :  { %s2684_s30 = smov [#allocation15]   ;;  %s2685_s28 = smov [#allocation18]  }
  0x4f   :  { %s127_s3 = sshll.u32 %s2684_s30, 4  ;;  %s149_s19 = sshll.u32 %s2685_s28, 4  ;;  %s128_s3 = int_to_ptr.vmem [resolvable:$true] %s127_s3  ;;  %s150_s19 = int_to_ptr.vmem [resolvable:$true] %s149_s19 }
  0x50   :  { %s2419_s1 = scalar_lea.hbm %s3650_s10, 16 }
  0x51   :  { %p2420_p10 = scmp.ne.s32.totalorder %s3650_s10, %s2419_s1  ;;  %p2423_p11 = scmp.lt.u32.totalorder %s2419_s1, %s3650_s10 }
  0x53   :  { %p2425_p12 = pnand %p2423_p11, %p2420_p10 }
  0x55   :  { %2428 = shalt.err (!%p2425_p12)
}
  0x56   :  { %s2429_s7 = scalar_lea.vmem %s128_s3, 16  ;;  %s2433_s0 = scalar_lea.vmem %s128_s3, 32 }
  0x57   :  { %p2430_p13 = scmp.ne.s32.totalorder %s128_s3, %s2429_s7  ;;  %p2434_p0 = scmp.lt.s32.totalorder %s128_s3, %s128_s3 }
  0x58   :  { %p2435_p1 = scmp.lt.s32.totalorder %s2433_s0, %s2429_s7 }
  0x5a   :  { %p2436_p2 = por %p2435_p1, %p2434_p0 }
  0x5c   :  { %p2437_p3 = pnand %p2436_p2, %p2430_p13 }
  0x5e   :  { %2440 = shalt.err (!%p2437_p3)
}
  0x5f   :  { %130 = dma.hbm_to_vmem [thread:$0]  %s3650_s10, 16, %s128_s3, [#allocation16]  }
  0x60   :  { %s2441_s22 = scalar_lea.hbm %s3653_s13, 16 }
  0x61   :  { %p2442_p4 = scmp.ne.s32.totalorder %s3653_s13, %s2441_s22  ;;  %p2445_p5 = scmp.lt.u32.totalorder %s2441_s22, %s3653_s13 }
  0x63   :  { %p2447_p6 = pnand %p2445_p5, %p2442_p4 }
  0x65   :  { %2450 = shalt.err (!%p2447_p6)
}
  0x66   :  { %s2451_s6 = scalar_lea.vmem %s150_s19, 16  ;;  %s2455_s25 = scalar_lea.vmem %s150_s19, 32 }
  0x67   :  { %p2452_p7 = scmp.ne.s32.totalorder %s150_s19, %s2451_s6  ;;  %p2456_p8 = scmp.lt.s32.totalorder %s150_s19, %s150_s19 }
  0x68   :  { %p2457_p9 = scmp.lt.s32.totalorder %s2455_s25, %s2451_s6 }
  0x6a   :  { %p2458_p10 = por %p2457_p9, %p2456_p8 }
  0x6c   :  { %p2459_p11 = pnand %p2458_p10, %p2452_p7 }
  0x6e   :  { %2462 = shalt.err (!%p2459_p11)
}
  0x6f   :  { %152 = dma.hbm_to_vmem [thread:$0]  %s3653_s13, 16, %s150_s19, [#allocation19]  }
  0x70   :  { %s2686_s7 = smov [#allocation21]   ;;  %s2687_s29 = smov [#allocation3]  }
  0x71   :  { %s169_s0 = sshll.u32 %s2686_s7, 4  ;;  %s42_s24 = sshll.u32 %s2687_s29, 4  ;;  %s170_s0 = int_to_ptr.vmem [resolvable:$true] %s169_s0  ;;  %s43_s24 = int_to_ptr.vmem [resolvable:$true] %s42_s24 }
  0x72   :  { %s2463_s22 = scalar_lea.hbm %s3655_s15, 16 }
  0x73   :  { %p2464_p12 = scmp.ne.s32.totalorder %s3655_s15, %s2463_s22  ;;  %p2467_p13 = scmp.lt.u32.totalorder %s2463_s22, %s3655_s15 }
  0x75   :  { %p2469_p0 = pnand %p2467_p13, %p2464_p12 }
  0x77   :  { %2472 = shalt.err (!%p2469_p0)
}
  0x78   :  { %s2473_s13 = scalar_lea.vmem %s170_s0, 16  ;;  %s2477_s19 = scalar_lea.vmem %s170_s0, 32 }
  0x79   :  { %p2474_p1 = scmp.ne.s32.totalorder %s170_s0, %s2473_s13  ;;  %p2478_p2 = scmp.lt.s32.totalorder %s170_s0, %s170_s0 }
  0x7a   :  { %p2479_p3 = scmp.lt.s32.totalorder %s2477_s19, %s2473_s13 }
  0x7c   :  { %p2480_p4 = por %p2479_p3, %p2478_p2 }
  0x7e   :  { %p2481_p5 = pnand %p2480_p4, %p2474_p1 }
  0x80   :  { %2484 = shalt.err (!%p2481_p5)
}
  0x81   :  { %172 = dma.hbm_to_vmem [thread:$0]  %s3655_s15, 16, %s170_s0, [#allocation22]  }
  0x82   :  { %s3681_s7 = sld [smem:[#allocation33_spill]] }
  0x88   :  { %s2485_s29 = scalar_lea.hbm %s3681_s7, 128 }
  0x89   :  { %p2486_p6 = scmp.ne.s32.totalorder %s3681_s7, %s2485_s29  ;;  %p2489_p7 = scmp.lt.u32.totalorder %s2485_s29, %s3681_s7 }
  0x8b   :  { %p2491_p8 = pnand %p2489_p7, %p2486_p6 }
  0x8d   :  { %2494 = shalt.err (!%p2491_p8)
}
  0x8e   :  { %s2495_s1 = scalar_lea.vmem %s43_s24, 128  ;;  %p2500_p10 = scmp.lt.s32.totalorder %s43_s24, %s43_s24 }
  0x8f   :  { %p2496_p9 = scmp.ne.s32.totalorder %s43_s24, %s2495_s1  ;;  %p2501_p11 = scmp.lt.s32.totalorder %s2495_s1, %s2495_s1 }
  0x91   :  { %p2502_p12 = por %p2501_p11, %p2500_p10 }
  0x93   :  { %p2503_p13 = pnand %p2502_p12, %p2496_p9 }
  0x95   :  { %2506 = shalt.err (!%p2503_p13)
}
  0x96   :  { %48 = dma.hbm_to_vmem [thread:$0]  %s3681_s7, 128, %s43_s24, [#allocation4], %s2678_s26, %s2678_s26, %s2679_s2  }
  0x97   :  { %s2688_s5 = smov [#allocation8]   ;;  %s2689_s13 = smov [#allocation11]  }
  0x98   :  { %s66_s21 = sshll.u32 %s2688_s5, 4  ;;  %s93_s19 = sshll.u32 %s2689_s13, 4  ;;  %s67_s21 = int_to_ptr.vmem [resolvable:$true] %s66_s21  ;;  %s94_s19 = int_to_ptr.vmem [resolvable:$true] %s93_s19 }
  0x99   :  { %s3682_s10 = sld [smem:[#allocation35_spill]] }
  0x9f   :  { %s2507_s3 = scalar_lea.hbm %s3682_s10, 512 }
  0xa0   :  { %p2508_p0 = scmp.ne.s32.totalorder %s3682_s10, %s2507_s3  ;;  %p2511_p1 = scmp.lt.u32.totalorder %s2507_s3, %s3682_s10 }
  0xa2   :  { %p2513_p2 = pnand %p2511_p1, %p2508_p0 }
  0xa4   :  { %2516 = shalt.err (!%p2513_p2)
}
  0xa5   :  { %s2517_s24 = scalar_lea.vmem %s67_s21, 512  ;;  %p2522_p4 = scmp.lt.s32.totalorder %s67_s21, %s67_s21 }
  0xa6   :  { %p2518_p3 = scmp.ne.s32.totalorder %s67_s21, %s2517_s24  ;;  %p2523_p5 = scmp.lt.s32.totalorder %s2517_s24, %s2517_s24 }
  0xa8   :  { %p2524_p6 = por %p2523_p5, %p2522_p4 }
  0xaa   :  { %p2525_p7 = pnand %p2524_p6, %p2518_p3 }
  0xac   :  { %2528 = shalt.err (!%p2525_p7)
}
  0xad   :  { %72 = dma.hbm_to_vmem [thread:$0]  %s3682_s10, 512, %s67_s21, [#allocation7], %s2682_s23, %s2682_s23, %s2683_s27  }
  0xae   :  { %s3683_s0 = sld [smem:[#allocation38_spill]] }
  0xb4   :  { %s2529_s5 = scalar_lea.hbm %s3683_s0, 16 }
  0xb5   :  { %p2530_p8 = scmp.ne.s32.totalorder %s3683_s0, %s2529_s5  ;;  %p2533_p9 = scmp.lt.u32.totalorder %s2529_s5, %s3683_s0 }
  0xb7   :  { %p2535_p10 = pnand %p2533_p9, %p2530_p8 }
  0xb9   :  { %2538 = shalt.err (!%p2535_p10)
}
  0xba   :  { %s2539_s29 = scalar_lea.vmem %s94_s19, 16  ;;  %s2543_s30 = scalar_lea.vmem %s94_s19, 32 }
  0xbb   :  { %p2540_p11 = scmp.ne.s32.totalorder %s94_s19, %s2539_s29  ;;  %p2544_p12 = scmp.lt.s32.totalorder %s94_s19, %s94_s19 }
  0xbc   :  { %p2545_p13 = scmp.lt.s32.totalorder %s2543_s30, %s2539_s29 }
  0xbe   :  { %p2546_p0 = por %p2545_p13, %p2544_p12 }
  0xc0   :  { %p2547_p1 = pnand %p2546_p0, %p2540_p11 }
  0xc2   :  { %2550 = shalt.err (!%p2547_p1)
}
  0xc3   :  { %96 = dma.hbm_to_vmem [thread:$0]  %s3683_s0, 16, %s94_s19, [#allocation10]  }
  0xc4   :  { %s2690_s28 = smov [#allocation14]   ;;  %s2691_s24 = smov [#allocation17]  }
  0xc5   :  { %s117_s22 = sshll.u32 %s2690_s28, 4  ;;  %s137_s7 = sshll.u32 %s2691_s24, 4  ;;  %s118_s22 = int_to_ptr.vmem [resolvable:$true] %s117_s22  ;;  %s138_s7 = int_to_ptr.vmem [resolvable:$true] %s137_s7 }
  0xc6   :  { %s2551_s15 = scalar_lea.hbm %s3649_s9, 16 }
  0xc7   :  { %p2552_p2 = scmp.ne.s32.totalorder %s3649_s9, %s2551_s15  ;;  %p2555_p3 = scmp.lt.u32.totalorder %s2551_s15, %s3649_s9 }
  0xc9   :  { %p2557_p4 = pnand %p2555_p3, %p2552_p2 }
  0xcb   :  { %2560 = shalt.err (!%p2557_p4)
}
  0xcc   :  { %s2561_s19 = scalar_lea.vmem %s118_s22, 16  ;;  %s2565_s0 = scalar_lea.vmem %s118_s22, 32 }
  0xcd   :  { %p2562_p5 = scmp.ne.s32.totalorder %s118_s22, %s2561_s19  ;;  %p2566_p6 = scmp.lt.s32.totalorder %s118_s22, %s118_s22 }
  0xce   :  { %p2567_p7 = scmp.lt.s32.totalorder %s2565_s0, %s2561_s19 }
  0xd0   :  { %p2568_p8 = por %p2567_p7, %p2566_p6 }
  0xd2   :  { %p2569_p9 = pnand %p2568_p8, %p2562_p5 }
  0xd4   :  { %2572 = shalt.err (!%p2569_p9)
}
  0xd5   :  { %120 = dma.hbm_to_vmem [thread:$0]  %s3649_s9, 16, %s118_s22, [#allocation13]  }
  0xd6   :  { %s2573_s10 = scalar_lea.hbm %s3651_s11, 16 }
  0xd7   :  { %p2574_p10 = scmp.ne.s32.totalorder %s3651_s11, %s2573_s10  ;;  %p2577_p11 = scmp.lt.u32.totalorder %s2573_s10, %s3651_s11 }
  0xd9   :  { %p2579_p12 = pnand %p2577_p11, %p2574_p10 }
  0xdb   :  { %2582 = shalt.err (!%p2579_p12)
}
  0xdc   :  { %s2583_s15 = scalar_lea.vmem %s138_s7, 16  ;;  %s2587_s5 = scalar_lea.vmem %s138_s7, 32 }
  0xdd   :  { %p2584_p13 = scmp.ne.s32.totalorder %s138_s7, %s2583_s15  ;;  %p2588_p0 = scmp.lt.s32.totalorder %s138_s7, %s138_s7 }
  0xde   :  { %p2589_p1 = scmp.lt.s32.totalorder %s2587_s5, %s2583_s15 }
  0xe0   :  { %p2590_p2 = por %p2589_p1, %p2588_p0 }
  0xe2   :  { %p2591_p3 = pnand %p2590_p2, %p2584_p13 }
  0xe4   :  { %2594 = shalt.err (!%p2591_p3)
}
  0xe5   :  { %140 = dma.hbm_to_vmem [thread:$0]  %s3651_s11, 16, %s138_s7, [#allocation16]  }
  0xe6   :  { %s2692_s13 = smov [#allocation20]   ;;  %s2693_s25 = smov [#allocation23]  }
  0xe7   :  { %s159_s6 = sshll.u32 %s2692_s13, 4  ;;  %s182_s19 = sshll.u32 %s2693_s25, 4  ;;  %s160_s6 = int_to_ptr.vmem [resolvable:$true] %s159_s6  ;;  %s183_s19 = int_to_ptr.vmem [resolvable:$true] %s182_s19 }
  0xe8   :  { %s2595_s29 = scalar_lea.hbm %s3654_s14, 16 }
  0xe9   :  { %p2596_p4 = scmp.ne.s32.totalorder %s3654_s14, %s2595_s29  ;;  %p2599_p5 = scmp.lt.u32.totalorder %s2595_s29, %s3654_s14 }
  0xeb   :  { %p2601_p6 = pnand %p2599_p5, %p2596_p4 }
  0xed   :  { %2604 = shalt.err (!%p2601_p6)
}
  0xee   :  { %s2605_s11 = scalar_lea.vmem %s160_s6, 16  ;;  %s2609_s7 = scalar_lea.vmem %s160_s6, 32 }
  0xef   :  { %p2606_p7 = scmp.ne.s32.totalorder %s160_s6, %s2605_s11  ;;  %p2610_p8 = scmp.lt.s32.totalorder %s160_s6, %s160_s6 }
  0xf0   :  { %p2611_p9 = scmp.lt.s32.totalorder %s2609_s7, %s2605_s11 }
  0xf2   :  { %p2612_p10 = por %p2611_p9, %p2610_p8 }
  0xf4   :  { %p2613_p11 = pnand %p2612_p10, %p2606_p7 }
  0xf6   :  { %2616 = shalt.err (!%p2613_p11)
}
  0xf7   :  { %162 = dma.hbm_to_vmem [thread:$0]  %s3654_s14, 16, %s160_s6, [#allocation19]  }
  0xf8   :  { %s2617_s5 = scalar_lea.hbm %s3658_s18, 1024 }
  0xf9   :  { %p2618_p12 = scmp.ne.s32.totalorder %s3658_s18, %s2617_s5  ;;  %p2621_p13 = scmp.lt.u32.totalorder %s2617_s5, %s3658_s18 }
  0xfb   :  { %p2623_p0 = pnand %p2621_p13, %p2618_p12 }
  0xfd   :  { %2626 = shalt.err (!%p2623_p0)
}
  0xfe   :  { %s2627_s0 = scalar_lea.vmem %s183_s19, 1024  ;;  %p2632_p2 = scmp.lt.s32.totalorder %s183_s19, %s183_s19 }
  0xff   :  { %p2628_p1 = scmp.ne.s32.totalorder %s183_s19, %s2627_s0  ;;  %p2633_p3 = scmp.lt.s32.totalorder %s2627_s0, %s2627_s0 }
 0x101   :  { %p2634_p4 = por %p2633_p3, %p2632_p2 }
 0x103   :  { %p2635_p5 = pnand %p2634_p4, %p2628_p1 }
 0x105   :  { %2638 = shalt.err (!%p2635_p5)
}
 0x106   :  { %188 = dma.hbm_to_vmem [thread:$0]  %s3658_s18, 1024, %s183_s19, [#allocation22], %s2682_s23, %s2682_s23, %s2683_s27  }
 0x107   :  { %2661 = dma.done.wait [#allocation4], 128  }
 0x108   :  { %2662 = vsyncadd [#allocation4], 4294967168 }
 0x109   :  { %2663 = dma.done.wait [#allocation7], 640  }
 0x10a   :  { %2664 = vsyncadd [#allocation7], 4294966656 }
 0x10b   :  { %2665 = dma.done.wait [#allocation10], 656  }
 0x10c   :  { %2666 = vsyncadd [#allocation10], 4294966640 }
 0x10d   :  { %2667 = dma.done.wait [#allocation13], 48  }
 0x10e   :  { %2668 = vsyncadd [#allocation13], 4294967248 }
 0x10f   :  { %2669 = dma.done.wait [#allocation16], 32  }
 0x110   :  { %2670 = vsyncadd [#allocation16], 4294967264 }
 0x111   :  { %2671 = dma.done.wait [#allocation19], 32  }
 0x112   :  { %2672 = vsyncadd [#allocation19], 4294967264 }
 0x113   :  { %2673 = dma.done.wait [#allocation22], 1040  }
 0x114   :  { %2674 = vsyncadd [#allocation22], 4294966256  ;;  %v2694_v1 = vmov 0.0|0.0   ;;  %vm2695_vm0 = vmmov 0   ;;  %v2696_v2 = vmov 0.0   ;;  %v281_v3 = vld [vmem:[#allocation8] sm:$0xff] }
 0x115   :  { %2131 = vmatprep.subr.bf16.mxu1 %v2694_v1  ;;  %2004 = vmatprep.mubr.msk.f32.mxu1 %vm2695_vm0, %v2696_v2  ;;  %v282_v4 = vld [vmem:[#allocation8 + $0x8] sm:$0xff]  ;;  %v283_v5 = vld [vmem:[#allocation8 + $0x10] sm:$0xff]  ;;  %v284_v7 = vld [vmem:[#allocation8 + $0x18] sm:$0xff]  ;;  %vm250_vm1 = vcmask 1041408   ;;  %vm252_vm2 = vcmask 1043456   ;;  %vm254_vm3 = vcmask 1045504  }
 0x116   :  { %601 = vmatprep.mubr.f32.mxu0 %v2696_v2  ;;  %v2132_v6 = vpack.c.bf16 %v282_v4, %v281_v3  ;;  %v234_v8 = vld [vmem:[#allocation3] sm:$0x3]  ;;  %v236_v9 = vld [vmem:[#allocation3 + $0x2] sm:$0x3]  ;;  %v238_v10 = vld [vmem:[#allocation3 + $0x4] sm:$0x3]  ;;  %v2135_v13 = vpack.c.bf16 %v284_v7, %v283_v5 }
 0x117   :  { %v240_v11 = vld [vmem:[#allocation3 + $0x6] sm:$0x3]  ;;  %v242_v12 = vrot.slane %v236_v9, 6  ;;  %v245_v14 = vrot.slane %v238_v10, 4  ;;  %vm279_vm4 = vcmask 261120   ;;  %s3684_s19 = sld [smem:[#allocation39_spill]] }
 0x118   :  { %2133 = vmatpush3.bf16.msra.mxu1 %v2132_v6  ;;  %v248_v15 = vrot.slane %v240_v11, 2  ;;  %v256_v43 = vld [vmem:[#allocation6] sm:$0x3]  ;;  %v258_v44 = vld [vmem:[#allocation6 + $0x2] sm:$0x3]  ;;  %s3685_s4 = sld [smem:[#allocation36_spill]] }
 0x119   :  { %2134 = vmatprep.subr.bf16.mxu1 %v2694_v1  ;;  %v251_v16 = vsel %vm250_vm1, %v234_v8, %v242_v12  ;;  %v260_v45 = vld [vmem:[#allocation6 + $0x4] sm:$0x3]  ;;  %v262_v46 = vld [vmem:[#allocation6 + $0x6] sm:$0x3]  ;;  %v264_v47 = vrot.slane %v258_v44, 6  ;;  %vm533_vm6 = vcmask 523264  }
 0x11a   :  { %v253_v17 = vsel %vm252_vm2, %v251_v16, %v245_v14  ;;  %v267_v48 = vrot.slane %v260_v45, 4  ;;  %v270_v49 = vrot.slane %v262_v46, 2  ;;  %vm404_vm7 = vcmask 326656   ;;  %s2698_s1 = smov 64   ;;  %s3686_s29 = sld [smem:[#allocation40_spill]] }
 0x11b   :  { %v3008_v18 = vsel %vm254_vm3, %v253_v17, %v248_v15  ;;  %v272_v50 = vsel %vm250_vm1, %v256_v43, %v264_v47  ;;  %v2697_v15 = vmov -1.0   ;;  %vm781_vm11 = vcmask 517120   ;;  %s2708_s30 = smov 3   ;;  %s2709_s21 = smov 52  }
 0x11c   :  { %2136 = vmatpush3.bf16.msra.mxu1 %v2135_v13  ;;  %v273_v51 = vsel %vm252_vm2, %v272_v50, %v267_v48  ;;  %vm851_vm12 = vcmask 519170   ;;  %vm905_vm13 = vcmask 521220   ;;  %vm957_vm14 = vcmask 523270  }
 0x11d   :  { %2137 = vmatprep.subr.bf16.mxu1 %v2694_v1  ;;  %v506_v19 = vld [vmem:[%s3684_s19 + $0x8] sm:$0xff]  ;;  %v508_v20 = vld [vmem:[%s3684_s19 + $0x18] sm:$0xff]  ;;  %v505_v22 = vld [vmem:[%s3684_s19] sm:$0xff]  ;;  %v274_v52 = vsel %vm254_vm3, %v273_v51, %v270_v49  ;;  %vm800_vm15 = vcmask 7168  }
 0x11e   :  { %v2143_v21 = vpack.c.bf16 %v508_v20, %v506_v19  ;;  %v507_v23 = vld [vmem:[%s3684_s19 + $0x10] sm:$0xff]  ;;  %v510_v25 = vld [vmem:[%s3684_s19 + $0x28] sm:$0xff]  ;;  %v512_v26 = vld [vmem:[%s3684_s19 + $0x38] sm:$0xff]  ;;  %276 = vrot.lane.b32.xlu0 %v274_v52, %s2678_s26 }
 0x11f   :  { %2005 = vmatmul.mubr.msk.f32.vlgmr.msra.gmra.mrb[0].mxu1 %vm279_vm4, %v3008_v18  ;;  %v2145_v24 = vpack.c.bf16 %v507_v23, %v505_v22  ;;  %v2147_v27 = vpack.c.bf16 %v512_v26, %v510_v25  ;;  %v509_v28 = vld [vmem:[%s3684_s19 + $0x20] sm:$0xff]  ;;  %v511_v29 = vld [vmem:[%s3684_s19 + $0x30] sm:$0xff]  ;;  %v514_v31 = vld [vmem:[%s3684_s19 + $0x48] sm:$0xff] }
 0x120   :  { %2017 = vmatprep.mubr.msk.f32.mxu1 %vm2695_vm0, %v2696_v2  ;;  %2144 = vmatprep.subr.bf16.mxu0 %v2143_v21  ;;  %v2149_v30 = vpack.c.bf16 %v511_v29, %v509_v28  ;;  %v516_v32 = vld [vmem:[%s3684_s19 + $0x58] sm:$0xff]  ;;  %v513_v34 = vld [vmem:[%s3684_s19 + $0x40] sm:$0xff]  ;;  %v515_v35 = vld [vmem:[%s3684_s19 + $0x50] sm:$0xff] }
 0x121   :  { %2146 = vmatpush1.bf16.msra.mxu0 %v2145_v24  ;;  %v2151_v33 = vpack.c.bf16 %v516_v32, %v514_v31  ;;  %v2153_v36 = vpack.c.bf16 %v515_v35, %v513_v34  ;;  %v518_v37 = vld [vmem:[%s3684_s19 + $0x68] sm:$0xff]  ;;  %v520_v38 = vld [vmem:[%s3684_s19 + $0x78] sm:$0xff]  ;;  %v517_v40 = vld [vmem:[%s3684_s19 + $0x60] sm:$0xff]  ;;  %v523_v31 = vlaneseq }
 0x122   :  { %2148 = vmatprep.subr.bf16.mxu0 %v2147_v27  ;;  %v2155_v39 = vpack.c.bf16 %v520_v38, %v518_v37  ;;  %v519_v41 = vld [vmem:[%s3684_s19 + $0x70] sm:$0xff]  ;;  %v1914_v53 = vld [vmem:[%s3685_s4] ss:$0 sm:$0xff]  ;;  %v394_v25 = vld [vmem:[#allocation9 + $0x10] sm:$0xff] }
 0x123   :  { %v2157_v42 = vpack.c.bf16 %v519_v41, %v517_v40  ;;  %v392_v22 = vld [vmem:[#allocation9] sm:$0xff]  ;;  %v393_v23 = vld [vmem:[#allocation9 + $0x8] sm:$0xff]  ;;  %v395_v26 = vld [vmem:[#allocation9 + $0x18] sm:$0xff]  ;;  %v524_v32 = vshrl.u32 %v523_v31, 7 }
 0x124   :  { %v2138_v24 = vpack.c.bf16 %v393_v23, %v392_v22  ;;  %v2141_v27 = vpack.c.bf16 %v395_v26, %v394_v25  ;;  %v396_v29 = vld [vmem:[#allocation9 + $0x20] sm:$0xff]  ;;  %v521_v34 = vld [vmem:[#allocation12] sm:$0x3] }
 0x125   :  { %2150 = vmatpush1.bf16.msra.mxu0 %v2149_v30  ;;  %v529_v35 = vsub.s32 1, %v524_v32 }
 0x126   :  { %2152 = vmatprep.subr.bf16.mxu0 %v2151_v33  ;;  %2139 = vmatpush3.bf16.msra.mxu1 %v2138_v24  ;;  %v525_v33 = vsub.s32 0, %v524_v32 }
 0x127   :  { %2140 = vmatprep.subr.bf16.mxu1 %v2694_v1  ;;  %v530_v37 = vrot.slane %v521_v34, %v529_v35 }
 0x129   :  { %2154 = vmatpush1.bf16.msra.mxu0 %v2153_v36  ;;  %v526_v36 = vrot.slane %v521_v34, %v525_v33 }
 0x12a   :  { %2156 = vmatprep.subr.bf16.mxu0 %v2155_v39  ;;  %2142 = vmatpush3.bf16.msra.mxu1 %v2141_v27 }
 0x12b   :  { %2015 = vmatprep.subr.mxu1 %v2696_v2 }
 0x12d   :  { %2158 = vmatpush1.bf16.msra.mxu0 %v2157_v42 }
 0x12e   :  { %2171 = vmatprep.subr.bf16.mxu0 %v2694_v1  ;;  %2016 = vmatpush3.msra.mxu1 %v396_v29 }
 0x12f   :  { %2159 = vmatprep.subr.bf16.mxu1 %v2694_v1 }
 0x190   :  { %v277_v28 = vpop.permute.xlu0 %276 }
 0x191   :  { %v280_v30 = vsel %vm279_vm4, %v3008_v18, %v277_v28 }
 0x192   :  { %2018 = vmatmul.mubr.msk.f32.vlgmr.msra.gmra.mrb[2].mxu1 %vm404_vm7, %v280_v30  ;;  %vm846_vm7 = vcmask 23552  }
 0x193   :  { %2036 = vmatprep.mubr.msk.f32.mxu1 %vm2695_vm0, %v2696_v2 }
 0x1f2   :  { %v361_v54 = vpop.f32.mrb[0].mxu1 }
 0x1f3   :  { %v362_v55 = vadd.f32 %v1914_v53, %v361_v54  ;;  %v2006_v56 = vpop.f32.mrb[1].mxu1 }
 0x1f5   :  { %v366_v57 = vmul.f32 0.70710677, %v362_v55  ;;  %v365_v19 = vmul.f32 0.5, %v362_v55 }
 0x1f7   :  { %v369_v58 = vand.u32 2147483647, %v366_v57  ;;  %vm367_vm5 = vcmp.ge.f32.partialorder %v366_v57, 0.0 }
 0x1f8   :  { %v368_v16 = vsel %vm367_vm5, 1.0, %v2697_v15  ;;  %vm802_vm5 = vcmask 15360  }
 0x1f9   :  { %v370_v59 = vmul.f32 0.3275911, %v369_v58  ;;  %v383_v61 = vsub.f32 0.0, %v369_v58 }
 0x1fb   :  { %v371_v60 = vadd.f32 1.0, %v370_v59  ;;  %v384_v63 = vmul.f32 %v383_v61, %v369_v58 }
 0x1fd   :  { %2285 = vrcp.f32 %v371_v60  ;;  %v385_v4 = vmul.f32 1.442695, %v384_v63 }
 0x1ff   :  { %2287 = vpow2.f32 %v385_v4 }
 0x207   :  { %v2286_v62 = vpop.eup %2285 }
 0x208   :  { %v374_v0 = vmul.f32 1.0614054, %v2286_v62 }
 0x209   :  { %v2288_v12 = vpop.eup %2287 }
 0x20a   :  { %v375_v3 = vadd.f32 -1.4531521, %v374_v0 }
 0x20c   :  { %v376_v5 = vmul.f32 %v2286_v62, %v375_v3 }
 0x20e   :  { %v377_v6 = vadd.f32 1.4214138, %v376_v5 }
 0x210   :  { %v378_v7 = vmul.f32 %v2286_v62, %v377_v6 }
 0x212   :  { %v379_v8 = vadd.f32 -0.28449672, %v378_v7 }
 0x214   :  { %v380_v9 = vmul.f32 %v2286_v62, %v379_v8 }
 0x216   :  { %v381_v10 = vadd.f32 0.2548296, %v380_v9 }
 0x218   :  { %v382_v11 = vmul.f32 %v2286_v62, %v381_v10 }
 0x21a   :  { %v387_v13 = vmul.f32 %v2288_v12, %v382_v11 }
 0x21c   :  { %v388_v14 = vsub.f32 1.0, %v387_v13 }
 0x21e   :  { %v389_v17 = vmul.f32 %v388_v14, %v368_v16 }
 0x220   :  { %v390_v20 = vadd.f32 1.0, %v389_v17 }
 0x222   :  { %v3072_v21 = vmul.f32 %v390_v20, %v365_v19 }
 0x224   :  { %1918 = vmatmul.mubr.msk.f32.vlgmr.msra.gmra.mrb[0].mxu0 %vm533_vm6, %v3072_v21 }
 0x225   :  { %2055 = vmatprep.mubr.msk.f32.mxu0 %vm2695_vm0, %v2696_v2 }
 0x2f7   :  { %v603_v38 = vpop.f32.mrb[0].mxu0 }
 0x2f8   :  { %v604_v39 = vadd.f32 %v603_v38, %v526_v36  ;;  %v605_v40 = vpop.f32.mrb[1].mxu0  ;;  %v662_v38 = vld [vmem:[%s3648_s8] sm:$0xff] }
 0x2f9   :  { %v606_v41 = vadd.f32 %v605_v40, %v530_v37 }
 0x2fa   :  { %v610_v18 = vmul.f32 0.70710677, %v604_v39  ;;  %v608_v26 = vmul.f32 0.5, %v604_v39  ;;  %v663_v39 = vld [vmem:[%s3648_s8 + $0x8] sm:$0xff] }
 0x2fb   :  { %v611_v42 = vmul.f32 0.70710677, %v606_v41  ;;  %v609_v28 = vmul.f32 0.5, %v606_v41  ;;  %v2160_v40 = vpack.c.bf16 %v663_v39, %v662_v38  ;;  %v664_v41 = vld [vmem:[%s3648_s8 + $0x10] sm:$0xff] }
 0x2fc   :  { %v616_v43 = vand.u32 2147483647, %v610_v18  ;;  %vm612_vm8 = vcmp.ge.f32.partialorder %v610_v18, 0.0  ;;  %v665_v18 = vld [vmem:[%s3648_s8 + $0x18] sm:$0xff] }
 0x2fd   :  { %v617_v44 = vand.u32 2147483647, %v611_v42  ;;  %vm613_vm9 = vcmp.ge.f32.partialorder %v611_v42, 0.0  ;;  %v614_v20 = vsel %vm612_vm8, 1.0, %v2697_v15  ;;  %2161 = vmatpush3.bf16.msra.mxu1 %v2160_v40  ;;  %v2163_v42 = vpack.c.bf16 %v665_v18, %v664_v41 }
 0x2fe   :  { %v618_v45 = vmul.f32 0.3275911, %v616_v43  ;;  %v644_v49 = vsub.f32 0.0, %v616_v43  ;;  %v615_v24 = vsel %vm613_vm9, 1.0, %v2697_v15  ;;  %2162 = vmatprep.subr.bf16.mxu1 %v2694_v1  ;;  %vm804_vm8 = vcmask 17408  }
 0x2ff   :  { %v619_v46 = vmul.f32 0.3275911, %v617_v44  ;;  %v645_v50 = vsub.f32 0.0, %v617_v44  ;;  %vm866_vm9 = vcmask 19458  }
 0x300   :  { %v620_v47 = vadd.f32 1.0, %v618_v45  ;;  %v646_v52 = vmul.f32 %v644_v49, %v616_v43  ;;  %v666_v43 = vld [vmem:[%s3648_s8 + $0x20] sm:$0xff]  ;;  %v1916_v49 = vld [vmem:[#allocation11] ss:$0 sm:$0xff] }
 0x301   :  { %v621_v48 = vadd.f32 1.0, %v619_v46  ;;  %v647_v55 = vmul.f32 %v645_v50, %v617_v44  ;;  %v667_v44 = vld [vmem:[%s3648_s8 + $0x28] sm:$0xff]  ;;  %2164 = vmatpush3.bf16.msra.mxu1 %v2163_v42  ;;  %v668_v46 = vld [vmem:[%s3648_s8 + $0x30] sm:$0xff]  ;;  %v474_v50 = vpop.f32.mrb[2].mxu1 }
 0x302   :  { %2289 = vrcp.f32 %v620_v47  ;;  %v648_v58 = vmul.f32 1.442695, %v646_v52  ;;  %v2166_v45 = vpack.c.bf16 %v667_v44, %v666_v43  ;;  %2165 = vmatprep.subr.bf16.mxu1 %v2694_v1  ;;  %v669_v47 = vld [vmem:[%s3648_s8 + $0x38] sm:$0xff]  ;;  %v2019_v52 = vpop.f32.mrb[3].mxu1  ;;  %s2701_s8 = smov 96  }
 0x303   :  { %2291 = vrcp.f32 %v621_v48  ;;  %v650_v61 = vmul.f32 1.442695, %v647_v55  ;;  %v2169_v48 = vpack.c.bf16 %v669_v47, %v668_v46 }
 0x304   :  { %2293 = vpow2.f32 %v648_v58 }
 0x305   :  { %2295 = vpow2.f32 %v650_v61  ;;  %2167 = vmatpush3.bf16.msra.mxu1 %v2166_v45 }
 0x306   :  { %2168 = vmatprep.subr.bf16.mxu1 %v2694_v1 }
 0x309   :  { %2170 = vmatpush3.bf16.msra.mxu1 %v2169_v48 }
 0x30a   :  { %2183 = vmatprep.subr.bf16.mxu1 %v2694_v1 }
 0x30c   :  { %v2290_v51 = vpop.eup %2289 }
 0x30d   :  { %v2292_v53 = vpop.eup %2291  ;;  %v626_v54 = vmul.f32 1.0614054, %v2290_v51 }
 0x30e   :  { %v627_v56 = vmul.f32 1.0614054, %v2292_v53  ;;  %v2294_v12 = vpop.eup %2293 }
 0x30f   :  { %v628_v57 = vadd.f32 -1.4531521, %v626_v54  ;;  %v2296_v14 = vpop.eup %2295 }
 0x310   :  { %v629_v59 = vadd.f32 -1.4531521, %v627_v56 }
 0x311   :  { %v630_v60 = vmul.f32 %v2290_v51, %v628_v57 }
 0x312   :  { %v631_v62 = vmul.f32 %v2292_v53, %v629_v59 }
 0x313   :  { %v632_v63 = vadd.f32 1.4214138, %v630_v60 }
 0x314   :  { %v633_v0 = vadd.f32 1.4214138, %v631_v62 }
 0x315   :  { %v634_v3 = vmul.f32 %v2290_v51, %v632_v63 }
 0x316   :  { %v635_v4 = vmul.f32 %v2292_v53, %v633_v0 }
 0x317   :  { %v636_v5 = vadd.f32 -0.28449672, %v634_v3 }
 0x318   :  { %v637_v6 = vadd.f32 -0.28449672, %v635_v4 }
 0x319   :  { %v638_v7 = vmul.f32 %v2290_v51, %v636_v5 }
 0x31a   :  { %v639_v8 = vmul.f32 %v2292_v53, %v637_v6 }
 0x31b   :  { %v640_v9 = vadd.f32 0.2548296, %v638_v7 }
 0x31c   :  { %v641_v10 = vadd.f32 0.2548296, %v639_v8 }
 0x31d   :  { %v642_v11 = vmul.f32 %v2290_v51, %v640_v9  ;;  %v475_v51 = vadd.f32 %v1916_v49, %v474_v50 }
 0x31e   :  { %v643_v13 = vmul.f32 %v2292_v53, %v641_v10 }
 0x31f   :  { %v652_v16 = vmul.f32 %v2294_v12, %v642_v11  ;;  %v479_v53 = vmul.f32 0.70710677, %v475_v51  ;;  %v478_v12 = vmul.f32 0.5, %v475_v51 }
 0x320   :  { %v653_v17 = vmul.f32 %v2296_v14, %v643_v13 }
 0x321   :  { %v654_v19 = vsub.f32 1.0, %v652_v16  ;;  %v482_v54 = vand.u32 2147483647, %v479_v53  ;;  %vm480_vm10 = vcmp.ge.f32.partialorder %v479_v53, 0.0 }
 0x322   :  { %v655_v22 = vsub.f32 1.0, %v653_v17  ;;  %v481_v10 = vsel %vm480_vm10, 1.0, %v2697_v15  ;;  %vm920_vm10 = vcmask 21508  }
 0x323   :  { %v656_v23 = vmul.f32 %v654_v19, %v614_v20  ;;  %v483_v55 = vmul.f32 0.3275911, %v482_v54  ;;  %v496_v57 = vsub.f32 0.0, %v482_v54 }
 0x324   :  { %v657_v25 = vmul.f32 %v655_v22, %v615_v24 }
 0x325   :  { %v658_v27 = vadd.f32 1.0, %v656_v23  ;;  %v484_v56 = vadd.f32 1.0, %v483_v55  ;;  %v497_v58 = vmul.f32 %v496_v57, %v482_v54 }
 0x326   :  { %v659_v29 = vadd.f32 1.0, %v657_v25 }
 0x327   :  { %v660_v30 = vmul.f32 %v658_v27, %v608_v26  ;;  %2297 = vrcp.f32 %v484_v56  ;;  %v498_v61 = vmul.f32 1.442695, %v497_v58 }
 0x328   :  { %v661_v31 = vmul.f32 %v659_v29, %v609_v28 }
 0x329   :  { %v778_v32 = vrot.slane %v660_v30, 2  ;;  %v786_v33 = vrot.slane %v660_v30, 4  ;;  %v793_v34 = vrot.slane %v660_v30, 6  ;;  %2299 = vpow2.f32 %v498_v61 }
 0x32b   :  { %v3087_v35 = vmul.f32 %v778_v32, %v661_v31  ;;  %v3089_v36 = vmul.f32 %v786_v33, %v661_v31  ;;  %v3091_v37 = vmul.f32 %v793_v34, %v661_v31 }
 0x32d   :  { %1052 = vrot.lane.b32.xlu1 %v3089_v36, %s2698_s1  ;;  %1044 = vrot.lane.b32.xlu0 %v3087_v35, %s2698_s1  ;;  %v782_v33 = vsel %vm781_vm11, %v3087_v35, 0.0  ;;  %v852_v38 = vsel %vm851_vm12, %v3091_v37, 0.0  ;;  %v789_v39 = vsel %vm781_vm11, %v3089_v36, 0.0  ;;  %v796_v40 = vsel %vm781_vm11, %v3091_v37, 0.0 }
 0x32e   :  { %v856_v41 = vsel %vm851_vm12, %v3087_v35, 0.0  ;;  %v906_v18 = vsel %vm905_vm13, %v3089_v36, 0.0  ;;  %v860_v42 = vsel %vm851_vm12, %v3089_v36, 0.0  ;;  %v914_v43 = vsel %vm905_vm13, %v3087_v35, 0.0 }
 0x32f   :  { %v910_v44 = vsel %vm905_vm13, %v3091_v37, 0.0  ;;  %v962_v45 = vsel %vm957_vm14, %v3089_v36, 0.0  ;;  %v958_v46 = vsel %vm957_vm14, %v3087_v35, 0.0  ;;  %v966_v47 = vsel %vm957_vm14, %v3091_v37, 0.0 }
 0x331   :  { %1060 = vrot.lane.b32.xlu1 %v3091_v37, %s2698_s1  ;;  %v2298_v59 = vpop.eup %2297 }
 0x332   :  { %v487_v60 = vmul.f32 1.0614054, %v2298_v59 }
 0x333   :  { %v2300_v7 = vpop.eup %2299 }
 0x334   :  { %v488_v62 = vadd.f32 -1.4531521, %v487_v60 }
 0x336   :  { %v489_v63 = vmul.f32 %v2298_v59, %v488_v62 }
 0x338   :  { %v490_v0 = vadd.f32 1.4214138, %v489_v63 }
 0x33a   :  { %v491_v3 = vmul.f32 %v2298_v59, %v490_v0 }
 0x33c   :  { %v492_v4 = vadd.f32 -0.28449672, %v491_v3 }
 0x33e   :  { %v493_v5 = vmul.f32 %v2298_v59, %v492_v4 }
 0x340   :  { %v494_v6 = vadd.f32 0.2548296, %v493_v5 }
 0x342   :  { %v495_v8 = vmul.f32 %v2298_v59, %v494_v6 }
 0x344   :  { %v500_v9 = vmul.f32 %v2300_v7, %v495_v8 }
 0x346   :  { %v501_v11 = vsub.f32 1.0, %v500_v9 }
 0x348   :  { %v502_v13 = vmul.f32 %v501_v11, %v481_v10 }
 0x34a   :  { %v503_v14 = vadd.f32 1.0, %v502_v13 }
 0x34c   :  { %v3128_v16 = vmul.f32 %v503_v14, %v478_v12 }
 0x34e   :  { %2037 = vmatmul.mubr.msk.f32.vlgmr.msra.gmra.mrb[4].mxu1 %vm533_vm6, %v3128_v16 }
 0x34f   :  { %2090 = vmatprep.mubr.msk.f32.mxu1 %vm2695_vm0, %v2696_v2 }
 0x39f   :  { %v1053_v17 = vpop.permute.xlu1 %1052  ;;  %v1045_v19 = vpop.permute.xlu0 %1044 }
 0x3a0   :  { %v1055_v20 = vsel %vm781_vm11, %v1053_v17, 0.0  ;;  %v1047_v22 = vsel %vm781_vm11, %v1045_v19, 0.0  ;;  %v1168_v26 = vsel %vm905_vm13, %v1053_v17, 0.0  ;;  %v1120_v27 = vsel %vm851_vm12, %v1045_v19, 0.0 }
 0x3a1   :  { %1056 = vadd.xlane.f32.xlu1 %v1055_v20  ;;  %1048 = vadd.xlane.f32.xlu0 %v1047_v22  ;;  %v1176_v28 = vsel %vm905_vm13, %v1045_v19, 0.0  ;;  %v1124_v29 = vsel %vm851_vm12, %v1053_v17, 0.0  ;;  %v1222_v30 = vsel %vm957_vm14, %v1053_v17, 0.0  ;;  %v1218_v32 = vsel %vm957_vm14, %v1045_v19, 0.0 }
 0x3a3   :  { %v1061_v23 = vpop.permute.xlu1 %1060 }
 0x3a4   :  { %v1063_v24 = vsel %vm781_vm11, %v1061_v23, 0.0  ;;  %v1116_v25 = vsel %vm851_vm12, %v1061_v23, 0.0  ;;  %v1172_v31 = vsel %vm905_vm13, %v1061_v23, 0.0  ;;  %v1226_v34 = vsel %vm957_vm14, %v1061_v23, 0.0 }
 0x3a5   :  { %1064 = vadd.xlane.f32.xlu1 %v1063_v24  ;;  %1117 = vadd.xlane.f32.xlu0 %v1116_v25  ;;  %vm972_vm11 = vcmask 23558   ;;  %vm1886_vm14 = vcmask 293888  }
 0x3a9   :  { %1169 = vadd.xlane.f32.xlu1 %v1168_v26  ;;  %1121 = vadd.xlane.f32.xlu0 %v1120_v27 }
 0x3ad   :  { %1177 = vadd.xlane.f32.xlu1 %v1176_v28  ;;  %1125 = vadd.xlane.f32.xlu0 %v1124_v29 }
 0x3b1   :  { %1223 = vadd.xlane.f32.xlu1 %v1222_v30  ;;  %1173 = vadd.xlane.f32.xlu0 %v1172_v31 }
 0x3b5   :  { %1219 = vadd.xlane.f32.xlu0 %v1218_v32  ;;  %783 = vadd.xlane.f32.xlu1 %v782_v33 }
 0x3b9   :  { %1227 = vadd.xlane.f32.xlu0 %v1226_v34  ;;  %853 = vadd.xlane.f32.xlu1 %v852_v38 }
 0x3bd   :  { %790 = vadd.xlane.f32.xlu0 %v789_v39  ;;  %797 = vadd.xlane.f32.xlu1 %v796_v40 }
 0x3c1   :  { %857 = vadd.xlane.f32.xlu0 %v856_v41  ;;  %907 = vadd.xlane.f32.xlu1 %v906_v18 }
 0x3c5   :  { %861 = vadd.xlane.f32.xlu0 %v860_v42  ;;  %915 = vadd.xlane.f32.xlu1 %v914_v43 }
 0x3c9   :  { %911 = vadd.xlane.f32.xlu0 %v910_v44  ;;  %963 = vadd.xlane.f32.xlu1 %v962_v45 }
 0x3cd   :  { %959 = vadd.xlane.f32.xlu0 %v958_v46 }
 0x3d1   :  { %967 = vadd.xlane.f32.xlu0 %v966_v47 }
 0x42e   :  { %v1057_v48 = vpop.xlane.xlu1 %1056  ;;  %v1049_v49 = vpop.xlane.xlu0 %1048 }
 0x42f   :  { %v1058_v50 = vmul.f32 0.125, %v1057_v48  ;;  %v1050_v51 = vmul.f32 0.125, %v1049_v49 }
 0x431   :  { %v1113_v52 = vsel %vm800_vm15, 0.0, %v1050_v51  ;;  %v1067_v56 = vsel %vm800_vm15, %v1050_v51, %v1058_v50 }
 0x432   :  { %v1114_v36 = vsel %vm802_vm5, %v1113_v52, %v1058_v50  ;;  %v1065_v53 = vpop.xlane.xlu1 %1064  ;;  %v1118_v54 = vpop.xlane.xlu0 %1117 }
 0x433   :  { %v1066_v55 = vmul.f32 0.125, %v1065_v53  ;;  %v1119_v35 = vmul.f32 0.125, %v1118_v54 }
 0x435   :  { %v3174_v37 = vsel %vm802_vm5, %v1067_v56, %v1066_v55  ;;  %v3177_v57 = vsel %vm846_vm7, %v1114_v36, %v1066_v55  ;;  %v1165_v62 = vsel %vm800_vm15, %v1119_v35, 0.0 }
 0x436   :  { %v1170_v58 = vpop.xlane.xlu1 %1169  ;;  %v1122_v59 = vpop.xlane.xlu0 %1121  ;;  %v1069_v60 = vsel %vm804_vm8, %v3174_v37, -inf }
 0x437   :  { %v1123_v61 = vmul.f32 0.125, %v1122_v59  ;;  %1070 = vmax.xlane.f32.xlu1 %v1069_v60  ;;  %v1171_v11 = vmul.f32 0.125, %v1170_v58 }
 0x439   :  { %v1166_v63 = vsel %vm802_vm5, %v1165_v62, %v1123_v61  ;;  %v1128_v5 = vsel %vm800_vm15, %v1119_v35, %v1123_v61 }
 0x43a   :  { %v1178_v0 = vpop.xlane.xlu1 %1177  ;;  %v1126_v3 = vpop.xlane.xlu0 %1125 }
 0x43b   :  { %v1127_v4 = vmul.f32 0.125, %v1126_v3  ;;  %v1179_v13 = vmul.f32 0.125, %v1178_v0 }
 0x43d   :  { %v3185_v6 = vsel %vm802_vm5, %v1128_v5, %v1127_v4  ;;  %v3188_v7 = vsel %vm846_vm7, %v1166_v63, %v1127_v4 }
 0x43e   :  { %v1224_v8 = vpop.xlane.xlu1 %1223  ;;  %v1174_v9 = vpop.xlane.xlu0 %1173  ;;  %v1130_v10 = vsel %vm866_vm9, %v3185_v6, -inf }
 0x43f   :  { %v1175_v12 = vmul.f32 0.125, %v1174_v9  ;;  %1131 = vmax.xlane.f32.xlu0 %v1130_v10  ;;  %v1225_v26 = vmul.f32 0.125, %v1224_v8 }
 0x441   :  { %v1180_v14 = vsel %vm800_vm15, %v1171_v11, %v1175_v12 }
 0x442   :  { %v1220_v17 = vpop.xlane.xlu0 %1219  ;;  %v784_v19 = vpop.xlane.xlu1 %783  ;;  %v3194_v20 = vsel %vm802_vm5, %v1180_v14, %v1179_v13  ;;  %v1216_v22 = vsel %vm802_vm5, %v1180_v14, 0.0 }
 0x443   :  { %v1182_v23 = vsel %vm920_vm10, %v3194_v20, -inf  ;;  %v3200_v24 = vsel %vm846_vm7, %v1216_v22, %v1179_v13  ;;  %v1221_v25 = vmul.f32 0.125, %v1220_v17  ;;  %v785_v30 = vmul.f32 0.125, %v784_v19  ;;  %v746_v19 = vpop.f32.mrb[4].mxu1 }
 0x444   :  { %1183 = vmax.xlane.f32.xlu1 %v1182_v23  ;;  %v2038_v22 = vpop.f32.mrb[5].mxu1  ;;  %v1919_v23 = vld [vmem:[#allocation14] ss:$0 sm:$0xff] }
 0x445   :  { %v1230_v31 = vsel %vm800_vm15, %v1221_v25, %v1225_v26  ;;  %v848_v41 = vsel %vm800_vm15, 0.0, %v785_v30  ;;  %v3246_v25 = vadd.f32 %v1919_v23, %v746_v19 }
 0x446   :  { %v1228_v27 = vpop.xlane.xlu0 %1227  ;;  %v854_v28 = vpop.xlane.xlu1 %853 }
 0x447   :  { %v1229_v29 = vmul.f32 0.125, %v1228_v27  ;;  %v855_v18 = vmul.f32 0.125, %v854_v28  ;;  %v3249_v26 = vmul.f32 0.70710677, %v3246_v25 }
 0x449   :  { %v3204_v32 = vsel %vm802_vm5, %v1230_v31, %v1229_v29  ;;  %v902_v50 = vsel %vm800_vm15, %v855_v18, 0.0  ;;  %v754_v27 = vand.u32 2147483647, %v3249_v26  ;;  %vm752_vm12 = vcmp.ge.f32.partialorder %v3249_v26, 0.0 }
 0x44a   :  { %v791_v33 = vpop.xlane.xlu0 %790  ;;  %v798_v34 = vpop.xlane.xlu1 %797  ;;  %v1232_v38 = vsel %vm972_vm11, %v3204_v32, -inf }
 0x44b   :  { %v792_v39 = vmul.f32 0.125, %v791_v33  ;;  %v799_v40 = vmul.f32 0.125, %v798_v34  ;;  %1233 = vmax.xlane.f32.xlu0 %v1232_v38  ;;  %v755_v28 = vmul.f32 0.3275911, %v754_v27 }
 0x44d   :  { %v849_v42 = vsel %vm802_vm5, %v848_v41, %v792_v39  ;;  %v801_v43 = vsel %vm800_vm15, %v785_v30, %v792_v39  ;;  %v756_v29 = vadd.f32 1.0, %v755_v28 }
 0x44e   :  { %v858_v44 = vpop.xlane.xlu0 %857  ;;  %v3212_v45 = vsel %vm802_vm5, %v801_v43, %v799_v40  ;;  %v3215_v46 = vsel %vm846_vm7, %v849_v42, %v799_v40  ;;  %v908_v48 = vpop.xlane.xlu1 %907 }
 0x44f   :  { %v859_v47 = vmul.f32 0.125, %v858_v44  ;;  %v805_v49 = vsel %vm804_vm8, %v3212_v45, -inf  ;;  %v909_v59 = vmul.f32 0.125, %v908_v48  ;;  %2301 = vrcp.f32 %v756_v29 }
 0x450   :  { %806 = vmax.xlane.f32.xlu1 %v805_v49  ;;  %v2699_v29 = vmov 1  }
 0x451   :  { %v903_v51 = vsel %vm802_vm5, %v902_v50, %v859_v47  ;;  %v864_v53 = vsel %vm800_vm15, %v855_v18, %v859_v47  ;;  %2266 = vset.pattern.permute.xlu0 %v2699_v29 }
 0x452   :  { %v862_v52 = vpop.xlane.xlu0 %861  ;;  %v916_v54 = vpop.xlane.xlu1 %915 }
 0x453   :  { %v863_v36 = vmul.f32 0.125, %v862_v52  ;;  %v917_v61 = vmul.f32 0.125, %v916_v54 }
 0x455   :  { %v3223_v55 = vsel %vm802_vm5, %v864_v53, %v863_v36  ;;  %v3226_v35 = vsel %vm846_vm7, %v903_v51, %v863_v36 }
 0x456   :  { %v912_v56 = vpop.xlane.xlu0 %911  ;;  %v867_v58 = vsel %vm866_vm9, %v3223_v55, -inf  ;;  %v964_v4 = vpop.xlane.xlu1 %963 }
 0x457   :  { %v913_v60 = vmul.f32 0.125, %v912_v56  ;;  %868 = vmax.xlane.f32.xlu0 %v867_v58  ;;  %v965_v10 = vmul.f32 0.125, %v964_v4 }
 0x459   :  { %v918_v62 = vsel %vm800_vm15, %v909_v59, %v913_v60  ;;  %v2302_v34 = vpop.eup %2301 }
 0x45a   :  { %v960_v63 = vpop.xlane.xlu0 %959  ;;  %v3232_v0 = vsel %vm802_vm5, %v918_v62, %v917_v61  ;;  %v955_v3 = vsel %vm802_vm5, %v918_v62, 0.0  ;;  %v759_v41 = vmul.f32 1.0614054, %v2302_v34 }
 0x45b   :  { %v921_v5 = vsel %vm920_vm10, %v3232_v0, -inf  ;;  %v3238_v8 = vsel %vm846_vm7, %v955_v3, %v917_v61  ;;  %v961_v9 = vmul.f32 0.125, %v960_v63 }
 0x45c   :  { %922 = vmax.xlane.f32.xlu1 %v921_v5  ;;  %v760_v44 = vadd.f32 -1.4531521, %v759_v41 }
 0x45d   :  { %v970_v13 = vsel %vm800_vm15, %v961_v9, %v965_v10 }
 0x45e   :  { %v968_v11 = vpop.xlane.xlu0 %967 }
 0x45f   :  { %v969_v12 = vmul.f32 0.125, %v968_v11 }
 0x461   :  { %v3242_v14 = vsel %vm802_vm5, %v970_v13, %v969_v12 }
 0x462   :  { %v973_v17 = vsel %vm972_vm11, %v3242_v14, -inf }
 0x463   :  { %974 = vmax.xlane.f32.xlu0 %v973_v17 }
 0x4c4   :  { %v1071_v30 = vpop.xlane.xlu1 %1070 }
 0x4c5   :  { %v1072_v31 = vsub.f32 %v3174_v37, %v1071_v30  ;;  %v761_v37 = vmul.f32 %v2302_v34, %v760_v44  ;;  %v2700_v30 = vmov 0   ;;  %v750_v44 = vmul.f32 0.5, %v3246_v25 }
 0x4c6   :  { %2265 = vset.pattern.permute.xlu1 %v2700_v30 }
 0x4c7   :  { %v1073_v33 = vmul.f32 1.442695, %v1072_v31  ;;  %v762_v36 = vadd.f32 1.4214138, %v761_v37 }
 0x4c9   :  { %2303 = vpow2.f32 %v1073_v33  ;;  %v763_v58 = vmul.f32 %v2302_v34, %v762_v36  ;;  %v2702_v36 = vmov 2  }
 0x4cb   :  { %v764_v63 = vadd.f32 -0.28449672, %v763_v58 }
 0x4cc   :  { %v1132_v38 = vpop.xlane.xlu0 %1131 }
 0x4cd   :  { %v1133_v39 = vsub.f32 %v3185_v6, %v1132_v38  ;;  %v768_v6 = vsub.f32 0.0, %v754_v27 }
 0x4cf   :  { %v1134_v40 = vmul.f32 1.442695, %v1133_v39  ;;  %v769_v56 = vmul.f32 %v768_v6, %v754_v27 }
 0x4d1   :  { %2305 = vpow2.f32 %v1134_v40  ;;  %v1184_v18 = vpop.xlane.xlu1 %1183  ;;  %v770_v62 = vmul.f32 1.442695, %v769_v56  ;;  %v753_v40 = vsel %vm752_vm12, 1.0, %v2697_v15 }
 0x4d2   :  { %v1185_v42 = vsub.f32 %v3194_v20, %v1184_v18 }
 0x4d3   :  { %v3255_v43 = vpop.eup %2303 }
 0x4d4   :  { %v1186_v47 = vmul.f32 1.442695, %v1185_v42  ;;  %v1075_v48 = vsel %vm804_vm8, %v3255_v43, 0.0 }
 0x4d5   :  { %1076 = vadd.xlane.f32.xlu1 %v1075_v48 }
 0x4d6   :  { %2307 = vpow2.f32 %v1186_v47 }
 0x4d8   :  { %v1234_v49 = vpop.xlane.xlu0 %1233 }
 0x4d9   :  { %v1235_v50 = vsub.f32 %v3204_v32, %v1234_v49 }
 0x4db   :  { %v3260_v51 = vpop.eup %2305  ;;  %v1236_v52 = vmul.f32 1.442695, %v1235_v50 }
 0x4dc   :  { %v1136_v20 = vsel %vm866_vm9, %v3260_v51, 0.0 }
 0x4dd   :  { %2309 = vpow2.f32 %v1236_v52  ;;  %1137 = vadd.xlane.f32.xlu0 %v1136_v20  ;;  %v807_v53 = vpop.xlane.xlu1 %806 }
 0x4de   :  { %v808_v54 = vsub.f32 %v3212_v45, %v807_v53  ;;  %v765_v45 = vmul.f32 %v2302_v34, %v764_v63 }
 0x4e0   :  { %v3265_v59 = vpop.eup %2307  ;;  %v809_v60 = vmul.f32 1.442695, %v808_v54  ;;  %v766_v13 = vadd.f32 0.2548296, %v765_v45 }
 0x4e1   :  { %v1188_v61 = vsel %vm920_vm10, %v3265_v59, 0.0 }
 0x4e2   :  { %2311 = vpow2.f32 %v809_v60  ;;  %1189 = vadd.xlane.f32.xlu1 %v1188_v61  ;;  %v767_v22 = vmul.f32 %v2302_v34, %v766_v13 }
 0x4e3   :  { %2313 = vpow2.f32 %v770_v62 }
 0x4e4   :  { %v869_v3 = vpop.xlane.xlu0 %868 }
 0x4e5   :  { %v870_v4 = vsub.f32 %v3223_v55, %v869_v3 }
 0x4e7   :  { %v3270_v5 = vpop.eup %2309  ;;  %v871_v9 = vmul.f32 1.442695, %v870_v4 }
 0x4e8   :  { %v1238_v10 = vsel %vm972_vm11, %v3270_v5, 0.0 }
 0x4e9   :  { %2315 = vpow2.f32 %v871_v9  ;;  %1239 = vadd.xlane.f32.xlu0 %v1238_v10  ;;  %v923_v11 = vpop.xlane.xlu1 %922 }
 0x4ea   :  { %v924_v12 = vsub.f32 %v3232_v0, %v923_v11 }
 0x4ec   :  { %v3275_v17 = vpop.eup %2311  ;;  %v925_v19 = vmul.f32 1.442695, %v924_v12 }
 0x4ed   :  { %v811_v55 = vsel %vm804_vm8, %v3275_v17, 0.0  ;;  %v2314_v23 = vpop.eup %2313  ;;  %vm1888_vm8 = vcmask 424960  }
 0x4ee   :  { %2317 = vpow2.f32 %v925_v19  ;;  %812 = vadd.xlane.f32.xlu1 %v811_v55  ;;  %v772_v31 = vmul.f32 %v2314_v23, %v767_v22 }
 0x4f0   :  { %v975_v27 = vpop.xlane.xlu0 %974  ;;  %v773_v34 = vsub.f32 1.0, %v772_v31 }
 0x4f1   :  { %v976_v28 = vsub.f32 %v3242_v14, %v975_v27 }
 0x4f2   :  { %v774_v18 = vmul.f32 %v773_v34, %v753_v40 }
 0x4f3   :  { %v3282_v0 = vpop.eup %2315  ;;  %v977_v33 = vmul.f32 1.442695, %v976_v28 }
 0x4f4   :  { %v873_v38 = vsel %vm866_vm9, %v3282_v0, 0.0  ;;  %v775_v47 = vadd.f32 1.0, %v774_v18  ;;  %vm1890_vm9 = vcmask 556032  }
 0x4f5   :  { %2319 = vpow2.f32 %v977_v33  ;;  %874 = vadd.xlane.f32.xlu0 %v873_v38 }
 0x4f6   :  { %v3297_v48 = vmul.f32 %v775_v47, %v750_v44 }
 0x4f8   :  { %v3287_v39 = vpop.eup %2317  ;;  %v3300_v37 = vrot.slane %v3297_v48, 2  ;;  %v3321_v60 = vrot.slane %v3297_v48, 4 }
 0x4f9   :  { %v927_v41 = vsel %vm920_vm10, %v3287_v39, 0.0 }
 0x4fa   :  { %928 = vadd.xlane.f32.xlu1 %v927_v41 }
 0x4ff   :  { %v3292_v42 = vpop.eup %2319 }
 0x500   :  { %v979_v26 = vsel %vm972_vm11, %v3292_v42, 0.0 }
 0x501   :  { %980 = vadd.xlane.f32.xlu0 %v979_v26 }
 0x50b   :  { %1085 = vrot.lane.b32.xlu1 %v3300_v37, %s2701_s8 }
 0x562   :  { %v1077_v49 = vpop.xlane.xlu1 %1076 }
 0x563   :  { %2321 = vrcp.f32 %v1077_v49 }
 0x56a   :  { %v1138_v50 = vpop.xlane.xlu0 %1137 }
 0x56b   :  { %2323 = vrcp.f32 %v1138_v50 }
 0x56d   :  { %v2322_v6 = vpop.eup %2321 }
 0x56e   :  { %v3305_v25 = vmul.f32 %v2322_v6, %v3255_v43 }
 0x56f   :  { %v1190_v52 = vpop.xlane.xlu1 %1189 }
 0x570   :  { %2325 = vrcp.f32 %v1190_v52  ;;  %1090 = vperm.xlu0 %2266, %v3305_v25   ;;  %1082 = vperm.xlu1 %2265, %v3305_v25  }
 0x574   :  { %2273 = vset.pattern.permute.xlu0 %v2702_v36 }
 0x575   :  { %v2324_v20 = vpop.eup %2323 }
 0x576   :  { %v3311_v53 = vmul.f32 %v2324_v20, %v3260_v51  ;;  %v1240_v58 = vpop.xlane.xlu0 %1239 }
 0x578   :  { %1143 = vperm.xlu1 %2265, %v3311_v53  }
 0x57a   :  { %v2326_v54 = vpop.eup %2325 }
 0x57b   :  { %v3315_v56 = vmul.f32 %v2326_v54, %v3265_v59  ;;  %v813_v43 = vpop.xlane.xlu1 %812 }
 0x57c   :  { %2327 = vrcp.f32 %v813_v43  ;;  %2267 = vset.pattern.permute.xlu1 %v2699_v29 }
 0x57d   :  { %1206 = vperm.xlu0 %2273, %v3315_v56   ;;  %1148 = vperm.xlu1 %2267, %v3311_v53  }
 0x581   :  { %1093 = vrot.lane.b32.xlu0 %v3321_v60, %s2701_s8  ;;  %2268 = vset.pattern.permute.xlu1 %v2700_v30 }
 0x582   :  { %v875_v51 = vpop.xlane.xlu0 %874  ;;  %1195 = vperm.xlu1 %2268, %v3315_v56   ;;  %2275 = vset.pattern.permute.xlu0 %v2700_v30 }
 0x583   :  { %2329 = vrcp.f32 %v875_v51 }
 0x584   :  { %2331 = vrcp.f32 %v1240_v58 }
 0x586   :  { %v2328_v59 = vpop.eup %2327  ;;  %2269 = vset.pattern.permute.xlu1 %v2699_v29 }
 0x587   :  { %1200 = vperm.xlu1 %2269, %v3315_v56   ;;  %v3331_v61 = vmul.f32 %v2328_v59, %v3275_v17  ;;  %v929_v11 = vpop.xlane.xlu1 %928 }
 0x589   :  { %818 = vperm.xlu0 %2275, %v3331_v61  }
 0x58b   :  { %2270 = vset.pattern.permute.xlu1 %v2702_v36  ;;  %v1086_v17 = vpop.permute.xlu1 %1085 }
 0x58c   :  { %1099 = vperm.xlu1 %2270, %v3305_v25  }
 0x58d   :  { %2279 = vset.pattern.permute.xlu0 %v2702_v36  ;;  %v2330_v62 = vpop.eup %2329 }
 0x58e   :  { %v981_v63 = vpop.xlane.xlu0 %980  ;;  %834 = vperm.xlu0 %2279, %v3331_v61   ;;  %v2332_v3 = vpop.eup %2331  ;;  %v3340_v4 = vmul.f32 %v2330_v62, %v3282_v0 }
 0x58f   :  { %2333 = vrcp.f32 %v981_v63  ;;  %v3345_v9 = vmul.f32 %v2332_v3, %v3270_v5  ;;  %v3359_v5 = vrot.slane %v3297_v48, 6 }
 0x590   :  { %1154 = vperm.xlu1 %2270, %v3311_v53   ;;  %2335 = vrcp.f32 %v929_v11 }
 0x592   :  { %2280 = vset.pattern.permute.xlu0 %v2699_v29 }
 0x593   :  { %885 = vperm.xlu0 %2280, %v3340_v4  }
 0x594   :  { %2271 = vset.pattern.permute.xlu1 %v2700_v30 }
 0x595   :  { %1245 = vperm.xlu1 %2271, %v3345_v9  }
 0x599   :  { %v2334_v45 = vpop.eup %2333  ;;  %2272 = vset.pattern.permute.xlu1 %v2699_v29 }
 0x59a   :  { %1250 = vperm.xlu1 %2272, %v3345_v9   ;;  %v3352_v10 = vmul.f32 %v2334_v45, %v3292_v42  ;;  %v2336_v12 = vpop.eup %2335 }
 0x59b   :  { %v3368_v13 = vmul.f32 %v2336_v12, %v3287_v39  ;;  %v1322_v12 = vrot.slane %v3128_v16, 2 }
 0x59c   :  { %991 = vperm.xlu0 %2280, %v3352_v10  }
 0x59e   :  { %2274 = vset.pattern.permute.xlu1 %v2702_v36 }
 0x59f   :  { %1256 = vperm.xlu1 %2274, %v3345_v9  }
 0x5a0   :  { %2284 = vset.pattern.permute.xlu0 %v2702_v36 }
 0x5a3   :  { %1102 = vrot.lane.b32.xlu1 %v3359_v5, %s2701_s8 }
 0x5a4   :  { %2276 = vset.pattern.permute.xlu1 %v2699_v29 }
 0x5a7   :  { %826 = vperm.xlu1 %2276, %v3331_v61  }
 0x5ab   :  { %2277 = vset.pattern.permute.xlu1 %v2700_v30 }
 0x5ac   :  { %880 = vperm.xlu1 %2277, %v3340_v4  }
 0x5b0   :  { %934 = vperm.xlu1 %2277, %v3368_v13  }
 0x5b4   :  { %2278 = vset.pattern.permute.xlu1 %v2699_v29 }
 0x5b5   :  { %939 = vperm.xlu1 %2278, %v3368_v13  }
 0x5b9   :  { %2281 = vset.pattern.permute.xlu1 %v2702_v36 }
 0x5ba   :  { %891 = vperm.xlu1 %2281, %v3340_v4  }
 0x5be   :  { %2282 = vset.pattern.permute.xlu1 %v2700_v30 }
 0x5bf   :  { %986 = vperm.xlu1 %2282, %v3352_v10  }
 0x5c3   :  { %2283 = vset.pattern.permute.xlu1 %v2702_v36 }
 0x5c4   :  { %945 = vperm.xlu1 %2283, %v3368_v13  }
 0x5c8   :  { %997 = vperm.xlu1 %2283, %v3352_v10  }
 0x5ef   :  { %v1083_v19 = vpop.permute.xlu1 %1082  ;;  %v1091_v0 = vpop.permute.xlu0 %1090 }
 0x5f0   :  { %v1088_v40 = vmul.f32 %v1086_v17, %v1083_v19 }
 0x5f7   :  { %v1144_v55 = vpop.permute.xlu1 %1143 }
 0x5fc   :  { %v1149_v22 = vpop.permute.xlu1 %1148  ;;  %v1207_v33 = vpop.permute.xlu0 %1206 }
 0x5fd   :  { %v1151_v41 = vmul.f32 %v1149_v22, %v1086_v17  ;;  %v1209_v20 = vmul.f32 %v1207_v33, %v1086_v17  ;;  %v1325_v22 = vrot.slane %v3128_v16, 4 }
 0x600   :  { %v1094_v38 = vpop.permute.xlu0 %1093 }
 0x601   :  { %v1196_v23 = vpop.permute.xlu1 %1195  ;;  %v1096_v39 = vmul.f32 %v1094_v38, %v1091_v0 }
 0x602   :  { %v1198_v18 = vmul.f32 %v1196_v23, %v1094_v38 }
 0x603   :  { %v1097_v44 = vadd.f32 %v1096_v39, %v1088_v40 }
 0x606   :  { %v1201_v27 = vpop.permute.xlu1 %1200 }
 0x60b   :  { %v1100_v28 = vpop.permute.xlu1 %1099 }
 0x60f   :  { %v1155_v29 = vpop.permute.xlu1 %1154 }
 0x610   :  { %v1157_v49 = vmul.f32 %v1155_v29, %v1094_v38  ;;  %v1328_v29 = vrot.slane %v3128_v16, 6 }
 0x614   :  { %v1246_v31 = vpop.permute.xlu1 %1245 }
 0x615   :  { %v1248_v54 = vmul.f32 %v1246_v31, %v1086_v17  ;;  %v819_v17 = vpop.permute.xlu0 %818 }
 0x619   :  { %v1251_v30 = vpop.permute.xlu1 %1250  ;;  %v835_v23 = vpop.permute.xlu0 %834 }
 0x61a   :  { %v1253_v50 = vmul.f32 %v1251_v30, %v1094_v38 }
 0x61c   :  { %v1254_v51 = vadd.f32 %v1253_v50, %v1248_v54 }
 0x61d   :  { %v886_v31 = vpop.permute.xlu0 %885 }
 0x61e   :  { %v1257_v34 = vpop.permute.xlu1 %1256 }
 0x621   :  { %v992_v40 = vpop.permute.xlu0 %991 }
 0x622   :  { %v1103_v42 = vpop.permute.xlu1 %1102  ;;  %v994_v54 = vmul.f32 %v992_v40, %v3321_v60 }
 0x623   :  { %v1105_v47 = vmul.f32 %v1103_v42, %v1100_v28  ;;  %v1146_v26 = vmul.f32 %v1144_v55, %v1103_v42  ;;  %v1203_v48 = vmul.f32 %v1201_v27, %v1103_v42  ;;  %v1259_v58 = vmul.f32 %v1257_v34, %v1103_v42 }
 0x624   :  { %v1324_v55 = vadd.f32 %v1322_v12, %v3128_v16  ;;  %v824_v34 = vmul.f32 %v3300_v37, %v819_v17 }
 0x625   :  { %v1106_v6 = vadd.f32 %v1105_v47, %v1097_v44  ;;  %v1152_v52 = vadd.f32 %v1151_v41, %v1146_v26  ;;  %v1204_v36 = vadd.f32 %v1203_v48, %v1198_v18  ;;  %v1260_v62 = vadd.f32 %v1259_v58, %v1254_v51 }
 0x626   :  { %v827_v63 = vpop.permute.xlu1 %826  ;;  %v1327_v28 = vadd.f32 %v1325_v22, %v1324_v55  ;;  %v888_v18 = vmul.f32 %v886_v31, %v3300_v37  ;;  %v839_v26 = vmul.f32 %v3359_v5, %v835_v23 }
 0x627   :  { %1300 = vrot.lane.b32.xlu0 %v1106_v6, %s2678_s26  ;;  %v1158_v43 = vadd.f32 %v1157_v49, %v1152_v52  ;;  %v1210_v59 = vadd.f32 %v1209_v20, %v1204_v36  ;;  %v831_v30 = vmul.f32 %v3321_v60, %v827_v63 }
 0x628   :  { %v1330_v0 = vadd.f32 %v1328_v29, %v1327_v28 }
 0x629   :  { %1305 = vrot.lane.b32.xlu1 %v1158_v43, %s2678_s26  ;;  %v832_v42 = vadd.f32 %v831_v30, %v824_v34 }
 0x62a   :  { %v1332_v38 = vsub.f32 %v1330_v0, %v1322_v12  ;;  %v1333_v41 = vsub.f32 %v1330_v0, %v1325_v22  ;;  %v1331_v49 = vsub.f32 %v1330_v0, %v3128_v16  ;;  %v1334_v58 = vsub.f32 %v1330_v0, %v1328_v29 }
 0x62b   :  { %1310 = vrot.lane.b32.xlu0 %v1210_v59, %s2678_s26  ;;  %v881_v3 = vpop.permute.xlu1 %880  ;;  %v840_v59 = vadd.f32 %v839_v26, %v832_v42  ;;  %v1379_v42 = vld [vmem:[%s3652_s12 + $0x8] sm:$0xff]  ;;  %v1381_v26 = vld [vmem:[%s3652_s12 + $0x18] sm:$0xff] }
 0x62c   :  { %v883_v39 = vmul.f32 %v881_v3, %v3359_v5  ;;  %v1336_v50 = vrot.slane %v1332_v38, 6  ;;  %v1339_v51 = vrot.slane %v1333_v41, 4  ;;  %v1342_v55 = vrot.slane %v1334_v58, 2 }
 0x62d   :  { %1315 = vrot.lane.b32.xlu1 %v1260_v62, %s2678_s26 }
 0x62e   :  { %v889_v6 = vadd.f32 %v888_v18, %v883_v39  ;;  %v1344_v16 = vsel %vm250_vm1, %v1331_v49, %v1336_v50  ;;  %v1378_v18 = vld [vmem:[%s3652_s12] sm:$0xff]  ;;  %v1383_v50 = vld [vmem:[%s3652_s12 + $0x28] sm:$0xff] }
 0x62f   :  { %v935_v45 = vpop.permute.xlu1 %934  ;;  %v1382_v49 = vld [vmem:[%s3652_s12 + $0x20] sm:$0xff] }
 0x630   :  { %v937_v52 = vmul.f32 %v935_v45, %v3321_v60 }
 0x634   :  { %v940_v11 = vpop.permute.xlu1 %939 }
 0x635   :  { %v942_v44 = vmul.f32 %v940_v11, %v3359_v5 }
 0x637   :  { %v943_v62 = vadd.f32 %v942_v44, %v937_v52  ;;  %v2172_v44 = vpack.c.bf16 %v1379_v42, %v1378_v18  ;;  %v1384_v52 = vld [vmem:[%s3652_s12 + $0x30] sm:$0xff] }
 0x639   :  { %v892_v19 = vpop.permute.xlu1 %891  ;;  %2173 = vmatpush3.bf16.msra.mxu0 %v2172_v44 }
 0x63a   :  { %v894_v47 = vmul.f32 %v892_v19, %v3321_v60  ;;  %2174 = vmatprep.subr.bf16.mxu0 %v2694_v1 }
 0x63c   :  { %v895_v63 = vadd.f32 %v894_v47, %v889_v6  ;;  %v1380_v47 = vld [vmem:[%s3652_s12 + $0x10] sm:$0xff]  ;;  %v2178_v6 = vpack.c.bf16 %v1383_v50, %v1382_v49 }
 0x63e   :  { %v987_v27 = vpop.permute.xlu1 %986 }
 0x63f   :  { %v989_v36 = vmul.f32 %v987_v27, %v3300_v37  ;;  %v1345_v27 = vsel %vm252_vm2, %v1344_v16, %v1339_v51  ;;  %v1923_v16 = vld [vmem:[#allocation18] ss:$0 sm:$0xff] }
 0x640   :  { %v1346_v31 = vsel %vm254_vm3, %v1345_v27, %v1342_v55 }
 0x641   :  { %v995_v12 = vadd.f32 %v994_v54, %v989_v36  ;;  %v1385_v36 = vld [vmem:[%s3652_s12 + $0x38] sm:$0xff]  ;;  %s2703_s12 = smov 1  }
 0x643   :  { %v946_v33 = vpop.permute.xlu1 %945 }
 0x644   :  { %v948_v20 = vmul.f32 %v946_v33, %v3300_v37 }
 0x646   :  { %v949_v17 = vadd.f32 %v948_v20, %v943_v62  ;;  %v2181_v20 = vpack.c.bf16 %v1385_v36, %v1384_v52 }
 0x647   :  { %v998_v48 = vpop.permute.xlu1 %997 }
 0x648   :  { %v1000_v3 = vmul.f32 %v998_v48, %v3359_v5  ;;  %v2175_v48 = vpack.c.bf16 %v1381_v26, %v1380_v47 }
 0x64a   :  { %v1001_v22 = vadd.f32 %v1000_v3, %v995_v12  ;;  %2176 = vmatpush3.bf16.msra.mxu0 %v2175_v48 }
 0x64b   :  { %2177 = vmatprep.subr.bf16.mxu0 %v2694_v1 }
 0x64e   :  { %2179 = vmatpush3.bf16.msra.mxu0 %v2178_v6 }
 0x64f   :  { %2180 = vmatprep.subr.bf16.mxu0 %v2694_v1 }
 0x652   :  { %2182 = vmatpush3.bf16.msra.mxu0 %v2181_v20 }
 0x653   :  { %2207 = vmatprep.subr.bf16.mxu0 %v2694_v1 }
 0x699   :  { %v1301_v43 = vpop.permute.xlu0 %1300 }
 0x69a   :  { %v1303_v45 = vsel %vm279_vm4, %v840_v59, %v1301_v43  ;;  %v1921_v59 = vld [vmem:[#allocation15] ss:$0 sm:$0xff] }
 0x69b   :  { %v1306_v11 = vpop.permute.xlu1 %1305 }
 0x69c   :  { %v1308_v19 = vsel %vm279_vm4, %v895_v63, %v1306_v11  ;;  %v1922_v63 = vld [vmem:[#allocation17] ss:$0 sm:$0xff] }
 0x69d   :  { %v1319_v37 = vsel %vm250_vm1, %v1303_v45, %v1308_v19  ;;  %v1311_v60 = vpop.permute.xlu0 %1310 }
 0x69e   :  { %v1313_v23 = vsel %vm279_vm4, %v949_v17, %v1311_v60 }
 0x69f   :  { %v1320_v5 = vsel %vm252_vm2, %v1319_v37, %v1313_v23  ;;  %v1316_v28 = vpop.permute.xlu1 %1315  ;;  %vm1019_vm2 = vcmask 31744  }
 0x6a0   :  { %v1318_v29 = vsel %vm279_vm4, %v1001_v22, %v1316_v28  ;;  %vm1023_vm4 = vcmask 97280  }
 0x6a1   :  { %v1321_v0 = vsel %vm254_vm3, %v1320_v5, %v1318_v29  ;;  %vm1021_vm3 = vcmask 64512  }
 0x6a2   :  { %v1347_v33 = vadd.f32 %v1346_v31, %v1321_v0 }
 0x6a4   :  { %v1350_v30 = vsel %vm533_vm6, %v1347_v33, 0.0 }
 0x6a5   :  { %1351 = vadd.xlane.f32.xlu0 %v1350_v30 }
 0x732   :  { %v1352_v38 = vpop.xlane.xlu0 %1351 }
 0x733   :  { %v1354_v34 = vmul.f32 0.015625, %v1352_v38 }
 0x735   :  { %v1355_v39 = vsub.f32 %v1347_v33, %v1354_v34 }
 0x737   :  { %v1356_v40 = vmul.f32 %v1355_v39, %v1355_v39 }
 0x739   :  { %v1357_v41 = vsel %vm533_vm6, %v1356_v40, 0.0 }
 0x73a   :  { %1358 = vadd.xlane.f32.xlu1 %v1357_v41 }
 0x7c7   :  { %v1359_v54 = vpop.xlane.xlu1 %1358 }
 0x7c8   :  { %v1360_v43 = vmul.f32 0.015625, %v1359_v54 }
 0x7ca   :  { %v1361_v58 = vadd.f32 1e-05, %v1360_v43  ;;  %v1528_v43 = vld [vmem:[%s3656_s16] sm:$0xff] }
 0x7cc   :  { %2337 = vrsqrt.f32 %v1361_v58  ;;  %v1529_v58 = vld [vmem:[%s3656_s16 + $0x8] sm:$0xff] }
 0x7d6   :  { %v2338_v51 = vpop.eup %2337 }
 0x7d7   :  { %v1363_v62 = vmul.f32 %v2338_v51, %v1355_v39  ;;  %v1530_v51 = vld [vmem:[%s3656_s16 + $0x10] sm:$0xff] }
 0x7d9   :  { %v1370_v3 = vmul.f32 %v1921_v59, %v1363_v62  ;;  %v2184_v59 = vpack.c.bf16 %v1529_v58, %v1528_v43  ;;  %v1531_v62 = vld [vmem:[%s3656_s16 + $0x18] sm:$0xff]  ;;  %v1031_v43 = vrot.slane %v3238_v8, 4 }
 0x7da   :  { %v1649_v58 = vld [vmem:[#allocation23 + $0x8] sm:$0xff] }
 0x7db   :  { %v1377_v11 = vadd.f32 %v1922_v63, %v1370_v3  ;;  %2185 = vmatpush3.bf16.msra.mxu1 %v2184_v59  ;;  %v2187_v63 = vpack.c.bf16 %v1531_v62, %v1530_v51  ;;  %v1533_v3 = vld [vmem:[%s3656_s16 + $0x28] sm:$0xff]  ;;  %v1650_v59 = vld [vmem:[#allocation23 + $0x10] sm:$0xff] }
 0x7dc   :  { %2186 = vmatprep.subr.bf16.mxu1 %v2694_v1  ;;  %v1651_v62 = vld [vmem:[#allocation23 + $0x18] sm:$0xff] }
 0x7dd   :  { %2056 = vmatmul.mubr.msk.f32.vlgmr.msra.gmra.mrb[2].mxu0 %vm533_vm6, %v1377_v11 }
 0x7de   :  { %2109 = vmatprep.mubr.msk.f32.mxu0 %vm2695_vm0, %v2696_v2 }
 0x7df   :  { %2188 = vmatpush3.bf16.msra.mxu1 %v2187_v63  ;;  %v2211_v63 = vpack.c.bf16 %v1651_v62, %v1650_v59 }
 0x7e0   :  { %2189 = vmatprep.subr.bf16.mxu1 %v2694_v1 }
 0x8b0   :  { %v1462_v12 = vpop.f32.mrb[2].mxu0 }
 0x8b1   :  { %v1463_v17 = vadd.f32 %v1923_v16, %v1462_v12  ;;  %v2057_v45 = vpop.f32.mrb[3].mxu0  ;;  %v1534_v16 = vld [vmem:[%s3656_s16 + $0x30] sm:$0xff]  ;;  %v1535_v12 = vld [vmem:[%s3656_s16 + $0x38] sm:$0xff] }
 0x8b2   :  { %v1536_v45 = vld [vmem:[%s3656_s16 + $0x40] sm:$0xff] }
 0x8b3   :  { %v1467_v19 = vmul.f32 0.70710677, %v1463_v17  ;;  %v1466_v47 = vmul.f32 0.5, %v1463_v17  ;;  %v2193_v17 = vpack.c.bf16 %v1535_v12, %v1534_v16 }
 0x8b5   :  { %v1470_v37 = vand.u32 2147483647, %v1467_v19  ;;  %vm1468_vm1 = vcmp.ge.f32.partialorder %v1467_v19, 0.0  ;;  %v1537_v19 = vld [vmem:[%s3656_s16 + $0x48] sm:$0xff] }
 0x8b6   :  { %v1469_v42 = vsel %vm1468_vm1, 1.0, %v2697_v15 }
 0x8b7   :  { %v1471_v60 = vmul.f32 0.3275911, %v1470_v37  ;;  %v1484_v22 = vsub.f32 0.0, %v1470_v37 }
 0x8b9   :  { %v1472_v55 = vadd.f32 1.0, %v1471_v60  ;;  %v1485_v27 = vmul.f32 %v1484_v22, %v1470_v37  ;;  %v2196_v37 = vpack.c.bf16 %v1537_v19, %v1536_v45  ;;  %v1538_v60 = vld [vmem:[%s3656_s16 + $0x50] sm:$0xff]  ;;  %v1654_v19 = vld [vmem:[#allocation23 + $0x30] sm:$0xff] }
 0x8bb   :  { %2339 = vrcp.f32 %v1472_v55  ;;  %v1486_v29 = vmul.f32 1.442695, %v1485_v27  ;;  %v1539_v55 = vld [vmem:[%s3656_s16 + $0x58] sm:$0xff]  ;;  %v1541_v27 = vld [vmem:[%s3656_s16 + $0x68] sm:$0xff] }
 0x8bc   :  { %v2199_v22 = vpack.c.bf16 %v1539_v55, %v1538_v60 }
 0x8bd   :  { %2341 = vpow2.f32 %v1486_v29  ;;  %v1543_v29 = vld [vmem:[%s3656_s16 + $0x78] sm:$0xff] }
 0x8c5   :  { %v2340_v23 = vpop.eup %2339 }
 0x8c6   :  { %v1475_v5 = vmul.f32 1.0614054, %v2340_v23 }
 0x8c7   :  { %v2342_v40 = vpop.eup %2341 }
 0x8c8   :  { %v1476_v28 = vadd.f32 -1.4531521, %v1475_v5 }
 0x8ca   :  { %v1477_v0 = vmul.f32 %v2340_v23, %v1476_v28  ;;  %v1542_v28 = vld [vmem:[%s3656_s16 + $0x70] sm:$0xff] }
 0x8cc   :  { %v1478_v31 = vadd.f32 1.4214138, %v1477_v0  ;;  %v2205_v0 = vpack.c.bf16 %v1543_v29, %v1542_v28 }
 0x8ce   :  { %v1479_v33 = vmul.f32 %v2340_v23, %v1478_v31 }
 0x8d0   :  { %v1480_v30 = vadd.f32 -0.28449672, %v1479_v33 }
 0x8d2   :  { %v1481_v38 = vmul.f32 %v2340_v23, %v1480_v30 }
 0x8d4   :  { %v1482_v34 = vadd.f32 0.2548296, %v1481_v38 }
 0x8d6   :  { %v1483_v39 = vmul.f32 %v2340_v23, %v1482_v34  ;;  %v1540_v23 = vld [vmem:[%s3656_s16 + $0x60] sm:$0xff] }
 0x8d7   :  { %v2202_v5 = vpack.c.bf16 %v1541_v27, %v1540_v23  ;;  %v1925_v34 = vld [vmem:[#allocation20] ss:$0 sm:$0xff] }
 0x8d8   :  { %v1488_v41 = vmul.f32 %v2342_v40, %v1483_v39  ;;  %v1926_v40 = vld [vmem:[#allocation21] ss:$0 sm:$0xff] }
 0x8da   :  { %v1489_v18 = vsub.f32 1.0, %v1488_v41 }
 0x8dc   :  { %v1490_v44 = vmul.f32 %v1489_v18, %v1469_v42 }
 0x8de   :  { %v1491_v26 = vadd.f32 1.0, %v1490_v44 }
 0x8e0   :  { %v1492_v48 = vmul.f32 %v1491_v26, %v1466_v47  ;;  %v899_v47 = vsel %vm800_vm15, %v3340_v4, 1.0 }
 0x8e2   :  { %v1493_v49 = vadd.f32 %v1492_v48, %v1377_v11 }
 0x8e4   :  { %v1496_v50 = vsel %vm533_vm6, %v1493_v49, 0.0 }
 0x8e5   :  { %1497 = vadd.xlane.f32.xlu0 %v1496_v50 }
 0x972   :  { %v1498_v6 = vpop.xlane.xlu0 %1497 }
 0x973   :  { %v1499_v52 = vmul.f32 0.015625, %v1498_v6 }
 0x975   :  { %v1500_v36 = vsub.f32 %v1493_v49, %v1499_v52  ;;  %v953_v52 = vsel %vm802_vm5, %v3368_v13, 1.0 }
 0x977   :  { %v1501_v20 = vmul.f32 %v1500_v36, %v1500_v36 }
 0x979   :  { %v1502_v54 = vsel %vm533_vm6, %v1501_v20, 0.0 }
 0x97a   :  { %1503 = vadd.xlane.f32.xlu0 %v1502_v54  ;;  %v1026_v54 = vrot.slane %v3226_v35, 2 }
 0x990   :  { %841 = vrot.lane.b32.xlu0 %v3331_v61, %s2703_s12  ;;  %v1532_v61 = vld [vmem:[%s3656_s16 + $0x20] sm:$0xff]  ;;  %s2704_s16 = smov 4  }
 0x991   :  { %v2190_v11 = vpack.c.bf16 %v1533_v3, %v1532_v61  ;;  %v1652_v3 = vld [vmem:[#allocation23 + $0x20] sm:$0xff] }
 0x993   :  { %2191 = vmatpush3.bf16.msra.mxu1 %v2190_v11  ;;  %v1653_v11 = vld [vmem:[#allocation23 + $0x28] sm:$0xff] }
 0x994   :  { %2192 = vmatprep.subr.bf16.mxu1 %v2694_v1  ;;  %v2214_v16 = vpack.c.bf16 %v1653_v11, %v1652_v3 }
 0x997   :  { %2194 = vmatpush3.bf16.msra.mxu1 %v2193_v17 }
 0x998   :  { %2195 = vmatprep.subr.bf16.mxu1 %v2694_v1 }
 0x99b   :  { %2197 = vmatpush3.bf16.msra.mxu1 %v2196_v37  ;;  %v1655_v37 = vld [vmem:[#allocation23 + $0x38] sm:$0xff] }
 0x99c   :  { %2198 = vmatprep.subr.bf16.mxu1 %v2694_v1  ;;  %v2217_v55 = vpack.c.bf16 %v1655_v37, %v1654_v19 }
 0x99f   :  { %2200 = vmatpush3.bf16.msra.mxu1 %v2199_v22 }
 0x9a0   :  { %2201 = vmatprep.subr.bf16.mxu1 %v2694_v1 }
 0x9a3   :  { %2203 = vmatpush3.bf16.msra.mxu1 %v2202_v5 }
 0x9a4   :  { %2204 = vmatprep.subr.bf16.mxu1 %v2694_v1 }
 0x9a7   :  { %2206 = vmatpush3.bf16.msra.mxu1 %v2205_v0  ;;  %v1214_v0 = vsel %vm802_vm5, %v3315_v56, 1.0 }
 0xa07   :  { %v1504_v31 = vpop.xlane.xlu0 %1503 }
 0xa08   :  { %v1505_v33 = vmul.f32 0.015625, %v1504_v31 }
 0xa0a   :  { %v1506_v30 = vadd.f32 1e-05, %v1505_v33 }
 0xa0b   :  { %v842_v35 = vpop.permute.xlu0 %841 }
 0xa0c   :  { %2343 = vrsqrt.f32 %v1506_v30 }
 0xa16   :  { %v2344_v38 = vpop.eup %2343 }
 0xa17   :  { %v1508_v39 = vmul.f32 %v2344_v38, %v1500_v36  ;;  %v1002_v36 = vsel %vm846_vm7, %v3352_v10, 1.0 }
 0xa19   :  { %v1515_v41 = vmul.f32 %v1925_v34, %v1508_v39  ;;  %v1261_v34 = vsel %vm846_vm7, %v3345_v9, 1.0  ;;  %v844_v39 = vsel %vm800_vm15, 1.0, %v842_v35 }
 0xa1b   :  { %v1522_v18 = vadd.f32 %v1926_v40, %v1515_v41  ;;  %v1282_v40 = vrot.slane %v3188_v7, 2  ;;  %v1262_v41 = vsel %vm846_vm7, %v3204_v32, 0.0  ;;  %v1927_v32 = vld [vmem:[%s3657_s17] ss:$0 sm:$0xff]  ;;  %s2706_s17 = smov 20  }
 0xa1d   :  { %1524 = vrot.lane.b32.xlu1 %v1522_v18, %s2698_s1  ;;  %s2705_s1 = smov 12   ;;  %v1287_v18 = vrot.slane %v3200_v24, 4 }
 0xa21   :  { %896 = vrot.lane.b32.xlu1 %v3340_v4, %s2703_s12  ;;  %v1015_v4 = vrot.slane %v1002_v36, 6 }
 0xa25   :  { %950 = vrot.lane.b32.xlu1 %v3368_v13, %s2703_s12  ;;  %v1003_v13 = vsel %vm846_vm7, %v3242_v14, 0.0  ;;  %v1648_v14 = vld [vmem:[#allocation23] sm:$0xff] }
 0xa26   :  { %v1036_v10 = vrot.slane %v1003_v13, 6  ;;  %v2208_v8 = vpack.c.bf16 %v1649_v58, %v1648_v14 }
 0xa28   :  { %2209 = vmatpush3.bf16.msra.mxu0 %v2208_v8 }
 0xa29   :  { %2210 = vmatprep.subr.bf16.mxu0 %v2694_v1 }
 0xa2c   :  { %2212 = vmatpush3.bf16.msra.mxu0 %v2211_v63 }
 0xa2d   :  { %2213 = vmatprep.subr.bf16.mxu0 %v2694_v1 }
 0xa30   :  { %2215 = vmatpush3.bf16.msra.mxu0 %v2214_v16 }
 0xa31   :  { %2216 = vmatprep.subr.bf16.mxu0 %v2694_v1 }
 0xa34   :  { %2218 = vmatpush3.bf16.msra.mxu0 %v2217_v55 }
 0xa35   :  { %2219 = vmatprep.subr.bf16.mxu0 %v2694_v1 }
 0xa8f   :  { %v1525_v42 = vpop.permute.xlu1 %1524 }
 0xa90   :  { %v1527_v44 = vsel %vm533_vm6, %v3072_v21, %v1525_v42  ;;  %v1292_v42 = vrot.slane %v1262_v41, 6 }
 0xa91   :  { %2091 = vmatmul.mubr.f32.vlgmr.msra.gmra.mrb[6].mxu1 %v1527_v44 }
 0xa93   :  { %v897_v26 = vpop.permute.xlu1 %896 }
 0xa94   :  { %v900_v48 = vsel %vm802_vm5, %v899_v47, %v897_v26 }
 0xa95   :  { %v901_v49 = vsel %vm846_vm7, %v900_v48, %v897_v26 }
 0xa96   :  { %v1005_v50 = vrot.slane %v901_v49, 2 }
 0xa97   :  { %v951_v6 = vpop.permute.xlu1 %950 }
 0xa98   :  { %1006 = vrot.lane.b32.xlu0 %v1005_v50, %s2704_s16  ;;  %v954_v21 = vsel %vm846_vm7, %v953_v52, %v951_v6 }
 0xa99   :  { %v1010_v20 = vrot.slane %v954_v21, 4 }
 0xa9b   :  { %1011 = vrot.lane.b32.xlu1 %v1010_v20, %s2683_s27 }
 0xa9c   :  { %1016 = vrot.lane.b32.xlu0 %v1015_v4, %s2705_s1 }
 0xa9f   :  { %1027 = vrot.lane.b32.xlu1 %v1026_v54, %s2704_s16 }
 0xaa0   :  { %1032 = vrot.lane.b32.xlu0 %v1031_v43, %s2683_s27 }
 0xaa3   :  { %1037 = vrot.lane.b32.xlu1 %v1036_v10, %s2705_s1 }
 0xaa4   :  { %1107 = vrot.lane.b32.xlu0 %v3305_v25, %s2703_s12 }
 0xaa7   :  { %1159 = vrot.lane.b32.xlu1 %v3311_v53, %s2703_s12 }
 0xaa8   :  { %1211 = vrot.lane.b32.xlu0 %v3315_v56, %s2703_s12  ;;  %v845_v56 = vsel %vm802_vm5, %v844_v39, %v842_v35 }
 0xaa9   :  { %v847_v9 = vsel %vm846_vm7, %v845_v56, %v842_v35 }
 0xb0a   :  { %v1007_v51 = vpop.permute.xlu0 %1006 }
 0xb0b   :  { %v1020_v44 = vsel %vm1019_vm2, %v847_v9, %v1007_v51 }
 0xb0d   :  { %v1012_v61 = vpop.permute.xlu1 %1011 }
 0xb0e   :  { %v1017_v25 = vpop.permute.xlu0 %1016  ;;  %v1022_v47 = vsel %vm1021_vm3, %v1020_v44, %v1012_v61 }
 0xb0f   :  { %v1024_v7 = vsel %vm1023_vm4, %v1022_v47, %v1017_v25 }
 0xb11   :  { %v1028_v12 = vpop.permute.xlu1 %1027 }
 0xb12   :  { %v1040_v17 = vsel %vm1019_vm2, %v3215_v46, %v1028_v12  ;;  %v1033_v45 = vpop.permute.xlu0 %1032  ;;  %v1162_v46 = vsel %vm800_vm15, %v3311_v53, 1.0  ;;  %v1274_v53 = vrot.slane %v1261_v34, 6  ;;  %v1770_v34 = vld [vmem:[%s3660_s20 + $0x38] sm:$0xff] }
 0xb13   :  { %v1041_v60 = vsel %vm1021_vm3, %v1040_v17, %v1033_v45 }
 0xb15   :  { %v1038_v22 = vpop.permute.xlu1 %1037 }
 0xb16   :  { %v1108_v23 = vpop.permute.xlu0 %1107  ;;  %v3544_v27 = vsel %vm1023_vm4, %v1041_v60, %v1038_v22 }
 0xb17   :  { %v1110_v51 = vsel %vm800_vm15, 1.0, %v1108_v23 }
 0xb18   :  { %v1111_v61 = vsel %vm802_vm5, %v1110_v51, %v1108_v23 }
 0xb19   :  { %v1160_v5 = vpop.permute.xlu1 %1159  ;;  %v1112_v11 = vsel %vm846_vm7, %v1111_v61, %v1108_v23  ;;  %v1763_v23 = vld [vmem:[%s3660_s20] sm:$0xff] }
 0xb1a   :  { %v1163_v28 = vsel %vm802_vm5, %v1162_v46, %v1160_v5  ;;  %v1212_v29 = vpop.permute.xlu0 %1211 }
 0xb1b   :  { %v1164_v31 = vsel %vm846_vm7, %v1163_v28, %v1160_v5  ;;  %v1215_v33 = vsel %vm846_vm7, %v1214_v0, %v1212_v29  ;;  %v1764_v5 = vld [vmem:[%s3660_s20 + $0x8] sm:$0xff]  ;;  %v1765_v29 = vld [vmem:[%s3660_s20 + $0x10] sm:$0xff] }
 0xb1c   :  { %v1264_v30 = vrot.slane %v1164_v31, 2  ;;  %v1269_v38 = vrot.slane %v1215_v33, 4  ;;  %v2220_v28 = vpack.c.bf16 %v1764_v5, %v1763_v23  ;;  %v1767_v31 = vld [vmem:[%s3660_s20 + $0x20] sm:$0xff]  ;;  %v1768_v33 = vld [vmem:[%s3660_s20 + $0x28] sm:$0xff] }
 0xb1e   :  { %1265 = vrot.lane.b32.xlu1 %v1264_v30, %s2704_s16  ;;  %1270 = vrot.lane.b32.xlu0 %v1269_v38, %s2683_s27  ;;  %v2226_v30 = vpack.c.bf16 %v1768_v33, %v1767_v31  ;;  %v1769_v38 = vld [vmem:[%s3660_s20 + $0x30] sm:$0xff] }
 0xb1f   :  { %v2229_v39 = vpack.c.bf16 %v1770_v34, %v1769_v38 }
 0xb22   :  { %1275 = vrot.lane.b32.xlu1 %v1274_v53, %s2705_s1  ;;  %1283 = vrot.lane.b32.xlu0 %v1282_v40, %s2704_s16  ;;  %v1928_v53 = vld [vmem:[%s3686_s29] ss:$0 sm:$0xff] }
 0xb26   :  { %1288 = vrot.lane.b32.xlu1 %v1287_v18, %s2683_s27  ;;  %1293 = vrot.lane.b32.xlu0 %v1292_v42, %s2705_s1 }
 0xb2a   :  { %1868 = vrot.lane.b32.xlu0 %v1024_v7, %s2704_s16 }
 0xb64   :  { %v1617_v26 = vpop.f32.mrb[6].mxu1 }
 0xb65   :  { %v1618_v48 = vadd.f32 %v1927_v32, %v1617_v26  ;;  %v2092_v24 = vpop.f32.mrb[7].mxu1 }
 0xb67   :  { %v1622_v49 = vmul.f32 0.70710677, %v1618_v48  ;;  %v1621_v19 = vmul.f32 0.5, %v1618_v48 }
 0xb69   :  { %v1625_v50 = vand.u32 2147483647, %v1622_v49  ;;  %vm1623_vm13 = vcmp.ge.f32.partialorder %v1622_v49, 0.0 }
 0xb6a   :  { %v1624_v3 = vsel %vm1623_vm13, 1.0, %v2697_v15 }
 0xb6b   :  { %v1626_v6 = vmul.f32 0.3275911, %v1625_v50  ;;  %v1639_v36 = vsub.f32 0.0, %v1625_v50 }
 0xb6d   :  { %v1627_v52 = vadd.f32 1.0, %v1626_v6  ;;  %v1640_v20 = vmul.f32 %v1639_v36, %v1625_v50 }
 0xb6f   :  { %2345 = vrcp.f32 %v1627_v52  ;;  %v1641_v13 = vmul.f32 1.442695, %v1640_v20 }
 0xb71   :  { %2347 = vpow2.f32 %v1641_v13 }
 0xb79   :  { %v2346_v21 = vpop.eup %2345 }
 0xb7a   :  { %v1630_v4 = vmul.f32 1.0614054, %v2346_v21 }
 0xb7b   :  { %v2348_v62 = vpop.eup %2347 }
 0xb7c   :  { %v1631_v54 = vadd.f32 -1.4531521, %v1630_v4 }
 0xb7e   :  { %v1632_v43 = vmul.f32 %v2346_v21, %v1631_v54 }
 0xb80   :  { %v1633_v10 = vadd.f32 1.4214138, %v1632_v43 }
 0xb82   :  { %v1634_v35 = vmul.f32 %v2346_v21, %v1633_v10 }
 0xb84   :  { %v1635_v14 = vadd.f32 -0.28449672, %v1634_v35 }
 0xb86   :  { %v1636_v58 = vmul.f32 %v2346_v21, %v1635_v14 }
 0xb88   :  { %v1637_v8 = vadd.f32 0.2548296, %v1636_v58  ;;  %v1930_v58 = vld [vmem:[#allocation2] ss:$0 sm:$0xff] }
 0xb8a   :  { %v1638_v59 = vmul.f32 %v2346_v21, %v1637_v8 }
 0xb8c   :  { %v1643_v63 = vmul.f32 %v2348_v62, %v1638_v59 }
 0xb8e   :  { %v1644_v25 = vsub.f32 1.0, %v1643_v63 }
 0xb90   :  { %v1645_v16 = vmul.f32 %v1644_v25, %v1624_v3  ;;  %v1266_v12 = vpop.permute.xlu1 %1265  ;;  %v1271_v45 = vpop.permute.xlu0 %1270 }
 0xb91   :  { %v1278_v17 = vsel %vm1019_vm2, %v1112_v11, %v1266_v12 }
 0xb92   :  { %v1646_v37 = vadd.f32 1.0, %v1645_v16  ;;  %v1279_v55 = vsel %vm1021_vm3, %v1278_v17, %v1271_v45 }
 0xb94   :  { %v1647_v60 = vmul.f32 %v1646_v37, %v1621_v19  ;;  %v1276_v22 = vpop.permute.xlu1 %1275  ;;  %v1284_v62 = vpop.permute.xlu0 %1283 }
 0xb95   :  { %v1280_v46 = vsel %vm1023_vm4, %v1279_v55, %v1276_v22 }
 0xb96   :  { %1872 = vrot.lane.b32.xlu1 %v1280_v46, %s2706_s17  ;;  %2110 = vmatmul.mubr.msk.f32.vlgmr.msra.gmra.mrb[4].mxu0 %vm533_vm6, %v1647_v60 }
 0xb97   :  { %2128 = vmatprep.mubr.msk.f32.mxu0 %vm2695_vm0, %v2696_v2  ;;  %2221 = vmatpush3.bf16.msra.mxu0 %v2220_v28  ;;  %v1766_v2 = vld [vmem:[%s3660_s20 + $0x18] sm:$0xff]  ;;  %s2707_s20 = smov 36  }
 0xb98   :  { %2222 = vmatprep.subr.bf16.mxu0 %v2694_v1  ;;  %v2223_v0 = vpack.c.bf16 %v1766_v2, %v1765_v29  ;;  %v1289_v25 = vpop.permute.xlu1 %1288  ;;  %v1294_v16 = vpop.permute.xlu0 %1293 }
 0xb9b   :  { %2224 = vmatpush3.bf16.msra.mxu0 %v2223_v0 }
 0xb9c   :  { %2225 = vmatprep.subr.bf16.mxu0 %v2694_v1  ;;  %v1869_v45 = vpop.permute.xlu0 %1868 }
 0xb9f   :  { %2227 = vmatpush3.bf16.msra.mxu0 %v2226_v30 }
 0xba0   :  { %2228 = vmatprep.subr.bf16.mxu0 %v2694_v1 }
 0xba3   :  { %2230 = vmatpush3.bf16.msra.mxu0 %v2229_v39 }
 0xc08   :  { %v1873_v17 = vpop.permute.xlu1 %1872 }
 0xc69   :  { %v1732_v40 = vpop.f32.mrb[4].mxu0 }
 0xc6a   :  { %v1733_v56 = vadd.f32 %v1928_v53, %v1732_v40  ;;  %v2111_v41 = vpop.f32.mrb[5].mxu0 }
 0xc6c   :  { %v1737_v9 = vmul.f32 0.70710677, %v1733_v56  ;;  %v1736_v10 = vmul.f32 0.5, %v1733_v56 }
 0xc6e   :  { %v1740_v18 = vand.u32 2147483647, %v1737_v9  ;;  %vm1738_vm0 = vcmp.ge.f32.partialorder %v1737_v9, 0.0 }
 0xc6f   :  { %v1739_v13 = vsel %vm1738_vm0, 1.0, %v2697_v15  ;;  %v1296_v15 = vsel %vm1019_vm2, %v3177_v57, %v1284_v62 }
 0xc70   :  { %v1741_v1 = vmul.f32 0.3275911, %v1740_v18  ;;  %v1754_v44 = vsub.f32 0.0, %v1740_v18  ;;  %v1297_v11 = vsel %vm1021_vm3, %v1296_v15, %v1289_v25 }
 0xc71   :  { %v1298_v12 = vsel %vm1023_vm4, %v1297_v11, %v1294_v16 }
 0xc72   :  { %v1742_v42 = vadd.f32 1.0, %v1741_v1  ;;  %v1755_v7 = vmul.f32 %v1754_v44, %v1740_v18 }
 0xc74   :  { %2349 = vrcp.f32 %v1742_v42  ;;  %v1756_v48 = vmul.f32 1.442695, %v1755_v7 }
 0xc76   :  { %2351 = vpow2.f32 %v1756_v48 }
 0xc7e   :  { %v2350_v47 = vpop.eup %2349 }
 0xc7f   :  { %v1745_v32 = vmul.f32 1.0614054, %v2350_v47 }
 0xc80   :  { %v2352_v20 = vpop.eup %2351 }
 0xc81   :  { %v1746_v26 = vadd.f32 -1.4531521, %v1745_v32 }
 0xc83   :  { %v1747_v24 = vmul.f32 %v2350_v47, %v1746_v26 }
 0xc85   :  { %v1748_v49 = vadd.f32 1.4214138, %v1747_v24 }
 0xc87   :  { %v1749_v50 = vmul.f32 %v2350_v47, %v1748_v49 }
 0xc89   :  { %v1750_v6 = vadd.f32 -0.28449672, %v1749_v50 }
 0xc8b   :  { %v1751_v52 = vmul.f32 %v2350_v47, %v1750_v6 }
 0xc8d   :  { %v1752_v36 = vadd.f32 0.2548296, %v1751_v52 }
 0xc8f   :  { %v1753_v21 = vmul.f32 %v2350_v47, %v1752_v36 }
 0xc91   :  { %v1758_v4 = vmul.f32 %v2352_v20, %v1753_v21 }
 0xc93   :  { %v1759_v54 = vsub.f32 1.0, %v1758_v4 }
 0xc95   :  { %v1760_v43 = vmul.f32 %v1759_v54, %v1739_v13 }
 0xc97   :  { %v1761_v35 = vadd.f32 1.0, %v1760_v43 }
 0xc99   :  { %v1762_v14 = vmul.f32 %v1761_v35, %v1736_v10 }
 0xc9b   :  { %2129 = vmatmul.mubr.msk.f32.vlgmr.msra.gmra.mrb[6].mxu0 %vm533_vm6, %v1762_v14  ;;  %vm1884_vm6 = vcmask 162816  }
 0xd6e   :  { %v1847_v8 = vpop.f32.mrb[6].mxu0 }
 0xd6f   :  { %v1848_v51 = vadd.f32 %v1930_v58, %v1847_v8  ;;  %v2130_v59 = vpop.f32.mrb[7].mxu0 }
 0xd71   :  { %v1856_v63 = vrot.slane %v1848_v51, 4  ;;  %v1852_v61 = vrot.slane %v1848_v51, 2  ;;  %v1860_v3 = vrot.slane %v1848_v51, 6 }
 0xd73   :  { %1857 = vrot.lane.b32.xlu0 %v1856_v63, %s2679_s2  ;;  %1853 = vrot.lane.b32.xlu1 %v1852_v61, %s2703_s12  ;;  %s2710_s2 = smov [#allocation24]  }
 0xd74   :  { %s1899_s12 = sshll.u32 %s2710_s2, 4  ;;  %s1900_s12 = int_to_ptr.vmem [resolvable:$true] %s1899_s12 }
 0xd75   :  { %s2639_s10 = scalar_lea.vmem %s1900_s12, 32  ;;  %p2644_p7 = scmp.lt.s32.totalorder %s1900_s12, %s1900_s12 }
 0xd76   :  { %p2640_p6 = scmp.ne.s32.totalorder %s1900_s12, %s2639_s10  ;;  %p2645_p8 = scmp.lt.s32.totalorder %s2639_s10, %s2639_s10 }
 0xd77   :  { %1876 = vrot.lane.b32.xlu0 %v3544_v27, %s2707_s20  ;;  %1861 = vrot.lane.b32.xlu1 %v1860_v3, %s2708_s30 }
 0xd78   :  { %p2646_p9 = por %p2645_p8, %p2644_p7 }
 0xd7a   :  { %p2647_p10 = pnand %p2646_p9, %p2640_p6 }
 0xd7b   :  { %1880 = vrot.lane.b32.xlu1 %v1298_v12, %s2709_s21 }
 0xde5   :  { %v1854_v19 = vpop.permute.xlu1 %1853  ;;  %v1858_v37 = vpop.permute.xlu0 %1857 }
 0xde6   :  { %v1864_v60 = vsel %vm800_vm15, %v1848_v51, %v1854_v19 }
 0xde7   :  { %v1865_v57 = vsel %vm802_vm5, %v1864_v60, %v1858_v37 }
 0xde9   :  { %v1862_v55 = vpop.permute.xlu1 %1861  ;;  %v1877_v46 = vpop.permute.xlu0 %1876 }
 0xdea   :  { %v1866_v22 = vsel %vm846_vm7, %v1865_v57, %v1862_v55 }
 0xdeb   :  { %v1883_v27 = vsel %vm1019_vm2, %v1866_v22, %v1869_v45 }
 0xdec   :  { %v1885_v23 = vsel %vm1884_vm6, %v1883_v27, %v1873_v17 }
 0xded   :  { %v1887_v5 = vsel %vm1886_vm14, %v1885_v23, %v1877_v46  ;;  %v1881_v28 = vpop.permute.xlu1 %1880 }
 0xdee   :  { %v1889_v29 = vsel %vm1888_vm8, %v1887_v5, %v1881_v28 }
 0xdef   :  { %v1891_v2 = vsel %vm1890_vm9, %v1889_v29, 0.0 }
 0xdf0   :  { %1892 = vst [vmem:[#allocation24] sm:$0x3] %v1891_v2 }
 0xdf1   :  { %2650 = shalt.err (!%p2647_p10)
}
 0xdf2   :  { %s3687_s1 = sld [smem:[#allocation41_spill]] }
 0xdf8   :  { %s2651_s26 = scalar_lea.hbm %s3687_s1, 32 }
 0xdf9   :  { %p2652_p11 = scmp.ne.s32.totalorder %s3687_s1, %s2651_s26  ;;  %p2655_p12 = scmp.lt.u32.totalorder %s2651_s26, %s3687_s1 }
 0xdfb   :  { %p2657_p13 = pnand %p2655_p12, %p2652_p11 }
 0xdfd   :  { %2660 = shalt.err (!%p2657_p13)
}
 0xdfe   :  { %1902 = dma.vmem_to_hbm [thread:$0]  %s1900_s12, 32, %s3687_s1, [#allocation5]  }
 0xdff   :  { %2675 = dma.done.wait [#allocation5], 32  }
 0xe00   :  { %2676 = vsyncadd [#allocation5], 4294967264 }
 0xe01   :  { %1906 = vsyncpa [#allocation4], 1 }
 0xe02   :  { %1907 = vsyncpa [#allocation7], 1 }
 0xe03   :  { %1908 = vsyncpa [#allocation10], 1 }
 0xe04   :  { %1909 = vsyncpa [#allocation13], 1 }
 0xe05   :  { %1910 = vsyncpa [#allocation16], 1 }
 0xe06   :  { %1911 = vsyncpa [#allocation19], 1 }
 0xe07   :  { %1912 = vsyncpa [#allocation22], 1 }
 0xe08   :  { %1913 = vsyncpa [#allocation5], 1 }

</bundles_post_ra>
